<compile_context>
chip_gen: v6e
topology: v6e:2x2x1
jax: 0.10.0
libtpu: 0.0.40
codegen_flags: <defaults>
</compile_context>

<pallas_src>
import functools

import jax
import jax.numpy as jnp
from jax.experimental import pallas as pl
from jax.experimental.pallas import tpu as pltpu


def _round_up(x, m):
    return (x + m - 1) // m * m


def _linear_for_text_kernel(x_ref, w_ref, o_ref, *, normalize, use_bf16):
    """One batch tile: (tile_b, in_dim) @ (in_dim, embed_dim) -> (tile_b, embed_dim)."""
    x = x_ref[...]
    w = w_ref[...]
    if use_bf16:
        # bf16 MXU inputs, f32 accumulation (v6e/v7x fast path).
        x = x.astype(jnp.bfloat16)
        w = w.astype(jnp.bfloat16)
    emb = jnp.dot(x, w, preferred_element_type=jnp.float32)

    if normalize:
        # F.normalize(x, dim=-1): x / max(||x||_2, 1e-12)
        #   == x * rsqrt(max(sum(x^2), 1e-24))   (rsqrt runs on the EUP slot)
        sumsq = jnp.sum(emb * emb, axis=-1, keepdims=True)
        emb = emb * jax.lax.rsqrt(jnp.maximum(sumsq, 1e-24))

    o_ref[...] = emb.astype(o_ref.dtype)


def linear_for_text(text_emb, w_head, *, normalize=False, tile_b=256,
                    use_bf16=False):
    """Pallas implementation of LinearforText.forward.

    text_emb: (B, in_dim) float32
    w_head:   (in_dim, embed_dim) float32   (== PyTorch weight.T)
    Returns (B, embed_dim) float32.
    """
    B, in_dim = text_emb.shape
    in_dim_w, embed_dim = w_head.shape
    assert in_dim == in_dim_w, "weight/in_dim mismatch"

    # Batch tile: multiple of 8 sublanes; shrink for tiny batches, pad B up to
    # a whole number of tiles (padded rows are sliced off afterwards).
    tile_b = _round_up(max(8, min(tile_b, _round_up(B, 8))), 8)
    B_pad = _round_up(B, tile_b)
    x = text_emb
    if B_pad != B:
        x = jnp.pad(x, ((0, B_pad - B), (0, 0)))

    kernel = functools.partial(_linear_for_text_kernel,
                               normalize=bool(normalize),
                               use_bf16=bool(use_bf16))

    out = pl.pallas_call(
        kernel,
        out_shape=jax.ShapeDtypeStruct((B_pad, embed_dim), jnp.float32),
        grid=(B_pad // tile_b,),
        in_specs=[
            # x: tiled along the batch axis.
            pl.BlockSpec((tile_b, in_dim), lambda i: (i, 0)),
            # W: same block every step -> stays resident in VMEM.
            pl.BlockSpec((in_dim, embed_dim), lambda i: (0, 0)),
        ],
        out_specs=pl.BlockSpec((tile_b, embed_dim), lambda i: (i, 0)),
        compiler_params=pltpu.CompilerParams(
            dimension_semantics=("parallel",),      # megacore sharding on v7x
            vmem_limit_bytes=32 * 1024 * 1024,      # safe on v5e (16 MiB default)
        ),
    )(x, w_head)
    return out[:B]


def _reference(text_emb, w_head, *, normalize):
    emb = text_emb @ w_head
    if normalize:
        norm = jnp.sqrt(jnp.sum(emb * emb, axis=-1, keepdims=True))
        emb = emb / jnp.maximum(norm, 1e-12)
    return emb


if __name__ == "__main__":
    key = jax.random.PRNGKey(0)
    k_x, k_w = jax.random.split(key)

    # Module constants: in_dim = 4096, embed_dim default 256; small batch.
    B, in_dim, embed_dim = 16, 4096, 256
    text_emb = jax.random.normal(k_x, (B, in_dim), jnp.float32)
    # nn.Linear(in_dim, embed_dim, bias=False) weight, stored as (in, out).
    w_head = jax.random.normal(k_w, (in_dim, embed_dim), jnp.float32) * (
        1.0 / in_dim) ** 0.5

    # Default: normalize=False
    embed = linear_for_text(text_emb, w_head, normalize=False)
    jax.block_until_ready(embed)
    ref = _reference(text_emb, w_head, normalize=False)
    assert embed.shape == (B, embed_dim)
    assert jnp.allclose(embed, ref, rtol=1e-5, atol=1e-5)

    # normalize=True branch
    embed_n = linear_for_text(text_emb, w_head, normalize=True)
    jax.block_until_ready(embed_n)
    ref_n = _reference(text_emb, w_head, normalize=True)
    assert jnp.allclose(embed_n, ref_n, rtol=1e-5, atol=1e-5)

    # Non-multiple-of-tile batch exercises the padding path.
    embed_odd = linear_for_text(text_emb[:13], w_head, normalize=True)
    jax.block_until_ready(embed_odd)
    assert embed_odd.shape == (13, embed_dim)
    assert jnp.allclose(embed_odd, ref_n[:13], rtol=1e-5, atol=1e-5)

    print("KERNEL_OK")
</pallas_src>

<mosaic_0001>
module attributes {stable_mosaic.version = 11 : i64} {
  func.func @_linear_for_text_kernel(%arg0: i32, %arg1: memref<16x4096xf32, #tpu.memory_space<vmem>>, %arg2: memref<4096x256xf32, #tpu.memory_space<vmem>>, %arg3: memref<16x256xf32, #tpu.memory_space<vmem>>) attributes {dimension_semantics = [#tpu.dimension_semantics<parallel>], iteration_bounds = array<i64: 1>, scalar_prefetch = 0 : i64, scratch_operands = 0 : i64, tpu.core_type = #tpu.core_type<tc>, window_params = [{transform_indices = @transform_0, window_bounds = array<i64: 16, 4096>}, {pipeline_mode = #tpu.pipeline_mode<synchronous>, transform_indices = @transform_1, window_bounds = array<i64: 4096, 256>}, {transform_indices = @transform_2, window_bounds = array<i64: 16, 256>}]} {
    %c0 = arith.constant 0 : index
    %c0_0 = arith.constant 0 : index
    %0 = vector.load %arg1[%c0, %c0_0] : memref<16x4096xf32, #tpu.memory_space<vmem>>, vector<16x4096xf32>
    %c0_1 = arith.constant 0 : index
    %c0_2 = arith.constant 0 : index
    %1 = vector.load %arg2[%c0_1, %c0_2] : memref<4096x256xf32, #tpu.memory_space<vmem>>, vector<4096x256xf32>
    %cst = arith.constant dense<0.000000e+00> : vector<16x256xf32>
    %2 = tpu.matmul %0, %1, %cst {dimension_numbers = #tpu.dot_dimension_numbers<[1], [0], [0], [1], [0, 0, 1, 1], [], []>} : vector<16x4096xf32>, vector<4096x256xf32>, vector<16x256xf32> -> vector<16x256xf32>
    %c0_3 = arith.constant 0 : index
    %c0_4 = arith.constant 0 : index
    %3 = vector.load %arg3[%c0_3, %c0_4] : memref<16x256xf32, #tpu.memory_space<vmem>>, vector<16x256xf32>
    tpu.vector_store %arg3[%c0_3, %c0_4], %2 {strides = array<i32>} : memref<16x256xf32, #tpu.memory_space<vmem>>, vector<16x256xf32>,
    return
  }
  func.func @transform_0(%arg0: i32) -> (i32, i32) {
    %c0_i32 = arith.constant 0 : i32
    %c0_i32_0 = arith.constant 0 : i32
    return %arg0, %c0_i32 : i32, i32
  }
  func.func @transform_1(%arg0: i32) -> (i32, i32) {
    %c0_i32 = arith.constant 0 : i32
    %c0_i32_0 = arith.constant 0 : i32
    %c0_i32_1 = arith.constant 0 : i32
    return %c0_i32, %c0_i32_0 : i32, i32
  }
  func.func @transform_2(%arg0: i32) -> (i32, i32) {
    %c0_i32 = arith.constant 0 : i32
    %c0_i32_0 = arith.constant 0 : i32
    return %arg0, %c0_i32 : i32, i32
  }
}

</mosaic_0001>

<bundles_post_ra>
// kernel: tpu_custom_call.1
= control target key start
LH: loop header
LB: loop body
LE: loop exit
PB: predicated region body
PF: predicated region fallthrough
CT: control target
= control target key end

     0   :  { %7 = vsyncpa [#allocation3], 0  ;;  %s2491_s0 = inlined_call_operand.hbm [shape: f32[16,4096], index: 0, kind: input, shape index: {}]   ;;  %s2492_s1 = inlined_call_operand.hbm [shape: f32[4096,256], index: 1, kind: input, shape index: {}]   ;;  %s2493_s2 = inlined_call_operand.hbm [shape: f32[16,256], index: 2, kind: output, shape index: {}]  }
   0x1   :  { %8 = vsyncpa [#allocation6], 0 }
   0x2   :  { %9 = vsyncpa [#allocation4], 0  ;;  %s2454_s9 = smov [#allocation2]  }
   0x3   :  { %s15_s10 = sshll.u32 %s2454_s9, 4  ;;  %s16_s10 = int_to_ptr.vmem [resolvable:$true] %s15_s10 }
   0x4   :  { %s2396_s11 = scalar_lea.vmem %s16_s10, 8192  ;;  %p2401_p1 = scmp.lt.s32.totalorder %s16_s10, %s16_s10 }
   0x5   :  { %p2397_p0 = scmp.ne.s32.totalorder %s16_s10, %s2396_s11  ;;  %p2402_p2 = scmp.lt.s32.totalorder %s2396_s11, %s2396_s11 }
   0x7   :  { %p2403_p3 = por %p2402_p2, %p2401_p1 }
   0x9   :  { %p2404_p4 = pnand %p2403_p3, %p2397_p0 }
   0xb   :  { %2407 = shalt.err (!%p2404_p4)
}
   0xc   :  { %s2455_s12 = smov 4096   ;;  %s2456_s13 = smov 256  }
   0xd   :  { %21 = dma.hbm_to_vmem [thread:$0]  %s2491_s0, 8192, %s16_s10, [#allocation3], %s2455_s12, %s2455_s12, %s2456_s13  }
   0xe   :  { %s2457_s16 = smov [#allocation5]  }
   0xf   :  { %s27_s17 = sshll.u32 %s2457_s16, 4  ;;  %s28_s17 = int_to_ptr.vmem [resolvable:$true] %s27_s17 }
  0x10   :  { %s2416_s18 = scalar_lea.vmem %s28_s17, 131072  ;;  %p2421_p6 = scmp.lt.s32.totalorder %s28_s17, %s28_s17 }
  0x11   :  { %p2417_p5 = scmp.ne.s32.totalorder %s28_s17, %s2416_s18  ;;  %p2422_p7 = scmp.lt.s32.totalorder %s2416_s18, %s2416_s18 }
  0x13   :  { %p2423_p8 = por %p2422_p7, %p2421_p6 }
  0x15   :  { %p2424_p9 = pnand %p2423_p8, %p2417_p5 }
  0x17   :  { %2427 = shalt.err (!%p2424_p9)
}
  0x18   :  { %s2458_s19 = smov 16  }
  0x19   :  { %33 = dma.hbm_to_vmem [thread:$0]  %s2492_s1, 131072, %s28_s17, [#allocation6], %s2456_s13, %s2456_s13, %s2458_s19  }
  0x1a   :  { %2448 = dma.done.wait [#allocation3], 8192  }
  0x1b   :  { %2449 = vsyncadd [#allocation3], 4294959104 }
  0x1c   :  { %2450 = dma.done.wait [#allocation6], 131072  }
  0x1d   :  { %2451 = vsyncadd [#allocation6], 4294836224  ;;  %v135_v0 = vld [vmem:[#allocation5 + $0xf8] sm:$0xff]  ;;  %v134_v2 = vld [vmem:[#allocation5 + $0xf0] sm:$0xff]  ;;  %s2459_s0 = smov [#allocation7]  }
  0x1e   :  { %v199_v1 = vld [vmem:[#allocation5 + $0x2f8] sm:$0xff]  ;;  %1128 = vmatprep.subr.mxu0 %v135_v0  ;;  %v198_v3 = vld [vmem:[#allocation5 + $0x2f0] sm:$0xff]  ;;  %v133_v4 = vld [vmem:[#allocation5 + $0xe8] sm:$0xff]  ;;  %s2369_s1 = sshll.u32 %s2459_s0, 4  ;;  %s2370_s1 = int_to_ptr.vmem [resolvable:$true] %s2369_s1 }
  0x1f   :  { %1205 = vmatprep.subr.mxu1 %v199_v1  ;;  %v197_v5 = vld [vmem:[#allocation5 + $0x2e8] sm:$0xff]  ;;  %1129 = vmatpush1.msra.mxu0 %v134_v2  ;;  %v132_v6 = vld [vmem:[#allocation5 + $0xe0] sm:$0xff]  ;;  %v131_v8 = vld [vmem:[#allocation5 + $0xd8] sm:$0xff]  ;;  %s2428_s22 = scalar_lea.vmem %s2370_s1, 512  ;;  %p2433_p11 = scmp.lt.s32.totalorder %s2370_s1, %s2370_s1 }
  0x20   :  { %1206 = vmatpush1.msra.mxu1 %v198_v3  ;;  %v196_v7 = vld [vmem:[#allocation5 + $0x2e0] sm:$0xff]  ;;  %1130 = vmatprep.subr.mxu0 %v133_v4  ;;  %v195_v9 = vld [vmem:[#allocation5 + $0x2d8] sm:$0xff]  ;;  %v130_v10 = vld [vmem:[#allocation5 + $0xd0] sm:$0xff]  ;;  %p2429_p10 = scmp.ne.s32.totalorder %s2370_s1, %s2428_s22  ;;  %p2434_p12 = scmp.lt.s32.totalorder %s2428_s22, %s2428_s22 }
  0x21   :  { %1207 = vmatprep.subr.mxu1 %v197_v5  ;;  %v194_v11 = vld [vmem:[#allocation5 + $0x2d0] sm:$0xff]  ;;  %1131 = vmatpush1.msra.mxu0 %v132_v6  ;;  %v129_v12 = vld [vmem:[#allocation5 + $0xc8] sm:$0xff]  ;;  %v128_v14 = vld [vmem:[#allocation5 + $0xc0] sm:$0xff] }
  0x22   :  { %1208 = vmatpush1.msra.mxu1 %v196_v7  ;;  %v193_v13 = vld [vmem:[#allocation5 + $0x2c8] sm:$0xff]  ;;  %1132 = vmatprep.subr.mxu0 %v131_v8  ;;  %v192_v15 = vld [vmem:[#allocation5 + $0x2c0] sm:$0xff]  ;;  %v127_v16 = vld [vmem:[#allocation5 + $0xb8] sm:$0xff]  ;;  %p2435_p13 = por %p2434_p12, %p2433_p11 }
  0x23   :  { %1209 = vmatprep.subr.mxu1 %v195_v9  ;;  %1133 = vmatpush1.msra.mxu0 %v130_v10  ;;  %v191_v17 = vld [vmem:[#allocation5 + $0x2b8] sm:$0xff]  ;;  %v126_v18 = vld [vmem:[#allocation5 + $0xb0] sm:$0xff]  ;;  %v125_v20 = vld [vmem:[#allocation5 + $0xa8] sm:$0xff] }
  0x24   :  { %1210 = vmatpush1.msra.mxu1 %v194_v11  ;;  %1134 = vmatprep.subr.mxu0 %v129_v12  ;;  %v190_v19 = vld [vmem:[#allocation5 + $0x2b0] sm:$0xff]  ;;  %v189_v21 = vld [vmem:[#allocation5 + $0x2a8] sm:$0xff]  ;;  %v124_v22 = vld [vmem:[#allocation5 + $0xa0] sm:$0xff]  ;;  %p2436_p0 = pnand %p2435_p13, %p2429_p10 }
  0x25   :  { %1211 = vmatprep.subr.mxu1 %v193_v13  ;;  %1135 = vmatpush1.msra.mxu0 %v128_v14  ;;  %v188_v23 = vld [vmem:[#allocation5 + $0x2a0] sm:$0xff]  ;;  %v123_v24 = vld [vmem:[#allocation5 + $0x98] sm:$0xff]  ;;  %v122_v26 = vld [vmem:[#allocation5 + $0x90] sm:$0xff] }
  0x26   :  { %1212 = vmatpush1.msra.mxu1 %v192_v15  ;;  %1136 = vmatprep.subr.mxu0 %v127_v16  ;;  %v187_v25 = vld [vmem:[#allocation5 + $0x298] sm:$0xff]  ;;  %v186_v27 = vld [vmem:[#allocation5 + $0x290] sm:$0xff]  ;;  %v121_v28 = vld [vmem:[#allocation5 + $0x88] sm:$0xff] }
  0x27   :  { %1213 = vmatprep.subr.mxu1 %v191_v17  ;;  %1137 = vmatpush1.msra.mxu0 %v126_v18  ;;  %v185_v29 = vld [vmem:[#allocation5 + $0x288] sm:$0xff]  ;;  %v120_v30 = vld [vmem:[#allocation5 + $0x80] sm:$0xff]  ;;  %v119_v32 = vld [vmem:[#allocation5 + $0x78] sm:$0xff] }
  0x28   :  { %1214 = vmatpush1.msra.mxu1 %v190_v19  ;;  %1138 = vmatprep.subr.mxu0 %v125_v20  ;;  %v184_v31 = vld [vmem:[#allocation5 + $0x280] sm:$0xff]  ;;  %v183_v33 = vld [vmem:[#allocation5 + $0x278] sm:$0xff]  ;;  %v118_v34 = vld [vmem:[#allocation5 + $0x70] sm:$0xff] }
  0x29   :  { %1215 = vmatprep.subr.mxu1 %v189_v21  ;;  %1139 = vmatpush1.msra.mxu0 %v124_v22  ;;  %v182_v35 = vld [vmem:[#allocation5 + $0x270] sm:$0xff]  ;;  %v117_v36 = vld [vmem:[#allocation5 + $0x68] sm:$0xff]  ;;  %v116_v38 = vld [vmem:[#allocation5 + $0x60] sm:$0xff] }
  0x2a   :  { %1216 = vmatpush1.msra.mxu1 %v188_v23  ;;  %1140 = vmatprep.subr.mxu0 %v123_v24  ;;  %v181_v37 = vld [vmem:[#allocation5 + $0x268] sm:$0xff]  ;;  %v180_v39 = vld [vmem:[#allocation5 + $0x260] sm:$0xff]  ;;  %v115_v40 = vld [vmem:[#allocation5 + $0x58] sm:$0xff] }
  0x2b   :  { %1217 = vmatprep.subr.mxu1 %v187_v25  ;;  %1141 = vmatpush1.msra.mxu0 %v122_v26  ;;  %v179_v41 = vld [vmem:[#allocation5 + $0x258] sm:$0xff]  ;;  %v114_v42 = vld [vmem:[#allocation5 + $0x50] sm:$0xff]  ;;  %v113_v44 = vld [vmem:[#allocation5 + $0x48] sm:$0xff] }
  0x2c   :  { %1218 = vmatpush1.msra.mxu1 %v186_v27  ;;  %1142 = vmatprep.subr.mxu0 %v121_v28  ;;  %v178_v43 = vld [vmem:[#allocation5 + $0x250] sm:$0xff]  ;;  %v177_v45 = vld [vmem:[#allocation5 + $0x248] sm:$0xff]  ;;  %v112_v46 = vld [vmem:[#allocation5 + $0x40] sm:$0xff] }
  0x2d   :  { %1219 = vmatprep.subr.mxu1 %v185_v29  ;;  %1143 = vmatpush1.msra.mxu0 %v120_v30  ;;  %v176_v47 = vld [vmem:[#allocation5 + $0x240] sm:$0xff]  ;;  %v111_v48 = vld [vmem:[#allocation5 + $0x38] sm:$0xff]  ;;  %v110_v50 = vld [vmem:[#allocation5 + $0x30] sm:$0xff] }
  0x2e   :  { %1220 = vmatpush1.msra.mxu1 %v184_v31  ;;  %1144 = vmatprep.subr.mxu0 %v119_v32  ;;  %v175_v49 = vld [vmem:[#allocation5 + $0x238] sm:$0xff]  ;;  %v174_v51 = vld [vmem:[#allocation5 + $0x230] sm:$0xff]  ;;  %v109_v52 = vld [vmem:[#allocation5 + $0x28] sm:$0xff] }
  0x2f   :  { %1221 = vmatprep.subr.mxu1 %v183_v33  ;;  %1145 = vmatpush1.msra.mxu0 %v118_v34  ;;  %v173_v53 = vld [vmem:[#allocation5 + $0x228] sm:$0xff]  ;;  %v108_v54 = vld [vmem:[#allocation5 + $0x20] sm:$0xff]  ;;  %v107_v56 = vld [vmem:[#allocation5 + $0x18] sm:$0xff] }
  0x30   :  { %1222 = vmatpush1.msra.mxu1 %v182_v35  ;;  %1146 = vmatprep.subr.mxu0 %v117_v36  ;;  %v172_v55 = vld [vmem:[#allocation5 + $0x220] sm:$0xff]  ;;  %v171_v57 = vld [vmem:[#allocation5 + $0x218] sm:$0xff]  ;;  %v106_v58 = vld [vmem:[#allocation5 + $0x10] sm:$0xff] }
  0x31   :  { %1223 = vmatprep.subr.mxu1 %v181_v37  ;;  %1147 = vmatpush1.msra.mxu0 %v116_v38  ;;  %v170_v59 = vld [vmem:[#allocation5 + $0x210] sm:$0xff]  ;;  %v105_v60 = vld [vmem:[#allocation5 + $0x8] sm:$0xff]  ;;  %v104_v62 = vld [vmem:[#allocation5] sm:$0xff] }
  0x32   :  { %1224 = vmatpush1.msra.mxu1 %v180_v39  ;;  %1148 = vmatprep.subr.mxu0 %v115_v40  ;;  %v169_v61 = vld [vmem:[#allocation5 + $0x208] sm:$0xff]  ;;  %v168_v63 = vld [vmem:[#allocation5 + $0x200] sm:$0xff]  ;;  %v167_v0 = vld [vmem:[#allocation5 + $0x1f8] sm:$0xff] }
  0x33   :  { %1225 = vmatprep.subr.mxu1 %v179_v41  ;;  %1149 = vmatpush1.msra.mxu0 %v114_v42  ;;  %v231_v1 = vld [vmem:[#allocation5 + $0x3f8] sm:$0xff]  ;;  %v166_v2 = vld [vmem:[#allocation5 + $0x1f0] sm:$0xff]  ;;  %v165_v4 = vld [vmem:[#allocation5 + $0x1e8] sm:$0xff] }
  0x34   :  { %1226 = vmatpush1.msra.mxu1 %v178_v43  ;;  %1150 = vmatprep.subr.mxu0 %v113_v44  ;;  %v230_v3 = vld [vmem:[#allocation5 + $0x3f0] sm:$0xff]  ;;  %v229_v5 = vld [vmem:[#allocation5 + $0x3e8] sm:$0xff]  ;;  %v164_v6 = vld [vmem:[#allocation5 + $0x1e0] sm:$0xff] }
  0x35   :  { %1227 = vmatprep.subr.mxu1 %v177_v45  ;;  %1151 = vmatpush1.msra.mxu0 %v112_v46  ;;  %v228_v7 = vld [vmem:[#allocation5 + $0x3e0] sm:$0xff]  ;;  %v163_v8 = vld [vmem:[#allocation5 + $0x1d8] sm:$0xff]  ;;  %v162_v10 = vld [vmem:[#allocation5 + $0x1d0] sm:$0xff] }
  0x36   :  { %1228 = vmatpush1.msra.mxu1 %v176_v47  ;;  %1152 = vmatprep.subr.mxu0 %v111_v48  ;;  %v227_v9 = vld [vmem:[#allocation5 + $0x3d8] sm:$0xff]  ;;  %v226_v11 = vld [vmem:[#allocation5 + $0x3d0] sm:$0xff]  ;;  %v161_v12 = vld [vmem:[#allocation5 + $0x1c8] sm:$0xff] }
  0x37   :  { %1229 = vmatprep.subr.mxu1 %v175_v49  ;;  %1153 = vmatpush1.msra.mxu0 %v110_v50  ;;  %v225_v13 = vld [vmem:[#allocation5 + $0x3c8] sm:$0xff]  ;;  %v160_v14 = vld [vmem:[#allocation5 + $0x1c0] sm:$0xff]  ;;  %v159_v16 = vld [vmem:[#allocation5 + $0x1b8] sm:$0xff] }
  0x38   :  { %1230 = vmatpush1.msra.mxu1 %v174_v51  ;;  %1154 = vmatprep.subr.mxu0 %v109_v52  ;;  %v224_v15 = vld [vmem:[#allocation5 + $0x3c0] sm:$0xff]  ;;  %v223_v17 = vld [vmem:[#allocation5 + $0x3b8] sm:$0xff]  ;;  %v158_v18 = vld [vmem:[#allocation5 + $0x1b0] sm:$0xff] }
  0x39   :  { %1231 = vmatprep.subr.mxu1 %v173_v53  ;;  %1155 = vmatpush1.msra.mxu0 %v108_v54  ;;  %v222_v19 = vld [vmem:[#allocation5 + $0x3b0] sm:$0xff]  ;;  %v157_v20 = vld [vmem:[#allocation5 + $0x1a8] sm:$0xff]  ;;  %v156_v22 = vld [vmem:[#allocation5 + $0x1a0] sm:$0xff] }
  0x3a   :  { %1232 = vmatpush1.msra.mxu1 %v172_v55  ;;  %1156 = vmatprep.subr.mxu0 %v107_v56  ;;  %v221_v21 = vld [vmem:[#allocation5 + $0x3a8] sm:$0xff]  ;;  %v220_v23 = vld [vmem:[#allocation5 + $0x3a0] sm:$0xff]  ;;  %v155_v24 = vld [vmem:[#allocation5 + $0x198] sm:$0xff] }
  0x3b   :  { %1233 = vmatprep.subr.mxu1 %v171_v57  ;;  %1157 = vmatpush1.msra.mxu0 %v106_v58  ;;  %v219_v25 = vld [vmem:[#allocation5 + $0x398] sm:$0xff]  ;;  %v154_v26 = vld [vmem:[#allocation5 + $0x190] sm:$0xff]  ;;  %v153_v28 = vld [vmem:[#allocation5 + $0x188] sm:$0xff] }
  0x3c   :  { %1234 = vmatpush1.msra.mxu1 %v170_v59  ;;  %1158 = vmatprep.subr.mxu0 %v105_v60  ;;  %v218_v27 = vld [vmem:[#allocation5 + $0x390] sm:$0xff]  ;;  %v217_v29 = vld [vmem:[#allocation5 + $0x388] sm:$0xff]  ;;  %v152_v30 = vld [vmem:[#allocation5 + $0x180] sm:$0xff] }
  0x3d   :  { %1235 = vmatprep.subr.mxu1 %v169_v61  ;;  %1159 = vmatpush1.msra.mxu0 %v104_v62  ;;  %v216_v31 = vld [vmem:[#allocation5 + $0x380] sm:$0xff]  ;;  %v151_v32 = vld [vmem:[#allocation5 + $0x178] sm:$0xff]  ;;  %v150_v34 = vld [vmem:[#allocation5 + $0x170] sm:$0xff] }
  0x3e   :  { %1236 = vmatpush1.msra.mxu1 %v168_v63  ;;  %1160 = vmatprep.subr.mxu0 %v167_v0  ;;  %v215_v33 = vld [vmem:[#allocation5 + $0x378] sm:$0xff]  ;;  %v214_v35 = vld [vmem:[#allocation5 + $0x370] sm:$0xff]  ;;  %v149_v36 = vld [vmem:[#allocation5 + $0x168] sm:$0xff] }
  0x3f   :  { %1237 = vmatprep.subr.mxu1 %v231_v1  ;;  %1161 = vmatpush2.msra.mxu0 %v166_v2  ;;  %v213_v37 = vld [vmem:[#allocation5 + $0x368] sm:$0xff]  ;;  %v148_v38 = vld [vmem:[#allocation5 + $0x160] sm:$0xff]  ;;  %v147_v40 = vld [vmem:[#allocation5 + $0x158] sm:$0xff] }
  0x40   :  { %1238 = vmatpush2.msra.mxu1 %v230_v3  ;;  %1162 = vmatprep.subr.mxu0 %v165_v4  ;;  %v212_v39 = vld [vmem:[#allocation5 + $0x360] sm:$0xff]  ;;  %v211_v41 = vld [vmem:[#allocation5 + $0x358] sm:$0xff]  ;;  %v146_v42 = vld [vmem:[#allocation5 + $0x150] sm:$0xff] }
  0x41   :  { %1239 = vmatprep.subr.mxu1 %v229_v5  ;;  %1163 = vmatpush2.msra.mxu0 %v164_v6  ;;  %v210_v43 = vld [vmem:[#allocation5 + $0x350] sm:$0xff]  ;;  %v145_v44 = vld [vmem:[#allocation5 + $0x148] sm:$0xff]  ;;  %v144_v46 = vld [vmem:[#allocation5 + $0x140] sm:$0xff] }
  0x42   :  { %1240 = vmatpush2.msra.mxu1 %v228_v7  ;;  %1164 = vmatprep.subr.mxu0 %v163_v8  ;;  %v209_v45 = vld [vmem:[#allocation5 + $0x348] sm:$0xff]  ;;  %v208_v47 = vld [vmem:[#allocation5 + $0x340] sm:$0xff]  ;;  %v143_v48 = vld [vmem:[#allocation5 + $0x138] sm:$0xff] }
  0x43   :  { %1241 = vmatprep.subr.mxu1 %v227_v9  ;;  %1165 = vmatpush2.msra.mxu0 %v162_v10  ;;  %v207_v49 = vld [vmem:[#allocation5 + $0x338] sm:$0xff]  ;;  %v142_v50 = vld [vmem:[#allocation5 + $0x130] sm:$0xff]  ;;  %v141_v52 = vld [vmem:[#allocation5 + $0x128] sm:$0xff] }
  0x44   :  { %1242 = vmatpush2.msra.mxu1 %v226_v11  ;;  %1166 = vmatprep.subr.mxu0 %v161_v12  ;;  %v206_v51 = vld [vmem:[#allocation5 + $0x330] sm:$0xff]  ;;  %v205_v53 = vld [vmem:[#allocation5 + $0x328] sm:$0xff]  ;;  %v140_v54 = vld [vmem:[#allocation5 + $0x120] sm:$0xff] }
  0x45   :  { %1243 = vmatprep.subr.mxu1 %v225_v13  ;;  %1167 = vmatpush2.msra.mxu0 %v160_v14  ;;  %v204_v55 = vld [vmem:[#allocation5 + $0x320] sm:$0xff]  ;;  %v139_v56 = vld [vmem:[#allocation5 + $0x118] sm:$0xff]  ;;  %v138_v58 = vld [vmem:[#allocation5 + $0x110] sm:$0xff] }
  0x46   :  { %1244 = vmatpush2.msra.mxu1 %v224_v15  ;;  %1168 = vmatprep.subr.mxu0 %v159_v16  ;;  %v203_v57 = vld [vmem:[#allocation5 + $0x318] sm:$0xff]  ;;  %v202_v59 = vld [vmem:[#allocation5 + $0x310] sm:$0xff]  ;;  %v137_v60 = vld [vmem:[#allocation5 + $0x108] sm:$0xff] }
  0x47   :  { %1245 = vmatprep.subr.mxu1 %v223_v17  ;;  %1169 = vmatpush2.msra.mxu0 %v158_v18  ;;  %v201_v61 = vld [vmem:[#allocation5 + $0x308] sm:$0xff]  ;;  %v136_v62 = vld [vmem:[#allocation5 + $0x100] sm:$0xff]  ;;  %v43_v1 = vld [vmem:[#allocation2 + $0x18] sm:$0xff] }
  0x48   :  { %1246 = vmatpush2.msra.mxu1 %v222_v19  ;;  %1170 = vmatprep.subr.mxu0 %v157_v20  ;;  %v41_v63 = vld [vmem:[#allocation2 + $0x8] sm:$0xff]  ;;  %v200_v0 = vld [vmem:[#allocation5 + $0x300] sm:$0xff]  ;;  %v42_v3 = vld [vmem:[#allocation2 + $0x10] sm:$0xff] }
  0x49   :  { %1247 = vmatprep.subr.mxu1 %v221_v21  ;;  %1171 = vmatpush2.msra.mxu0 %v156_v22  ;;  %v40_v2 = vld [vmem:[#allocation2] sm:$0xff]  ;;  %v263_v4 = vld [vmem:[#allocation5 + $0x4f8] sm:$0xff]  ;;  %v262_v6 = vld [vmem:[#allocation5 + $0x4f0] sm:$0xff] }
  0x4a   :  { %1248 = vmatpush2.msra.mxu1 %v220_v23  ;;  %1172 = vmatprep.subr.mxu0 %v155_v24  ;;  %v327_v5 = vld [vmem:[#allocation5 + $0x6f8] sm:$0xff]  ;;  %v326_v7 = vld [vmem:[#allocation5 + $0x6f0] sm:$0xff]  ;;  %v261_v8 = vld [vmem:[#allocation5 + $0x4e8] sm:$0xff] }
  0x4b   :  { %1249 = vmatprep.subr.mxu1 %v219_v25  ;;  %1173 = vmatpush2.msra.mxu0 %v154_v26  ;;  %v325_v9 = vld [vmem:[#allocation5 + $0x6e8] sm:$0xff]  ;;  %v260_v10 = vld [vmem:[#allocation5 + $0x4e0] sm:$0xff]  ;;  %v259_v12 = vld [vmem:[#allocation5 + $0x4d8] sm:$0xff] }
  0x4c   :  { %1250 = vmatpush2.msra.mxu1 %v218_v27  ;;  %1174 = vmatprep.subr.mxu0 %v153_v28  ;;  %v324_v11 = vld [vmem:[#allocation5 + $0x6e0] sm:$0xff]  ;;  %v323_v13 = vld [vmem:[#allocation5 + $0x6d8] sm:$0xff]  ;;  %v258_v14 = vld [vmem:[#allocation5 + $0x4d0] sm:$0xff] }
  0x4d   :  { %1251 = vmatprep.subr.mxu1 %v217_v29  ;;  %1175 = vmatpush2.msra.mxu0 %v152_v30  ;;  %v322_v15 = vld [vmem:[#allocation5 + $0x6d0] sm:$0xff]  ;;  %v257_v16 = vld [vmem:[#allocation5 + $0x4c8] sm:$0xff]  ;;  %v256_v18 = vld [vmem:[#allocation5 + $0x4c0] sm:$0xff] }
  0x4e   :  { %1252 = vmatpush2.msra.mxu1 %v216_v31  ;;  %1176 = vmatprep.subr.mxu0 %v151_v32  ;;  %v321_v17 = vld [vmem:[#allocation5 + $0x6c8] sm:$0xff]  ;;  %v320_v19 = vld [vmem:[#allocation5 + $0x6c0] sm:$0xff]  ;;  %v255_v20 = vld [vmem:[#allocation5 + $0x4b8] sm:$0xff] }
  0x4f   :  { %1253 = vmatprep.subr.mxu1 %v215_v33  ;;  %1177 = vmatpush2.msra.mxu0 %v150_v34  ;;  %v319_v21 = vld [vmem:[#allocation5 + $0x6b8] sm:$0xff]  ;;  %v254_v22 = vld [vmem:[#allocation5 + $0x4b0] sm:$0xff]  ;;  %v253_v24 = vld [vmem:[#allocation5 + $0x4a8] sm:$0xff] }
  0x50   :  { %1254 = vmatpush2.msra.mxu1 %v214_v35  ;;  %1178 = vmatprep.subr.mxu0 %v149_v36  ;;  %v318_v23 = vld [vmem:[#allocation5 + $0x6b0] sm:$0xff]  ;;  %v317_v25 = vld [vmem:[#allocation5 + $0x6a8] sm:$0xff]  ;;  %v252_v26 = vld [vmem:[#allocation5 + $0x4a0] sm:$0xff] }
  0x51   :  { %1255 = vmatprep.subr.mxu1 %v213_v37  ;;  %1179 = vmatpush2.msra.mxu0 %v148_v38  ;;  %v316_v27 = vld [vmem:[#allocation5 + $0x6a0] sm:$0xff]  ;;  %v251_v28 = vld [vmem:[#allocation5 + $0x498] sm:$0xff]  ;;  %v250_v30 = vld [vmem:[#allocation5 + $0x490] sm:$0xff] }
  0x52   :  { %1256 = vmatpush2.msra.mxu1 %v212_v39  ;;  %1180 = vmatprep.subr.mxu0 %v147_v40  ;;  %v315_v29 = vld [vmem:[#allocation5 + $0x698] sm:$0xff]  ;;  %v314_v31 = vld [vmem:[#allocation5 + $0x690] sm:$0xff]  ;;  %v249_v32 = vld [vmem:[#allocation5 + $0x488] sm:$0xff] }
  0x53   :  { %1257 = vmatprep.subr.mxu1 %v211_v41  ;;  %1181 = vmatpush2.msra.mxu0 %v146_v42  ;;  %v313_v33 = vld [vmem:[#allocation5 + $0x688] sm:$0xff]  ;;  %v248_v34 = vld [vmem:[#allocation5 + $0x480] sm:$0xff]  ;;  %v247_v36 = vld [vmem:[#allocation5 + $0x478] sm:$0xff] }
  0x54   :  { %1258 = vmatpush2.msra.mxu1 %v210_v43  ;;  %1182 = vmatprep.subr.mxu0 %v145_v44  ;;  %v312_v35 = vld [vmem:[#allocation5 + $0x680] sm:$0xff]  ;;  %v311_v37 = vld [vmem:[#allocation5 + $0x678] sm:$0xff]  ;;  %v246_v38 = vld [vmem:[#allocation5 + $0x470] sm:$0xff] }
  0x55   :  { %1259 = vmatprep.subr.mxu1 %v209_v45  ;;  %1183 = vmatpush2.msra.mxu0 %v144_v46  ;;  %v310_v39 = vld [vmem:[#allocation5 + $0x670] sm:$0xff]  ;;  %v245_v40 = vld [vmem:[#allocation5 + $0x468] sm:$0xff]  ;;  %v244_v42 = vld [vmem:[#allocation5 + $0x460] sm:$0xff] }
  0x56   :  { %1260 = vmatpush2.msra.mxu1 %v208_v47  ;;  %1184 = vmatprep.subr.mxu0 %v143_v48  ;;  %v309_v41 = vld [vmem:[#allocation5 + $0x668] sm:$0xff]  ;;  %v308_v43 = vld [vmem:[#allocation5 + $0x660] sm:$0xff]  ;;  %v243_v44 = vld [vmem:[#allocation5 + $0x458] sm:$0xff] }
  0x57   :  { %1261 = vmatprep.subr.mxu1 %v207_v49  ;;  %1185 = vmatpush2.msra.mxu0 %v142_v50  ;;  %v307_v45 = vld [vmem:[#allocation5 + $0x658] sm:$0xff]  ;;  %v242_v46 = vld [vmem:[#allocation5 + $0x450] sm:$0xff]  ;;  %v241_v48 = vld [vmem:[#allocation5 + $0x448] sm:$0xff] }
  0x58   :  { %1262 = vmatpush2.msra.mxu1 %v206_v51  ;;  %1186 = vmatprep.subr.mxu0 %v141_v52  ;;  %v306_v47 = vld [vmem:[#allocation5 + $0x650] sm:$0xff]  ;;  %v305_v49 = vld [vmem:[#allocation5 + $0x648] sm:$0xff]  ;;  %v240_v50 = vld [vmem:[#allocation5 + $0x440] sm:$0xff] }
  0x59   :  { %1263 = vmatprep.subr.mxu1 %v205_v53  ;;  %1187 = vmatpush2.msra.mxu0 %v140_v54  ;;  %v304_v51 = vld [vmem:[#allocation5 + $0x640] sm:$0xff]  ;;  %v239_v52 = vld [vmem:[#allocation5 + $0x438] sm:$0xff]  ;;  %v238_v54 = vld [vmem:[#allocation5 + $0x430] sm:$0xff] }
  0x5a   :  { %1264 = vmatpush2.msra.mxu1 %v204_v55  ;;  %1188 = vmatprep.subr.mxu0 %v139_v56  ;;  %v303_v53 = vld [vmem:[#allocation5 + $0x638] sm:$0xff]  ;;  %v302_v55 = vld [vmem:[#allocation5 + $0x630] sm:$0xff]  ;;  %v237_v56 = vld [vmem:[#allocation5 + $0x428] sm:$0xff] }
  0x5b   :  { %1265 = vmatprep.subr.mxu1 %v203_v57  ;;  %1189 = vmatpush2.msra.mxu0 %v138_v58  ;;  %v301_v57 = vld [vmem:[#allocation5 + $0x628] sm:$0xff]  ;;  %v236_v58 = vld [vmem:[#allocation5 + $0x420] sm:$0xff] }
  0x5c   :  { %1266 = vmatpush2.msra.mxu1 %v202_v59  ;;  %1190 = vmatprep.subr.mxu0 %v137_v60  ;;  %v300_v59 = vld [vmem:[#allocation5 + $0x620] sm:$0xff]  ;;  %v235_v60 = vld [vmem:[#allocation5 + $0x418] sm:$0xff] }
  0x5d   :  { %1267 = vmatprep.subr.mxu1 %v201_v61  ;;  %1191 = vmatpush2.msra.mxu0 %v136_v62  ;;  %v299_v61 = vld [vmem:[#allocation5 + $0x618] sm:$0xff]  ;;  %v234_v62 = vld [vmem:[#allocation5 + $0x410] sm:$0xff] }
  0x5e   :  { %1192 = vmatprep.mubr.f32.mxu0 %v41_v63  ;;  %1268 = vmatpush2.msra.mxu1 %v200_v0  ;;  %v298_v63 = vld [vmem:[#allocation5 + $0x610] sm:$0xff]  ;;  %v233_v0 = vld [vmem:[#allocation5 + $0x408] sm:$0xff] }
  0x5f   :  { %1269 = vmatprep.mubr.f32.mxu1 %v43_v1  ;;  %1193 = vmatmul.mubr.f32.vlgmr.msra.gmra.mxu0 %v40_v2  ;;  %v297_v1 = vld [vmem:[#allocation5 + $0x608] sm:$0xff]  ;;  %v232_v2 = vld [vmem:[#allocation5 + $0x400] sm:$0xff] }
  0x60   :  { %1270 = vmatmul.mubr.f32.vlgmr.msra.gmra.mxu1 %v42_v3  ;;  %1282 = vmatprep.subr.mxu0 %v263_v4  ;;  %v296_v3 = vld [vmem:[#allocation5 + $0x600] sm:$0xff]  ;;  %v295_v4 = vld [vmem:[#allocation5 + $0x5f8] sm:$0xff] }
  0x61   :  { %1359 = vmatprep.subr.mxu1 %v327_v5  ;;  %1283 = vmatpush1.msra.mxu0 %v262_v6  ;;  %v359_v5 = vld [vmem:[#allocation5 + $0x7f8] sm:$0xff]  ;;  %v294_v6 = vld [vmem:[#allocation5 + $0x5f0] sm:$0xff] }
  0x62   :  { %1360 = vmatpush1.msra.mxu1 %v326_v7  ;;  %1284 = vmatprep.subr.mxu0 %v261_v8  ;;  %v358_v7 = vld [vmem:[#allocation5 + $0x7f0] sm:$0xff]  ;;  %v293_v8 = vld [vmem:[#allocation5 + $0x5e8] sm:$0xff] }
  0x63   :  { %1361 = vmatprep.subr.mxu1 %v325_v9  ;;  %1285 = vmatpush1.msra.mxu0 %v260_v10  ;;  %v357_v9 = vld [vmem:[#allocation5 + $0x7e8] sm:$0xff]  ;;  %v292_v10 = vld [vmem:[#allocation5 + $0x5e0] sm:$0xff] }
  0x64   :  { %1362 = vmatpush1.msra.mxu1 %v324_v11  ;;  %1286 = vmatprep.subr.mxu0 %v259_v12  ;;  %v356_v11 = vld [vmem:[#allocation5 + $0x7e0] sm:$0xff]  ;;  %v291_v12 = vld [vmem:[#allocation5 + $0x5d8] sm:$0xff] }
  0x65   :  { %1363 = vmatprep.subr.mxu1 %v323_v13  ;;  %1287 = vmatpush1.msra.mxu0 %v258_v14  ;;  %v355_v13 = vld [vmem:[#allocation5 + $0x7d8] sm:$0xff]  ;;  %v290_v14 = vld [vmem:[#allocation5 + $0x5d0] sm:$0xff] }
  0x66   :  { %1364 = vmatpush1.msra.mxu1 %v322_v15  ;;  %1288 = vmatprep.subr.mxu0 %v257_v16  ;;  %v354_v15 = vld [vmem:[#allocation5 + $0x7d0] sm:$0xff]  ;;  %v289_v16 = vld [vmem:[#allocation5 + $0x5c8] sm:$0xff] }
  0x67   :  { %1365 = vmatprep.subr.mxu1 %v321_v17  ;;  %1289 = vmatpush1.msra.mxu0 %v256_v18  ;;  %v353_v17 = vld [vmem:[#allocation5 + $0x7c8] sm:$0xff]  ;;  %v288_v18 = vld [vmem:[#allocation5 + $0x5c0] sm:$0xff] }
  0x68   :  { %1366 = vmatpush1.msra.mxu1 %v320_v19  ;;  %1290 = vmatprep.subr.mxu0 %v255_v20  ;;  %v352_v19 = vld [vmem:[#allocation5 + $0x7c0] sm:$0xff]  ;;  %v287_v20 = vld [vmem:[#allocation5 + $0x5b8] sm:$0xff] }
  0x69   :  { %1367 = vmatprep.subr.mxu1 %v319_v21  ;;  %1291 = vmatpush1.msra.mxu0 %v254_v22  ;;  %v351_v21 = vld [vmem:[#allocation5 + $0x7b8] sm:$0xff]  ;;  %v286_v22 = vld [vmem:[#allocation5 + $0x5b0] sm:$0xff] }
  0x6a   :  { %1368 = vmatpush1.msra.mxu1 %v318_v23  ;;  %1292 = vmatprep.subr.mxu0 %v253_v24  ;;  %v350_v23 = vld [vmem:[#allocation5 + $0x7b0] sm:$0xff]  ;;  %v285_v24 = vld [vmem:[#allocation5 + $0x5a8] sm:$0xff] }
  0x6b   :  { %1369 = vmatprep.subr.mxu1 %v317_v25  ;;  %1293 = vmatpush1.msra.mxu0 %v252_v26  ;;  %v349_v25 = vld [vmem:[#allocation5 + $0x7a8] sm:$0xff]  ;;  %v284_v26 = vld [vmem:[#allocation5 + $0x5a0] sm:$0xff] }
  0x6c   :  { %1370 = vmatpush1.msra.mxu1 %v316_v27  ;;  %1294 = vmatprep.subr.mxu0 %v251_v28  ;;  %v348_v27 = vld [vmem:[#allocation5 + $0x7a0] sm:$0xff]  ;;  %v283_v28 = vld [vmem:[#allocation5 + $0x598] sm:$0xff] }
  0x6d   :  { %1371 = vmatprep.subr.mxu1 %v315_v29  ;;  %1295 = vmatpush1.msra.mxu0 %v250_v30  ;;  %v347_v29 = vld [vmem:[#allocation5 + $0x798] sm:$0xff]  ;;  %v282_v30 = vld [vmem:[#allocation5 + $0x590] sm:$0xff] }
  0x6e   :  { %1372 = vmatpush1.msra.mxu1 %v314_v31  ;;  %1296 = vmatprep.subr.mxu0 %v249_v32  ;;  %v346_v31 = vld [vmem:[#allocation5 + $0x790] sm:$0xff]  ;;  %v281_v32 = vld [vmem:[#allocation5 + $0x588] sm:$0xff] }
  0x6f   :  { %1373 = vmatprep.subr.mxu1 %v313_v33  ;;  %1297 = vmatpush1.msra.mxu0 %v248_v34  ;;  %v345_v33 = vld [vmem:[#allocation5 + $0x788] sm:$0xff]  ;;  %v280_v34 = vld [vmem:[#allocation5 + $0x580] sm:$0xff] }
  0x70   :  { %1374 = vmatpush1.msra.mxu1 %v312_v35  ;;  %1298 = vmatprep.subr.mxu0 %v247_v36  ;;  %v344_v35 = vld [vmem:[#allocation5 + $0x780] sm:$0xff]  ;;  %v279_v36 = vld [vmem:[#allocation5 + $0x578] sm:$0xff] }
  0x71   :  { %1375 = vmatprep.subr.mxu1 %v311_v37  ;;  %1299 = vmatpush1.msra.mxu0 %v246_v38  ;;  %v343_v37 = vld [vmem:[#allocation5 + $0x778] sm:$0xff]  ;;  %v278_v38 = vld [vmem:[#allocation5 + $0x570] sm:$0xff] }
  0x72   :  { %1376 = vmatpush1.msra.mxu1 %v310_v39  ;;  %1300 = vmatprep.subr.mxu0 %v245_v40  ;;  %v342_v39 = vld [vmem:[#allocation5 + $0x770] sm:$0xff]  ;;  %v277_v40 = vld [vmem:[#allocation5 + $0x568] sm:$0xff] }
  0x73   :  { %1377 = vmatprep.subr.mxu1 %v309_v41  ;;  %1301 = vmatpush1.msra.mxu0 %v244_v42  ;;  %v341_v41 = vld [vmem:[#allocation5 + $0x768] sm:$0xff]  ;;  %v276_v42 = vld [vmem:[#allocation5 + $0x560] sm:$0xff] }
  0x74   :  { %1378 = vmatpush1.msra.mxu1 %v308_v43  ;;  %1302 = vmatprep.subr.mxu0 %v243_v44  ;;  %v340_v43 = vld [vmem:[#allocation5 + $0x760] sm:$0xff]  ;;  %v275_v44 = vld [vmem:[#allocation5 + $0x558] sm:$0xff] }
  0x75   :  { %1379 = vmatprep.subr.mxu1 %v307_v45  ;;  %1303 = vmatpush1.msra.mxu0 %v242_v46  ;;  %v339_v45 = vld [vmem:[#allocation5 + $0x758] sm:$0xff]  ;;  %v274_v46 = vld [vmem:[#allocation5 + $0x550] sm:$0xff] }
  0x76   :  { %1380 = vmatpush1.msra.mxu1 %v306_v47  ;;  %1304 = vmatprep.subr.mxu0 %v241_v48  ;;  %v338_v47 = vld [vmem:[#allocation5 + $0x750] sm:$0xff]  ;;  %v273_v48 = vld [vmem:[#allocation5 + $0x548] sm:$0xff] }
  0x77   :  { %1381 = vmatprep.subr.mxu1 %v305_v49  ;;  %1305 = vmatpush1.msra.mxu0 %v240_v50  ;;  %v337_v49 = vld [vmem:[#allocation5 + $0x748] sm:$0xff]  ;;  %v272_v50 = vld [vmem:[#allocation5 + $0x540] sm:$0xff] }
  0x78   :  { %1382 = vmatpush1.msra.mxu1 %v304_v51  ;;  %1306 = vmatprep.subr.mxu0 %v239_v52  ;;  %v336_v51 = vld [vmem:[#allocation5 + $0x740] sm:$0xff]  ;;  %v271_v52 = vld [vmem:[#allocation5 + $0x538] sm:$0xff] }
  0x79   :  { %1383 = vmatprep.subr.mxu1 %v303_v53  ;;  %1307 = vmatpush1.msra.mxu0 %v238_v54  ;;  %v335_v53 = vld [vmem:[#allocation5 + $0x738] sm:$0xff]  ;;  %v270_v54 = vld [vmem:[#allocation5 + $0x530] sm:$0xff] }
  0x7a   :  { %1384 = vmatpush1.msra.mxu1 %v302_v55  ;;  %1308 = vmatprep.subr.mxu0 %v237_v56  ;;  %v334_v55 = vld [vmem:[#allocation5 + $0x730] sm:$0xff]  ;;  %v73_v56 = vld [vmem:[#allocation2 + $0x108] sm:$0xff] }
  0x7b   :  { %1385 = vmatprep.subr.mxu1 %v301_v57  ;;  %1309 = vmatpush1.msra.mxu0 %v236_v58  ;;  %v75_v57 = vld [vmem:[#allocation2 + $0x118] sm:$0xff]  ;;  %v269_v58 = vld [vmem:[#allocation5 + $0x528] sm:$0xff] }
  0x7c   :  { %1386 = vmatpush1.msra.mxu1 %v300_v59  ;;  %1310 = vmatprep.subr.mxu0 %v235_v60  ;;  %v333_v59 = vld [vmem:[#allocation5 + $0x728] sm:$0xff]  ;;  %v72_v60 = vld [vmem:[#allocation2 + $0x100] sm:$0xff] }
  0x7d   :  { %1387 = vmatprep.subr.mxu1 %v299_v61  ;;  %1311 = vmatpush1.msra.mxu0 %v234_v62  ;;  %v74_v61 = vld [vmem:[#allocation2 + $0x110] sm:$0xff]  ;;  %v268_v62 = vld [vmem:[#allocation5 + $0x520] sm:$0xff] }
  0x7e   :  { %1388 = vmatpush1.msra.mxu1 %v298_v63  ;;  %1312 = vmatprep.subr.mxu0 %v233_v0  ;;  %v332_v63 = vld [vmem:[#allocation5 + $0x720] sm:$0xff]  ;;  %v267_v0 = vld [vmem:[#allocation5 + $0x518] sm:$0xff] }
  0x7f   :  { %1389 = vmatprep.subr.mxu1 %v297_v1  ;;  %1313 = vmatpush1.msra.mxu0 %v232_v2  ;;  %v331_v1 = vld [vmem:[#allocation5 + $0x718] sm:$0xff]  ;;  %v266_v2 = vld [vmem:[#allocation5 + $0x510] sm:$0xff] }
  0x80   :  { %1390 = vmatpush1.msra.mxu1 %v296_v3  ;;  %1314 = vmatprep.subr.mxu0 %v295_v4  ;;  %v330_v3 = vld [vmem:[#allocation5 + $0x710] sm:$0xff]  ;;  %v265_v4 = vld [vmem:[#allocation5 + $0x508] sm:$0xff] }
  0x81   :  { %1391 = vmatprep.subr.mxu1 %v359_v5  ;;  %1315 = vmatpush2.msra.mxu0 %v294_v6  ;;  %v329_v5 = vld [vmem:[#allocation5 + $0x708] sm:$0xff]  ;;  %v264_v6 = vld [vmem:[#allocation5 + $0x500] sm:$0xff] }
  0x82   :  { %1392 = vmatpush2.msra.mxu1 %v358_v7  ;;  %1316 = vmatprep.subr.mxu0 %v293_v8  ;;  %v45_v7 = vld [vmem:[#allocation2 + $0x28] sm:$0xff]  ;;  %v328_v8 = vld [vmem:[#allocation5 + $0x700] sm:$0xff] }
  0x83   :  { %1393 = vmatprep.subr.mxu1 %v357_v9  ;;  %1317 = vmatpush2.msra.mxu0 %v292_v10  ;;  %v44_v9 = vld [vmem:[#allocation2 + $0x20] sm:$0xff]  ;;  %v47_v10 = vld [vmem:[#allocation2 + $0x38] sm:$0xff] }
  0x84   :  { %1394 = vmatpush2.msra.mxu1 %v356_v11  ;;  %1318 = vmatprep.subr.mxu0 %v291_v12  ;;  %v391_v11 = vld [vmem:[#allocation5 + $0x8f8] sm:$0xff] }
  0x85   :  { %1395 = vmatprep.subr.mxu1 %v355_v13  ;;  %1319 = vmatpush2.msra.mxu0 %v290_v14  ;;  %v455_v12 = vld [vmem:[#allocation5 + $0xaf8] sm:$0xff]  ;;  %v46_v13 = vld [vmem:[#allocation2 + $0x30] sm:$0xff] }
  0x86   :  { %1396 = vmatpush2.msra.mxu1 %v354_v15  ;;  %1320 = vmatprep.subr.mxu0 %v289_v16  ;;  %v390_v14 = vld [vmem:[#allocation5 + $0x8f0] sm:$0xff]  ;;  %v389_v16 = vld [vmem:[#allocation5 + $0x8e8] sm:$0xff] }
  0x87   :  { %1397 = vmatprep.subr.mxu1 %v353_v17  ;;  %1321 = vmatpush2.msra.mxu0 %v288_v18  ;;  %v454_v15 = vld [vmem:[#allocation5 + $0xaf0] sm:$0xff]  ;;  %v453_v17 = vld [vmem:[#allocation5 + $0xae8] sm:$0xff] }
  0x88   :  { %1398 = vmatpush2.msra.mxu1 %v352_v19  ;;  %1322 = vmatprep.subr.mxu0 %v287_v20  ;;  %v77_v18 = vld [vmem:[#allocation2 + $0x128] sm:$0xff]  ;;  %v388_v19 = vld [vmem:[#allocation5 + $0x8e0] sm:$0xff] }
  0x89   :  { %1399 = vmatprep.subr.mxu1 %v351_v21  ;;  %1323 = vmatpush2.msra.mxu0 %v286_v22  ;;  %v452_v20 = vld [vmem:[#allocation5 + $0xae0] sm:$0xff]  ;;  %v387_v22 = vld [vmem:[#allocation5 + $0x8d8] sm:$0xff] }
  0x8a   :  { %1400 = vmatpush2.msra.mxu1 %v350_v23  ;;  %1324 = vmatprep.subr.mxu0 %v285_v24  ;;  %v76_v21 = vld [vmem:[#allocation2 + $0x120] sm:$0xff]  ;;  %v451_v23 = vld [vmem:[#allocation5 + $0xad8] sm:$0xff] }
  0x8b   :  { %1401 = vmatprep.subr.mxu1 %v349_v25  ;;  %1325 = vmatpush2.msra.mxu0 %v284_v26  ;;  %v79_v24 = vld [vmem:[#allocation2 + $0x138] sm:$0xff]  ;;  %v386_v25 = vld [vmem:[#allocation5 + $0x8d0] sm:$0xff] }
  0x8c   :  { %1402 = vmatpush2.msra.mxu1 %v348_v27  ;;  %1326 = vmatprep.subr.mxu0 %v283_v28  ;;  %v450_v26 = vld [vmem:[#allocation5 + $0xad0] sm:$0xff]  ;;  %v385_v27 = vld [vmem:[#allocation5 + $0x8c8] sm:$0xff] }
  0x8d   :  { %1403 = vmatprep.subr.mxu1 %v347_v29  ;;  %1327 = vmatpush2.msra.mxu0 %v282_v30  ;;  %v78_v28 = vld [vmem:[#allocation2 + $0x130] sm:$0xff]  ;;  %v449_v29 = vld [vmem:[#allocation5 + $0xac8] sm:$0xff]  ;;  %v384_v30 = vld [vmem:[#allocation5 + $0x8c0] sm:$0xff] }
  0x8e   :  { %1404 = vmatpush2.msra.mxu1 %v346_v31  ;;  %1328 = vmatprep.subr.mxu0 %v281_v32  ;;  %v448_v31 = vld [vmem:[#allocation5 + $0xac0] sm:$0xff]  ;;  %v383_v32 = vld [vmem:[#allocation5 + $0x8b8] sm:$0xff] }
  0x8f   :  { %1405 = vmatprep.subr.mxu1 %v345_v33  ;;  %1329 = vmatpush2.msra.mxu0 %v280_v34  ;;  %v447_v33 = vld [vmem:[#allocation5 + $0xab8] sm:$0xff]  ;;  %v382_v34 = vld [vmem:[#allocation5 + $0x8b0] sm:$0xff] }
  0x90   :  { %1406 = vmatpush2.msra.mxu1 %v344_v35  ;;  %1330 = vmatprep.subr.mxu0 %v279_v36  ;;  %v446_v35 = vld [vmem:[#allocation5 + $0xab0] sm:$0xff]  ;;  %v381_v36 = vld [vmem:[#allocation5 + $0x8a8] sm:$0xff] }
  0x91   :  { %1407 = vmatprep.subr.mxu1 %v343_v37  ;;  %1331 = vmatpush2.msra.mxu0 %v278_v38  ;;  %v445_v37 = vld [vmem:[#allocation5 + $0xaa8] sm:$0xff]  ;;  %v380_v38 = vld [vmem:[#allocation5 + $0x8a0] sm:$0xff] }
  0x92   :  { %1408 = vmatpush2.msra.mxu1 %v342_v39  ;;  %1332 = vmatprep.subr.mxu0 %v277_v40  ;;  %v444_v39 = vld [vmem:[#allocation5 + $0xaa0] sm:$0xff]  ;;  %v379_v40 = vld [vmem:[#allocation5 + $0x898] sm:$0xff] }
  0x93   :  { %1409 = vmatprep.subr.mxu1 %v341_v41  ;;  %1333 = vmatpush2.msra.mxu0 %v276_v42  ;;  %v443_v41 = vld [vmem:[#allocation5 + $0xa98] sm:$0xff]  ;;  %v378_v42 = vld [vmem:[#allocation5 + $0x890] sm:$0xff] }
  0x94   :  { %1410 = vmatpush2.msra.mxu1 %v340_v43  ;;  %1334 = vmatprep.subr.mxu0 %v275_v44  ;;  %v442_v43 = vld [vmem:[#allocation5 + $0xa90] sm:$0xff]  ;;  %v377_v44 = vld [vmem:[#allocation5 + $0x888] sm:$0xff] }
  0x95   :  { %1411 = vmatprep.subr.mxu1 %v339_v45  ;;  %1335 = vmatpush2.msra.mxu0 %v274_v46  ;;  %v441_v45 = vld [vmem:[#allocation5 + $0xa88] sm:$0xff]  ;;  %v376_v46 = vld [vmem:[#allocation5 + $0x880] sm:$0xff] }
  0x96   :  { %1412 = vmatpush2.msra.mxu1 %v338_v47  ;;  %1336 = vmatprep.subr.mxu0 %v273_v48  ;;  %v440_v47 = vld [vmem:[#allocation5 + $0xa80] sm:$0xff]  ;;  %v375_v48 = vld [vmem:[#allocation5 + $0x878] sm:$0xff] }
  0x97   :  { %1413 = vmatprep.subr.mxu1 %v337_v49  ;;  %1337 = vmatpush2.msra.mxu0 %v272_v50  ;;  %v439_v49 = vld [vmem:[#allocation5 + $0xa78] sm:$0xff]  ;;  %v374_v50 = vld [vmem:[#allocation5 + $0x870] sm:$0xff] }
  0x98   :  { %1414 = vmatpush2.msra.mxu1 %v336_v51  ;;  %1338 = vmatprep.subr.mxu0 %v271_v52  ;;  %v438_v51 = vld [vmem:[#allocation5 + $0xa70] sm:$0xff]  ;;  %v373_v52 = vld [vmem:[#allocation5 + $0x868] sm:$0xff] }
  0x99   :  { %1415 = vmatprep.subr.mxu1 %v335_v53  ;;  %1339 = vmatpush2.msra.mxu0 %v270_v54  ;;  %v437_v53 = vld [vmem:[#allocation5 + $0xa68] sm:$0xff]  ;;  %v372_v54 = vld [vmem:[#allocation5 + $0x860] sm:$0xff] }
  0x9a   :  { %1416 = vmatpush2.msra.mxu1 %v334_v55  ;;  %1198 = vmatprep.mubr.f32.mxu0 %v73_v56  ;;  %v436_v55 = vld [vmem:[#allocation5 + $0xa60] sm:$0xff]  ;;  %v371_v56 = vld [vmem:[#allocation5 + $0x858] sm:$0xff] }
  0x9b   :  { %1275 = vmatprep.mubr.f32.mxu1 %v75_v57  ;;  %1340 = vmatprep.subr.mxu0 %v269_v58  ;;  %v435_v57 = vld [vmem:[#allocation5 + $0xa58] sm:$0xff]  ;;  %v370_v58 = vld [vmem:[#allocation5 + $0x850] sm:$0xff] }
  0x9c   :  { %1417 = vmatprep.subr.mxu1 %v333_v59  ;;  %1199 = vmatmul.mubr.f32.gmra.mxu0 %v72_v60  ;;  %v434_v59 = vld [vmem:[#allocation5 + $0xa50] sm:$0xff]  ;;  %v369_v60 = vld [vmem:[#allocation5 + $0x848] sm:$0xff] }
  0x9d   :  { %1276 = vmatmul.mubr.f32.gmra.mxu1 %v74_v61  ;;  %1341 = vmatpush2.msra.mxu0 %v268_v62  ;;  %v433_v61 = vld [vmem:[#allocation5 + $0xa48] sm:$0xff]  ;;  %v368_v62 = vld [vmem:[#allocation5 + $0x840] sm:$0xff] }
  0x9e   :  { %1418 = vmatpush2.msra.mxu1 %v332_v63  ;;  %1342 = vmatprep.subr.mxu0 %v267_v0  ;;  %v432_v63 = vld [vmem:[#allocation5 + $0xa40] sm:$0xff]  ;;  %v367_v0 = vld [vmem:[#allocation5 + $0x838] sm:$0xff] }
  0x9f   :  { %1419 = vmatprep.subr.mxu1 %v331_v1  ;;  %1343 = vmatpush2.msra.mxu0 %v266_v2  ;;  %v431_v1 = vld [vmem:[#allocation5 + $0xa38] sm:$0xff]  ;;  %v366_v2 = vld [vmem:[#allocation5 + $0x830] sm:$0xff] }
  0xa0   :  { %1420 = vmatpush2.msra.mxu1 %v330_v3  ;;  %1344 = vmatprep.subr.mxu0 %v265_v4  ;;  %v430_v3 = vld [vmem:[#allocation5 + $0xa30] sm:$0xff]  ;;  %v365_v4 = vld [vmem:[#allocation5 + $0x828] sm:$0xff] }
  0xa1   :  { %1421 = vmatprep.subr.mxu1 %v329_v5  ;;  %1345 = vmatpush2.msra.mxu0 %v264_v6  ;;  %v429_v5 = vld [vmem:[#allocation5 + $0xa28] sm:$0xff]  ;;  %v364_v6 = vld [vmem:[#allocation5 + $0x820] sm:$0xff] }
  0xa2   :  { %1346 = vmatprep.mubr.f32.mxu0 %v45_v7  ;;  %1422 = vmatpush2.msra.mxu1 %v328_v8  ;;  %v428_v7 = vld [vmem:[#allocation5 + $0xa20] sm:$0xff]  ;;  %v363_v8 = vld [vmem:[#allocation5 + $0x818] sm:$0xff] }
  0xa3   :  { %1347 = vmatmul.mubr.f32.vlgmr.msra.gmra.mxu0 %v44_v9  ;;  %1423 = vmatprep.mubr.f32.mxu1 %v47_v10  ;;  %v427_v9 = vld [vmem:[#allocation5 + $0xa18] sm:$0xff]  ;;  %v362_v10 = vld [vmem:[#allocation5 + $0x810] sm:$0xff] }
  0xa4   :  { %1436 = vmatprep.subr.mxu0 %v391_v11  ;;  %1513 = vmatprep.subr.mxu1 %v455_v12  ;;  %v426_v11 = vld [vmem:[#allocation5 + $0xa10] sm:$0xff]  ;;  %v361_v12 = vld [vmem:[#allocation5 + $0x808] sm:$0xff] }
  0xa5   :  { %1424 = vmatmul.mubr.f32.vlgmr.msra.gmra.mxu1 %v46_v13  ;;  %1437 = vmatpush1.msra.mxu0 %v390_v14  ;;  %v425_v13 = vld [vmem:[#allocation5 + $0xa08] sm:$0xff]  ;;  %v360_v14 = vld [vmem:[#allocation5 + $0x800] sm:$0xff] }
  0xa6   :  { %1514 = vmatpush1.msra.mxu1 %v454_v15  ;;  %1438 = vmatprep.subr.mxu0 %v389_v16  ;;  %v424_v15 = vld [vmem:[#allocation5 + $0xa00] sm:$0xff]  ;;  %v423_v16 = vld [vmem:[#allocation5 + $0x9f8] sm:$0xff] }
  0xa7   :  { %1515 = vmatprep.subr.mxu1 %v453_v17  ;;  %1352 = vmatprep.mubr.f32.mxu0 %v77_v18  ;;  %v487_v17 = vld [vmem:[#allocation5 + $0xbf8] sm:$0xff]  ;;  %v422_v18 = vld [vmem:[#allocation5 + $0x9f0] sm:$0xff] }
  0xa8   :  { %1439 = vmatpush1.msra.mxu0 %v388_v19  ;;  %1516 = vmatpush1.msra.mxu1 %v452_v20  ;;  %v486_v19 = vld [vmem:[#allocation5 + $0xbf0] sm:$0xff]  ;;  %v421_v20 = vld [vmem:[#allocation5 + $0x9e8] sm:$0xff] }
  0xa9   :  { %1353 = vmatmul.mubr.f32.gmra.mxu0 %v76_v21  ;;  %1440 = vmatprep.subr.mxu0 %v387_v22  ;;  %v485_v21 = vld [vmem:[#allocation5 + $0xbe8] sm:$0xff]  ;;  %v420_v22 = vld [vmem:[#allocation5 + $0x9e0] sm:$0xff] }
  0xaa   :  { %1517 = vmatprep.subr.mxu1 %v451_v23  ;;  %1429 = vmatprep.mubr.f32.mxu1 %v79_v24  ;;  %v484_v23 = vld [vmem:[#allocation5 + $0xbe0] sm:$0xff]  ;;  %v419_v24 = vld [vmem:[#allocation5 + $0x9d8] sm:$0xff] }
  0xab   :  { %1441 = vmatpush1.msra.mxu0 %v386_v25  ;;  %1518 = vmatpush1.msra.mxu1 %v450_v26  ;;  %v483_v25 = vld [vmem:[#allocation5 + $0xbd8] sm:$0xff]  ;;  %v418_v26 = vld [vmem:[#allocation5 + $0x9d0] sm:$0xff] }
  0xac   :  { %1442 = vmatprep.subr.mxu0 %v385_v27  ;;  %1430 = vmatmul.mubr.f32.gmra.mxu1 %v78_v28  ;;  %v482_v27 = vld [vmem:[#allocation5 + $0xbd0] sm:$0xff]  ;;  %v417_v28 = vld [vmem:[#allocation5 + $0x9c8] sm:$0xff] }
  0xad   :  { %1519 = vmatprep.subr.mxu1 %v449_v29  ;;  %1443 = vmatpush1.msra.mxu0 %v384_v30  ;;  %v481_v29 = vld [vmem:[#allocation5 + $0xbc8] sm:$0xff]  ;;  %v416_v30 = vld [vmem:[#allocation5 + $0x9c0] sm:$0xff] }
  0xae   :  { %1520 = vmatpush1.msra.mxu1 %v448_v31  ;;  %1444 = vmatprep.subr.mxu0 %v383_v32  ;;  %v480_v31 = vld [vmem:[#allocation5 + $0xbc0] sm:$0xff]  ;;  %v415_v32 = vld [vmem:[#allocation5 + $0x9b8] sm:$0xff] }
  0xaf   :  { %1521 = vmatprep.subr.mxu1 %v447_v33  ;;  %1445 = vmatpush1.msra.mxu0 %v382_v34  ;;  %v479_v33 = vld [vmem:[#allocation5 + $0xbb8] sm:$0xff]  ;;  %v414_v34 = vld [vmem:[#allocation5 + $0x9b0] sm:$0xff] }
  0xb0   :  { %1522 = vmatpush1.msra.mxu1 %v446_v35  ;;  %1446 = vmatprep.subr.mxu0 %v381_v36  ;;  %v478_v35 = vld [vmem:[#allocation5 + $0xbb0] sm:$0xff]  ;;  %v413_v36 = vld [vmem:[#allocation5 + $0x9a8] sm:$0xff] }
  0xb1   :  { %1523 = vmatprep.subr.mxu1 %v445_v37  ;;  %1447 = vmatpush1.msra.mxu0 %v380_v38  ;;  %v477_v37 = vld [vmem:[#allocation5 + $0xba8] sm:$0xff]  ;;  %v412_v38 = vld [vmem:[#allocation5 + $0x9a0] sm:$0xff] }
  0xb2   :  { %1524 = vmatpush1.msra.mxu1 %v444_v39  ;;  %1448 = vmatprep.subr.mxu0 %v379_v40  ;;  %v476_v39 = vld [vmem:[#allocation5 + $0xba0] sm:$0xff]  ;;  %v411_v40 = vld [vmem:[#allocation5 + $0x998] sm:$0xff] }
  0xb3   :  { %1525 = vmatprep.subr.mxu1 %v443_v41  ;;  %1449 = vmatpush1.msra.mxu0 %v378_v42  ;;  %v475_v41 = vld [vmem:[#allocation5 + $0xb98] sm:$0xff]  ;;  %v410_v42 = vld [vmem:[#allocation5 + $0x990] sm:$0xff] }
  0xb4   :  { %1526 = vmatpush1.msra.mxu1 %v442_v43  ;;  %1450 = vmatprep.subr.mxu0 %v377_v44  ;;  %v474_v43 = vld [vmem:[#allocation5 + $0xb90] sm:$0xff]  ;;  %v409_v44 = vld [vmem:[#allocation5 + $0x988] sm:$0xff] }
  0xb5   :  { %1527 = vmatprep.subr.mxu1 %v441_v45  ;;  %1451 = vmatpush1.msra.mxu0 %v376_v46  ;;  %v473_v45 = vld [vmem:[#allocation5 + $0xb88] sm:$0xff]  ;;  %v408_v46 = vld [vmem:[#allocation5 + $0x980] sm:$0xff] }
  0xb6   :  { %1528 = vmatpush1.msra.mxu1 %v440_v47  ;;  %1452 = vmatprep.subr.mxu0 %v375_v48  ;;  %v472_v47 = vld [vmem:[#allocation5 + $0xb80] sm:$0xff]  ;;  %v407_v48 = vld [vmem:[#allocation5 + $0x978] sm:$0xff] }
  0xb7   :  { %1529 = vmatprep.subr.mxu1 %v439_v49  ;;  %1453 = vmatpush1.msra.mxu0 %v374_v50  ;;  %v471_v49 = vld [vmem:[#allocation5 + $0xb78] sm:$0xff]  ;;  %v406_v50 = vld [vmem:[#allocation5 + $0x970] sm:$0xff] }
  0xb8   :  { %1530 = vmatpush1.msra.mxu1 %v438_v51  ;;  %1454 = vmatprep.subr.mxu0 %v373_v52  ;;  %v470_v51 = vld [vmem:[#allocation5 + $0xb70] sm:$0xff]  ;;  %v405_v52 = vld [vmem:[#allocation5 + $0x968] sm:$0xff] }
  0xb9   :  { %1531 = vmatprep.subr.mxu1 %v437_v53  ;;  %1455 = vmatpush1.msra.mxu0 %v372_v54  ;;  %v469_v53 = vld [vmem:[#allocation5 + $0xb68] sm:$0xff]  ;;  %v404_v54 = vld [vmem:[#allocation5 + $0x960] sm:$0xff] }
  0xba   :  { %1532 = vmatpush1.msra.mxu1 %v436_v55  ;;  %1456 = vmatprep.subr.mxu0 %v371_v56  ;;  %v468_v55 = vld [vmem:[#allocation5 + $0xb60] sm:$0xff]  ;;  %v403_v56 = vld [vmem:[#allocation5 + $0x958] sm:$0xff] }
  0xbb   :  { %1533 = vmatprep.subr.mxu1 %v435_v57  ;;  %1457 = vmatpush1.msra.mxu0 %v370_v58  ;;  %v467_v57 = vld [vmem:[#allocation5 + $0xb58] sm:$0xff]  ;;  %v402_v58 = vld [vmem:[#allocation5 + $0x950] sm:$0xff] }
  0xbc   :  { %1534 = vmatpush1.msra.mxu1 %v434_v59  ;;  %1458 = vmatprep.subr.mxu0 %v369_v60  ;;  %v466_v59 = vld [vmem:[#allocation5 + $0xb50] sm:$0xff]  ;;  %v401_v60 = vld [vmem:[#allocation5 + $0x948] sm:$0xff] }
  0xbd   :  { %1535 = vmatprep.subr.mxu1 %v433_v61  ;;  %1459 = vmatpush1.msra.mxu0 %v368_v62  ;;  %v465_v61 = vld [vmem:[#allocation5 + $0xb48] sm:$0xff]  ;;  %v400_v62 = vld [vmem:[#allocation5 + $0x940] sm:$0xff] }
  0xbe   :  { %1536 = vmatpush1.msra.mxu1 %v432_v63  ;;  %1460 = vmatprep.subr.mxu0 %v367_v0  ;;  %v464_v63 = vld [vmem:[#allocation5 + $0xb40] sm:$0xff]  ;;  %v399_v0 = vld [vmem:[#allocation5 + $0x938] sm:$0xff] }
  0xbf   :  { %1537 = vmatprep.subr.mxu1 %v431_v1  ;;  %1461 = vmatpush1.msra.mxu0 %v366_v2  ;;  %v463_v1 = vld [vmem:[#allocation5 + $0xb38] sm:$0xff]  ;;  %v398_v2 = vld [vmem:[#allocation5 + $0x930] sm:$0xff] }
  0xc0   :  { %1538 = vmatpush1.msra.mxu1 %v430_v3  ;;  %1462 = vmatprep.subr.mxu0 %v365_v4  ;;  %v462_v3 = vld [vmem:[#allocation5 + $0xb30] sm:$0xff]  ;;  %v397_v4 = vld [vmem:[#allocation5 + $0x928] sm:$0xff] }
  0xc1   :  { %1539 = vmatprep.subr.mxu1 %v429_v5  ;;  %1463 = vmatpush1.msra.mxu0 %v364_v6  ;;  %v461_v5 = vld [vmem:[#allocation5 + $0xb28] sm:$0xff]  ;;  %v396_v6 = vld [vmem:[#allocation5 + $0x920] sm:$0xff] }
  0xc2   :  { %1540 = vmatpush1.msra.mxu1 %v428_v7  ;;  %1464 = vmatprep.subr.mxu0 %v363_v8  ;;  %v460_v7 = vld [vmem:[#allocation5 + $0xb20] sm:$0xff]  ;;  %v395_v8 = vld [vmem:[#allocation5 + $0x918] sm:$0xff] }
  0xc3   :  { %1541 = vmatprep.subr.mxu1 %v427_v9  ;;  %1465 = vmatpush1.msra.mxu0 %v362_v10  ;;  %v459_v9 = vld [vmem:[#allocation5 + $0xb18] sm:$0xff]  ;;  %v394_v10 = vld [vmem:[#allocation5 + $0x910] sm:$0xff] }
  0xc4   :  { %1542 = vmatpush1.msra.mxu1 %v426_v11  ;;  %1466 = vmatprep.subr.mxu0 %v361_v12  ;;  %v458_v11 = vld [vmem:[#allocation5 + $0xb10] sm:$0xff]  ;;  %v393_v12 = vld [vmem:[#allocation5 + $0x908] sm:$0xff] }
  0xc5   :  { %1543 = vmatprep.subr.mxu1 %v425_v13  ;;  %1467 = vmatpush1.msra.mxu0 %v360_v14  ;;  %v457_v13 = vld [vmem:[#allocation5 + $0xb08] sm:$0xff]  ;;  %v392_v14 = vld [vmem:[#allocation5 + $0x900] sm:$0xff] }
  0xc6   :  { %1544 = vmatpush1.msra.mxu1 %v424_v15  ;;  %1468 = vmatprep.subr.mxu0 %v423_v16  ;;  %v49_v15 = vld [vmem:[#allocation2 + $0x48] sm:$0xff]  ;;  %v456_v16 = vld [vmem:[#allocation5 + $0xb00] sm:$0xff] }
  0xc7   :  { %1545 = vmatprep.subr.mxu1 %v487_v17  ;;  %1469 = vmatpush2.msra.mxu0 %v422_v18  ;;  %v48_v17 = vld [vmem:[#allocation2 + $0x40] sm:$0xff]  ;;  %v51_v18 = vld [vmem:[#allocation2 + $0x58] sm:$0xff] }
  0xc8   :  { %1546 = vmatpush2.msra.mxu1 %v486_v19  ;;  %1470 = vmatprep.subr.mxu0 %v421_v20  ;;  %v519_v19 = vld [vmem:[#allocation5 + $0xcf8] sm:$0xff] }
  0xc9   :  { %1547 = vmatprep.subr.mxu1 %v485_v21  ;;  %1471 = vmatpush2.msra.mxu0 %v420_v22  ;;  %v583_v20 = vld [vmem:[#allocation5 + $0xef8] sm:$0xff]  ;;  %v50_v21 = vld [vmem:[#allocation2 + $0x50] sm:$0xff] }
  0xca   :  { %1548 = vmatpush2.msra.mxu1 %v484_v23  ;;  %1472 = vmatprep.subr.mxu0 %v419_v24  ;;  %v518_v22 = vld [vmem:[#allocation5 + $0xcf0] sm:$0xff]  ;;  %v517_v24 = vld [vmem:[#allocation5 + $0xce8] sm:$0xff] }
  0xcb   :  { %1549 = vmatprep.subr.mxu1 %v483_v25  ;;  %1473 = vmatpush2.msra.mxu0 %v418_v26  ;;  %v582_v23 = vld [vmem:[#allocation5 + $0xef0] sm:$0xff]  ;;  %v581_v25 = vld [vmem:[#allocation5 + $0xee8] sm:$0xff] }
  0xcc   :  { %1550 = vmatpush2.msra.mxu1 %v482_v27  ;;  %1474 = vmatprep.subr.mxu0 %v417_v28  ;;  %v81_v26 = vld [vmem:[#allocation2 + $0x148] sm:$0xff]  ;;  %v516_v27 = vld [vmem:[#allocation5 + $0xce0] sm:$0xff] }
  0xcd   :  { %1551 = vmatprep.subr.mxu1 %v481_v29  ;;  %1475 = vmatpush2.msra.mxu0 %v416_v30  ;;  %v580_v28 = vld [vmem:[#allocation5 + $0xee0] sm:$0xff]  ;;  %v515_v30 = vld [vmem:[#allocation5 + $0xcd8] sm:$0xff] }
  0xce   :  { %1552 = vmatpush2.msra.mxu1 %v480_v31  ;;  %1476 = vmatprep.subr.mxu0 %v415_v32  ;;  %v80_v29 = vld [vmem:[#allocation2 + $0x140] sm:$0xff]  ;;  %v579_v31 = vld [vmem:[#allocation5 + $0xed8] sm:$0xff] }
  0xcf   :  { %1553 = vmatprep.subr.mxu1 %v479_v33  ;;  %1477 = vmatpush2.msra.mxu0 %v414_v34  ;;  %v83_v32 = vld [vmem:[#allocation2 + $0x158] sm:$0xff]  ;;  %v514_v33 = vld [vmem:[#allocation5 + $0xcd0] sm:$0xff] }
  0xd0   :  { %1554 = vmatpush2.msra.mxu1 %v478_v35  ;;  %1478 = vmatprep.subr.mxu0 %v413_v36  ;;  %v578_v34 = vld [vmem:[#allocation5 + $0xed0] sm:$0xff]  ;;  %v513_v35 = vld [vmem:[#allocation5 + $0xcc8] sm:$0xff] }
  0xd1   :  { %1555 = vmatprep.subr.mxu1 %v477_v37  ;;  %1479 = vmatpush2.msra.mxu0 %v412_v38  ;;  %v82_v36 = vld [vmem:[#allocation2 + $0x150] sm:$0xff]  ;;  %v577_v37 = vld [vmem:[#allocation5 + $0xec8] sm:$0xff]  ;;  %v512_v38 = vld [vmem:[#allocation5 + $0xcc0] sm:$0xff] }
  0xd2   :  { %1556 = vmatpush2.msra.mxu1 %v476_v39  ;;  %1480 = vmatprep.subr.mxu0 %v411_v40  ;;  %v576_v39 = vld [vmem:[#allocation5 + $0xec0] sm:$0xff]  ;;  %v511_v40 = vld [vmem:[#allocation5 + $0xcb8] sm:$0xff] }
  0xd3   :  { %1557 = vmatprep.subr.mxu1 %v475_v41  ;;  %1481 = vmatpush2.msra.mxu0 %v410_v42  ;;  %v575_v41 = vld [vmem:[#allocation5 + $0xeb8] sm:$0xff]  ;;  %v510_v42 = vld [vmem:[#allocation5 + $0xcb0] sm:$0xff] }
  0xd4   :  { %1558 = vmatpush2.msra.mxu1 %v474_v43  ;;  %1482 = vmatprep.subr.mxu0 %v409_v44  ;;  %v574_v43 = vld [vmem:[#allocation5 + $0xeb0] sm:$0xff]  ;;  %v509_v44 = vld [vmem:[#allocation5 + $0xca8] sm:$0xff] }
  0xd5   :  { %1559 = vmatprep.subr.mxu1 %v473_v45  ;;  %1483 = vmatpush2.msra.mxu0 %v408_v46  ;;  %v573_v45 = vld [vmem:[#allocation5 + $0xea8] sm:$0xff]  ;;  %v508_v46 = vld [vmem:[#allocation5 + $0xca0] sm:$0xff] }
  0xd6   :  { %1560 = vmatpush2.msra.mxu1 %v472_v47  ;;  %1484 = vmatprep.subr.mxu0 %v407_v48  ;;  %v572_v47 = vld [vmem:[#allocation5 + $0xea0] sm:$0xff]  ;;  %v507_v48 = vld [vmem:[#allocation5 + $0xc98] sm:$0xff] }
  0xd7   :  { %1561 = vmatprep.subr.mxu1 %v471_v49  ;;  %1485 = vmatpush2.msra.mxu0 %v406_v50  ;;  %v571_v49 = vld [vmem:[#allocation5 + $0xe98] sm:$0xff]  ;;  %v506_v50 = vld [vmem:[#allocation5 + $0xc90] sm:$0xff] }
  0xd8   :  { %1562 = vmatpush2.msra.mxu1 %v470_v51  ;;  %1486 = vmatprep.subr.mxu0 %v405_v52  ;;  %v570_v51 = vld [vmem:[#allocation5 + $0xe90] sm:$0xff]  ;;  %v505_v52 = vld [vmem:[#allocation5 + $0xc88] sm:$0xff] }
  0xd9   :  { %1563 = vmatprep.subr.mxu1 %v469_v53  ;;  %1487 = vmatpush2.msra.mxu0 %v404_v54  ;;  %v569_v53 = vld [vmem:[#allocation5 + $0xe88] sm:$0xff]  ;;  %v504_v54 = vld [vmem:[#allocation5 + $0xc80] sm:$0xff] }
  0xda   :  { %1564 = vmatpush2.msra.mxu1 %v468_v55  ;;  %1488 = vmatprep.subr.mxu0 %v403_v56  ;;  %v568_v55 = vld [vmem:[#allocation5 + $0xe80] sm:$0xff]  ;;  %v503_v56 = vld [vmem:[#allocation5 + $0xc78] sm:$0xff] }
  0xdb   :  { %1565 = vmatprep.subr.mxu1 %v467_v57  ;;  %1489 = vmatpush2.msra.mxu0 %v402_v58  ;;  %v567_v57 = vld [vmem:[#allocation5 + $0xe78] sm:$0xff]  ;;  %v502_v58 = vld [vmem:[#allocation5 + $0xc70] sm:$0xff] }
  0xdc   :  { %1566 = vmatpush2.msra.mxu1 %v466_v59  ;;  %1490 = vmatprep.subr.mxu0 %v401_v60  ;;  %v566_v59 = vld [vmem:[#allocation5 + $0xe70] sm:$0xff]  ;;  %v501_v60 = vld [vmem:[#allocation5 + $0xc68] sm:$0xff] }
  0xdd   :  { %1567 = vmatprep.subr.mxu1 %v465_v61  ;;  %1491 = vmatpush2.msra.mxu0 %v400_v62  ;;  %v565_v61 = vld [vmem:[#allocation5 + $0xe68] sm:$0xff]  ;;  %v500_v62 = vld [vmem:[#allocation5 + $0xc60] sm:$0xff] }
  0xde   :  { %1568 = vmatpush2.msra.mxu1 %v464_v63  ;;  %1492 = vmatprep.subr.mxu0 %v399_v0  ;;  %v564_v63 = vld [vmem:[#allocation5 + $0xe60] sm:$0xff]  ;;  %v499_v0 = vld [vmem:[#allocation5 + $0xc58] sm:$0xff] }
  0xdf   :  { %1569 = vmatprep.subr.mxu1 %v463_v1  ;;  %1493 = vmatpush2.msra.mxu0 %v398_v2  ;;  %v563_v1 = vld [vmem:[#allocation5 + $0xe58] sm:$0xff]  ;;  %v498_v2 = vld [vmem:[#allocation5 + $0xc50] sm:$0xff] }
  0xe0   :  { %1570 = vmatpush2.msra.mxu1 %v462_v3  ;;  %1494 = vmatprep.subr.mxu0 %v397_v4  ;;  %v562_v3 = vld [vmem:[#allocation5 + $0xe50] sm:$0xff]  ;;  %v497_v4 = vld [vmem:[#allocation5 + $0xc48] sm:$0xff] }
  0xe1   :  { %1571 = vmatprep.subr.mxu1 %v461_v5  ;;  %1495 = vmatpush2.msra.mxu0 %v396_v6  ;;  %v561_v5 = vld [vmem:[#allocation5 + $0xe48] sm:$0xff]  ;;  %v496_v6 = vld [vmem:[#allocation5 + $0xc40] sm:$0xff] }
  0xe2   :  { %1572 = vmatpush2.msra.mxu1 %v460_v7  ;;  %1496 = vmatprep.subr.mxu0 %v395_v8  ;;  %v560_v7 = vld [vmem:[#allocation5 + $0xe40] sm:$0xff]  ;;  %v495_v8 = vld [vmem:[#allocation5 + $0xc38] sm:$0xff] }
  0xe3   :  { %1573 = vmatprep.subr.mxu1 %v459_v9  ;;  %1497 = vmatpush2.msra.mxu0 %v394_v10  ;;  %v559_v9 = vld [vmem:[#allocation5 + $0xe38] sm:$0xff]  ;;  %v494_v10 = vld [vmem:[#allocation5 + $0xc30] sm:$0xff] }
  0xe4   :  { %1574 = vmatpush2.msra.mxu1 %v458_v11  ;;  %1498 = vmatprep.subr.mxu0 %v393_v12  ;;  %v558_v11 = vld [vmem:[#allocation5 + $0xe30] sm:$0xff]  ;;  %v493_v12 = vld [vmem:[#allocation5 + $0xc28] sm:$0xff] }
  0xe5   :  { %1575 = vmatprep.subr.mxu1 %v457_v13  ;;  %1499 = vmatpush2.msra.mxu0 %v392_v14  ;;  %v557_v13 = vld [vmem:[#allocation5 + $0xe28] sm:$0xff]  ;;  %v492_v14 = vld [vmem:[#allocation5 + $0xc20] sm:$0xff] }
  0xe6   :  { %1500 = vmatprep.mubr.f32.mxu0 %v49_v15  ;;  %1576 = vmatpush2.msra.mxu1 %v456_v16  ;;  %v556_v15 = vld [vmem:[#allocation5 + $0xe20] sm:$0xff]  ;;  %v491_v16 = vld [vmem:[#allocation5 + $0xc18] sm:$0xff] }
  0xe7   :  { %1501 = vmatmul.mubr.f32.vlgmr.msra.gmra.mxu0 %v48_v17  ;;  %1577 = vmatprep.mubr.f32.mxu1 %v51_v18  ;;  %v555_v17 = vld [vmem:[#allocation5 + $0xe18] sm:$0xff]  ;;  %v490_v18 = vld [vmem:[#allocation5 + $0xc10] sm:$0xff] }
  0xe8   :  { %1590 = vmatprep.subr.mxu0 %v519_v19  ;;  %1667 = vmatprep.subr.mxu1 %v583_v20  ;;  %v554_v19 = vld [vmem:[#allocation5 + $0xe10] sm:$0xff]  ;;  %v489_v20 = vld [vmem:[#allocation5 + $0xc08] sm:$0xff] }
  0xe9   :  { %1578 = vmatmul.mubr.f32.vlgmr.msra.gmra.mxu1 %v50_v21  ;;  %1591 = vmatpush1.msra.mxu0 %v518_v22  ;;  %v553_v21 = vld [vmem:[#allocation5 + $0xe08] sm:$0xff]  ;;  %v488_v22 = vld [vmem:[#allocation5 + $0xc00] sm:$0xff] }
  0xea   :  { %1668 = vmatpush1.msra.mxu1 %v582_v23  ;;  %1592 = vmatprep.subr.mxu0 %v517_v24  ;;  %v552_v23 = vld [vmem:[#allocation5 + $0xe00] sm:$0xff]  ;;  %v551_v24 = vld [vmem:[#allocation5 + $0xdf8] sm:$0xff] }
  0xeb   :  { %1669 = vmatprep.subr.mxu1 %v581_v25  ;;  %1506 = vmatprep.mubr.f32.mxu0 %v81_v26  ;;  %v615_v25 = vld [vmem:[#allocation5 + $0xff8] sm:$0xff]  ;;  %v550_v26 = vld [vmem:[#allocation5 + $0xdf0] sm:$0xff] }
  0xec   :  { %1593 = vmatpush1.msra.mxu0 %v516_v27  ;;  %1670 = vmatpush1.msra.mxu1 %v580_v28  ;;  %v614_v27 = vld [vmem:[#allocation5 + $0xff0] sm:$0xff]  ;;  %v549_v28 = vld [vmem:[#allocation5 + $0xde8] sm:$0xff] }
  0xed   :  { %1507 = vmatmul.mubr.f32.gmra.mxu0 %v80_v29  ;;  %1594 = vmatprep.subr.mxu0 %v515_v30  ;;  %v613_v29 = vld [vmem:[#allocation5 + $0xfe8] sm:$0xff]  ;;  %v548_v30 = vld [vmem:[#allocation5 + $0xde0] sm:$0xff] }
  0xee   :  { %1671 = vmatprep.subr.mxu1 %v579_v31  ;;  %1583 = vmatprep.mubr.f32.mxu1 %v83_v32  ;;  %v612_v31 = vld [vmem:[#allocation5 + $0xfe0] sm:$0xff]  ;;  %v547_v32 = vld [vmem:[#allocation5 + $0xdd8] sm:$0xff] }
  0xef   :  { %1595 = vmatpush1.msra.mxu0 %v514_v33  ;;  %1672 = vmatpush1.msra.mxu1 %v578_v34  ;;  %v611_v33 = vld [vmem:[#allocation5 + $0xfd8] sm:$0xff]  ;;  %v546_v34 = vld [vmem:[#allocation5 + $0xdd0] sm:$0xff] }
  0xf0   :  { %1596 = vmatprep.subr.mxu0 %v513_v35  ;;  %1584 = vmatmul.mubr.f32.gmra.mxu1 %v82_v36  ;;  %v610_v35 = vld [vmem:[#allocation5 + $0xfd0] sm:$0xff]  ;;  %v545_v36 = vld [vmem:[#allocation5 + $0xdc8] sm:$0xff] }
  0xf1   :  { %1673 = vmatprep.subr.mxu1 %v577_v37  ;;  %1597 = vmatpush1.msra.mxu0 %v512_v38  ;;  %v609_v37 = vld [vmem:[#allocation5 + $0xfc8] sm:$0xff]  ;;  %v544_v38 = vld [vmem:[#allocation5 + $0xdc0] sm:$0xff] }
  0xf2   :  { %1674 = vmatpush1.msra.mxu1 %v576_v39  ;;  %1598 = vmatprep.subr.mxu0 %v511_v40  ;;  %v608_v39 = vld [vmem:[#allocation5 + $0xfc0] sm:$0xff]  ;;  %v543_v40 = vld [vmem:[#allocation5 + $0xdb8] sm:$0xff] }
  0xf3   :  { %1675 = vmatprep.subr.mxu1 %v575_v41  ;;  %1599 = vmatpush1.msra.mxu0 %v510_v42  ;;  %v607_v41 = vld [vmem:[#allocation5 + $0xfb8] sm:$0xff]  ;;  %v542_v42 = vld [vmem:[#allocation5 + $0xdb0] sm:$0xff] }
  0xf4   :  { %1676 = vmatpush1.msra.mxu1 %v574_v43  ;;  %1600 = vmatprep.subr.mxu0 %v509_v44  ;;  %v606_v43 = vld [vmem:[#allocation5 + $0xfb0] sm:$0xff]  ;;  %v541_v44 = vld [vmem:[#allocation5 + $0xda8] sm:$0xff] }
  0xf5   :  { %1677 = vmatprep.subr.mxu1 %v573_v45  ;;  %1601 = vmatpush1.msra.mxu0 %v508_v46  ;;  %v605_v45 = vld [vmem:[#allocation5 + $0xfa8] sm:$0xff]  ;;  %v540_v46 = vld [vmem:[#allocation5 + $0xda0] sm:$0xff] }
  0xf6   :  { %1678 = vmatpush1.msra.mxu1 %v572_v47  ;;  %1602 = vmatprep.subr.mxu0 %v507_v48  ;;  %v604_v47 = vld [vmem:[#allocation5 + $0xfa0] sm:$0xff]  ;;  %v539_v48 = vld [vmem:[#allocation5 + $0xd98] sm:$0xff] }
  0xf7   :  { %1679 = vmatprep.subr.mxu1 %v571_v49  ;;  %1603 = vmatpush1.msra.mxu0 %v506_v50  ;;  %v603_v49 = vld [vmem:[#allocation5 + $0xf98] sm:$0xff]  ;;  %v538_v50 = vld [vmem:[#allocation5 + $0xd90] sm:$0xff] }
  0xf8   :  { %1680 = vmatpush1.msra.mxu1 %v570_v51  ;;  %1604 = vmatprep.subr.mxu0 %v505_v52  ;;  %v602_v51 = vld [vmem:[#allocation5 + $0xf90] sm:$0xff]  ;;  %v537_v52 = vld [vmem:[#allocation5 + $0xd88] sm:$0xff] }
  0xf9   :  { %1681 = vmatprep.subr.mxu1 %v569_v53  ;;  %1605 = vmatpush1.msra.mxu0 %v504_v54  ;;  %v601_v53 = vld [vmem:[#allocation5 + $0xf88] sm:$0xff]  ;;  %v536_v54 = vld [vmem:[#allocation5 + $0xd80] sm:$0xff] }
  0xfa   :  { %1682 = vmatpush1.msra.mxu1 %v568_v55  ;;  %1606 = vmatprep.subr.mxu0 %v503_v56  ;;  %v600_v55 = vld [vmem:[#allocation5 + $0xf80] sm:$0xff]  ;;  %v535_v56 = vld [vmem:[#allocation5 + $0xd78] sm:$0xff] }
  0xfb   :  { %1683 = vmatprep.subr.mxu1 %v567_v57  ;;  %1607 = vmatpush1.msra.mxu0 %v502_v58  ;;  %v599_v57 = vld [vmem:[#allocation5 + $0xf78] sm:$0xff]  ;;  %v534_v58 = vld [vmem:[#allocation5 + $0xd70] sm:$0xff] }
  0xfc   :  { %1684 = vmatpush1.msra.mxu1 %v566_v59  ;;  %1608 = vmatprep.subr.mxu0 %v501_v60  ;;  %v598_v59 = vld [vmem:[#allocation5 + $0xf70] sm:$0xff]  ;;  %v533_v60 = vld [vmem:[#allocation5 + $0xd68] sm:$0xff] }
  0xfd   :  { %1685 = vmatprep.subr.mxu1 %v565_v61  ;;  %1609 = vmatpush1.msra.mxu0 %v500_v62  ;;  %v597_v61 = vld [vmem:[#allocation5 + $0xf68] sm:$0xff]  ;;  %v532_v62 = vld [vmem:[#allocation5 + $0xd60] sm:$0xff] }
  0xfe   :  { %1686 = vmatpush1.msra.mxu1 %v564_v63  ;;  %1610 = vmatprep.subr.mxu0 %v499_v0  ;;  %v596_v63 = vld [vmem:[#allocation5 + $0xf60] sm:$0xff]  ;;  %v531_v0 = vld [vmem:[#allocation5 + $0xd58] sm:$0xff] }
  0xff   :  { %1687 = vmatprep.subr.mxu1 %v563_v1  ;;  %1611 = vmatpush1.msra.mxu0 %v498_v2  ;;  %v595_v1 = vld [vmem:[#allocation5 + $0xf58] sm:$0xff]  ;;  %v530_v2 = vld [vmem:[#allocation5 + $0xd50] sm:$0xff] }
 0x100   :  { %1688 = vmatpush1.msra.mxu1 %v562_v3  ;;  %1612 = vmatprep.subr.mxu0 %v497_v4  ;;  %v594_v3 = vld [vmem:[#allocation5 + $0xf50] sm:$0xff]  ;;  %v529_v4 = vld [vmem:[#allocation5 + $0xd48] sm:$0xff] }
 0x101   :  { %1689 = vmatprep.subr.mxu1 %v561_v5  ;;  %1613 = vmatpush1.msra.mxu0 %v496_v6  ;;  %v593_v5 = vld [vmem:[#allocation5 + $0xf48] sm:$0xff]  ;;  %v528_v6 = vld [vmem:[#allocation5 + $0xd40] sm:$0xff] }
 0x102   :  { %1690 = vmatpush1.msra.mxu1 %v560_v7  ;;  %1614 = vmatprep.subr.mxu0 %v495_v8  ;;  %v592_v7 = vld [vmem:[#allocation5 + $0xf40] sm:$0xff]  ;;  %v527_v8 = vld [vmem:[#allocation5 + $0xd38] sm:$0xff] }
 0x103   :  { %1691 = vmatprep.subr.mxu1 %v559_v9  ;;  %1615 = vmatpush1.msra.mxu0 %v494_v10  ;;  %v591_v9 = vld [vmem:[#allocation5 + $0xf38] sm:$0xff]  ;;  %v526_v10 = vld [vmem:[#allocation5 + $0xd30] sm:$0xff] }
 0x104   :  { %1692 = vmatpush1.msra.mxu1 %v558_v11  ;;  %1616 = vmatprep.subr.mxu0 %v493_v12  ;;  %v590_v11 = vld [vmem:[#allocation5 + $0xf30] sm:$0xff]  ;;  %v525_v12 = vld [vmem:[#allocation5 + $0xd28] sm:$0xff] }
 0x105   :  { %1693 = vmatprep.subr.mxu1 %v557_v13  ;;  %1617 = vmatpush1.msra.mxu0 %v492_v14  ;;  %v589_v13 = vld [vmem:[#allocation5 + $0xf28] sm:$0xff]  ;;  %v524_v14 = vld [vmem:[#allocation5 + $0xd20] sm:$0xff] }
 0x106   :  { %1694 = vmatpush1.msra.mxu1 %v556_v15  ;;  %1618 = vmatprep.subr.mxu0 %v491_v16  ;;  %v588_v15 = vld [vmem:[#allocation5 + $0xf20] sm:$0xff]  ;;  %v523_v16 = vld [vmem:[#allocation5 + $0xd18] sm:$0xff] }
 0x107   :  { %1695 = vmatprep.subr.mxu1 %v555_v17  ;;  %1619 = vmatpush1.msra.mxu0 %v490_v18  ;;  %v587_v17 = vld [vmem:[#allocation5 + $0xf18] sm:$0xff]  ;;  %v522_v18 = vld [vmem:[#allocation5 + $0xd10] sm:$0xff] }
 0x108   :  { %1696 = vmatpush1.msra.mxu1 %v554_v19  ;;  %1620 = vmatprep.subr.mxu0 %v489_v20  ;;  %v586_v19 = vld [vmem:[#allocation5 + $0xf10] sm:$0xff]  ;;  %v521_v20 = vld [vmem:[#allocation5 + $0xd08] sm:$0xff] }
 0x109   :  { %1697 = vmatprep.subr.mxu1 %v553_v21  ;;  %1621 = vmatpush1.msra.mxu0 %v488_v22  ;;  %v585_v21 = vld [vmem:[#allocation5 + $0xf08] sm:$0xff]  ;;  %v520_v22 = vld [vmem:[#allocation5 + $0xd00] sm:$0xff] }
 0x10a   :  { %1698 = vmatpush1.msra.mxu1 %v552_v23  ;;  %1622 = vmatprep.subr.mxu0 %v551_v24  ;;  %v53_v23 = vld [vmem:[#allocation2 + $0x68] sm:$0xff]  ;;  %v584_v24 = vld [vmem:[#allocation5 + $0xf00] sm:$0xff] }
 0x10b   :  { %1699 = vmatprep.subr.mxu1 %v615_v25  ;;  %1623 = vmatpush2.msra.mxu0 %v550_v26  ;;  %v52_v25 = vld [vmem:[#allocation2 + $0x60] sm:$0xff]  ;;  %v55_v26 = vld [vmem:[#allocation2 + $0x78] sm:$0xff] }
 0x10c   :  { %1700 = vmatpush2.msra.mxu1 %v614_v27  ;;  %1624 = vmatprep.subr.mxu0 %v549_v28  ;;  %v647_v27 = vld [vmem:[#allocation5 + $0x10f8] sm:$0xff] }
 0x10d   :  { %1701 = vmatprep.subr.mxu1 %v613_v29  ;;  %1625 = vmatpush2.msra.mxu0 %v548_v30  ;;  %v711_v28 = vld [vmem:[#allocation5 + $0x12f8] sm:$0xff]  ;;  %v54_v29 = vld [vmem:[#allocation2 + $0x70] sm:$0xff] }
 0x10e   :  { %1702 = vmatpush2.msra.mxu1 %v612_v31  ;;  %1626 = vmatprep.subr.mxu0 %v547_v32  ;;  %v646_v30 = vld [vmem:[#allocation5 + $0x10f0] sm:$0xff]  ;;  %v645_v32 = vld [vmem:[#allocation5 + $0x10e8] sm:$0xff] }
 0x10f   :  { %1703 = vmatprep.subr.mxu1 %v611_v33  ;;  %1627 = vmatpush2.msra.mxu0 %v546_v34  ;;  %v710_v31 = vld [vmem:[#allocation5 + $0x12f0] sm:$0xff]  ;;  %v709_v33 = vld [vmem:[#allocation5 + $0x12e8] sm:$0xff] }
 0x110   :  { %1704 = vmatpush2.msra.mxu1 %v610_v35  ;;  %1628 = vmatprep.subr.mxu0 %v545_v36  ;;  %v85_v34 = vld [vmem:[#allocation2 + $0x168] sm:$0xff]  ;;  %v644_v35 = vld [vmem:[#allocation5 + $0x10e0] sm:$0xff] }
 0x111   :  { %1705 = vmatprep.subr.mxu1 %v609_v37  ;;  %1629 = vmatpush2.msra.mxu0 %v544_v38  ;;  %v708_v36 = vld [vmem:[#allocation5 + $0x12e0] sm:$0xff]  ;;  %v643_v38 = vld [vmem:[#allocation5 + $0x10d8] sm:$0xff] }
 0x112   :  { %1706 = vmatpush2.msra.mxu1 %v608_v39  ;;  %1630 = vmatprep.subr.mxu0 %v543_v40  ;;  %v84_v37 = vld [vmem:[#allocation2 + $0x160] sm:$0xff]  ;;  %v707_v39 = vld [vmem:[#allocation5 + $0x12d8] sm:$0xff] }
 0x113   :  { %1707 = vmatprep.subr.mxu1 %v607_v41  ;;  %1631 = vmatpush2.msra.mxu0 %v542_v42  ;;  %v87_v40 = vld [vmem:[#allocation2 + $0x178] sm:$0xff]  ;;  %v642_v41 = vld [vmem:[#allocation5 + $0x10d0] sm:$0xff] }
 0x114   :  { %1708 = vmatpush2.msra.mxu1 %v606_v43  ;;  %1632 = vmatprep.subr.mxu0 %v541_v44  ;;  %v706_v42 = vld [vmem:[#allocation5 + $0x12d0] sm:$0xff]  ;;  %v641_v43 = vld [vmem:[#allocation5 + $0x10c8] sm:$0xff] }
 0x115   :  { %1709 = vmatprep.subr.mxu1 %v605_v45  ;;  %1633 = vmatpush2.msra.mxu0 %v540_v46  ;;  %v86_v44 = vld [vmem:[#allocation2 + $0x170] sm:$0xff]  ;;  %v705_v45 = vld [vmem:[#allocation5 + $0x12c8] sm:$0xff]  ;;  %v640_v46 = vld [vmem:[#allocation5 + $0x10c0] sm:$0xff] }
 0x116   :  { %1710 = vmatpush2.msra.mxu1 %v604_v47  ;;  %1634 = vmatprep.subr.mxu0 %v539_v48  ;;  %v704_v47 = vld [vmem:[#allocation5 + $0x12c0] sm:$0xff]  ;;  %v639_v48 = vld [vmem:[#allocation5 + $0x10b8] sm:$0xff] }
 0x117   :  { %1711 = vmatprep.subr.mxu1 %v603_v49  ;;  %1635 = vmatpush2.msra.mxu0 %v538_v50  ;;  %v703_v49 = vld [vmem:[#allocation5 + $0x12b8] sm:$0xff]  ;;  %v638_v50 = vld [vmem:[#allocation5 + $0x10b0] sm:$0xff] }
 0x118   :  { %1712 = vmatpush2.msra.mxu1 %v602_v51  ;;  %1636 = vmatprep.subr.mxu0 %v537_v52  ;;  %v702_v51 = vld [vmem:[#allocation5 + $0x12b0] sm:$0xff]  ;;  %v637_v52 = vld [vmem:[#allocation5 + $0x10a8] sm:$0xff] }
 0x119   :  { %1713 = vmatprep.subr.mxu1 %v601_v53  ;;  %1637 = vmatpush2.msra.mxu0 %v536_v54  ;;  %v701_v53 = vld [vmem:[#allocation5 + $0x12a8] sm:$0xff]  ;;  %v636_v54 = vld [vmem:[#allocation5 + $0x10a0] sm:$0xff] }
 0x11a   :  { %1714 = vmatpush2.msra.mxu1 %v600_v55  ;;  %1638 = vmatprep.subr.mxu0 %v535_v56  ;;  %v700_v55 = vld [vmem:[#allocation5 + $0x12a0] sm:$0xff]  ;;  %v635_v56 = vld [vmem:[#allocation5 + $0x1098] sm:$0xff] }
 0x11b   :  { %1715 = vmatprep.subr.mxu1 %v599_v57  ;;  %1639 = vmatpush2.msra.mxu0 %v534_v58  ;;  %v699_v57 = vld [vmem:[#allocation5 + $0x1298] sm:$0xff]  ;;  %v634_v58 = vld [vmem:[#allocation5 + $0x1090] sm:$0xff] }
 0x11c   :  { %1716 = vmatpush2.msra.mxu1 %v598_v59  ;;  %1640 = vmatprep.subr.mxu0 %v533_v60  ;;  %v698_v59 = vld [vmem:[#allocation5 + $0x1290] sm:$0xff]  ;;  %v633_v60 = vld [vmem:[#allocation5 + $0x1088] sm:$0xff] }
 0x11d   :  { %1717 = vmatprep.subr.mxu1 %v597_v61  ;;  %1641 = vmatpush2.msra.mxu0 %v532_v62  ;;  %v697_v61 = vld [vmem:[#allocation5 + $0x1288] sm:$0xff]  ;;  %v632_v62 = vld [vmem:[#allocation5 + $0x1080] sm:$0xff] }
 0x11e   :  { %1718 = vmatpush2.msra.mxu1 %v596_v63  ;;  %1642 = vmatprep.subr.mxu0 %v531_v0  ;;  %v696_v63 = vld [vmem:[#allocation5 + $0x1280] sm:$0xff]  ;;  %v631_v0 = vld [vmem:[#allocation5 + $0x1078] sm:$0xff] }
 0x11f   :  { %1719 = vmatprep.subr.mxu1 %v595_v1  ;;  %1643 = vmatpush2.msra.mxu0 %v530_v2  ;;  %v695_v1 = vld [vmem:[#allocation5 + $0x1278] sm:$0xff]  ;;  %v630_v2 = vld [vmem:[#allocation5 + $0x1070] sm:$0xff] }
 0x120   :  { %1720 = vmatpush2.msra.mxu1 %v594_v3  ;;  %1644 = vmatprep.subr.mxu0 %v529_v4  ;;  %v694_v3 = vld [vmem:[#allocation5 + $0x1270] sm:$0xff]  ;;  %v629_v4 = vld [vmem:[#allocation5 + $0x1068] sm:$0xff] }
 0x121   :  { %1721 = vmatprep.subr.mxu1 %v593_v5  ;;  %1645 = vmatpush2.msra.mxu0 %v528_v6  ;;  %v693_v5 = vld [vmem:[#allocation5 + $0x1268] sm:$0xff]  ;;  %v628_v6 = vld [vmem:[#allocation5 + $0x1060] sm:$0xff] }
 0x122   :  { %1722 = vmatpush2.msra.mxu1 %v592_v7  ;;  %1646 = vmatprep.subr.mxu0 %v527_v8  ;;  %v692_v7 = vld [vmem:[#allocation5 + $0x1260] sm:$0xff]  ;;  %v627_v8 = vld [vmem:[#allocation5 + $0x1058] sm:$0xff] }
 0x123   :  { %1723 = vmatprep.subr.mxu1 %v591_v9  ;;  %1647 = vmatpush2.msra.mxu0 %v526_v10  ;;  %v691_v9 = vld [vmem:[#allocation5 + $0x1258] sm:$0xff]  ;;  %v626_v10 = vld [vmem:[#allocation5 + $0x1050] sm:$0xff] }
 0x124   :  { %1724 = vmatpush2.msra.mxu1 %v590_v11  ;;  %1648 = vmatprep.subr.mxu0 %v525_v12  ;;  %v690_v11 = vld [vmem:[#allocation5 + $0x1250] sm:$0xff]  ;;  %v625_v12 = vld [vmem:[#allocation5 + $0x1048] sm:$0xff] }
 0x125   :  { %1725 = vmatprep.subr.mxu1 %v589_v13  ;;  %1649 = vmatpush2.msra.mxu0 %v524_v14  ;;  %v689_v13 = vld [vmem:[#allocation5 + $0x1248] sm:$0xff]  ;;  %v624_v14 = vld [vmem:[#allocation5 + $0x1040] sm:$0xff] }
 0x126   :  { %1726 = vmatpush2.msra.mxu1 %v588_v15  ;;  %1650 = vmatprep.subr.mxu0 %v523_v16  ;;  %v688_v15 = vld [vmem:[#allocation5 + $0x1240] sm:$0xff]  ;;  %v623_v16 = vld [vmem:[#allocation5 + $0x1038] sm:$0xff] }
 0x127   :  { %1727 = vmatprep.subr.mxu1 %v587_v17  ;;  %1651 = vmatpush2.msra.mxu0 %v522_v18  ;;  %v687_v17 = vld [vmem:[#allocation5 + $0x1238] sm:$0xff]  ;;  %v622_v18 = vld [vmem:[#allocation5 + $0x1030] sm:$0xff] }
 0x128   :  { %1728 = vmatpush2.msra.mxu1 %v586_v19  ;;  %1652 = vmatprep.subr.mxu0 %v521_v20  ;;  %v686_v19 = vld [vmem:[#allocation5 + $0x1230] sm:$0xff]  ;;  %v621_v20 = vld [vmem:[#allocation5 + $0x1028] sm:$0xff] }
 0x129   :  { %1729 = vmatprep.subr.mxu1 %v585_v21  ;;  %1653 = vmatpush2.msra.mxu0 %v520_v22  ;;  %v685_v21 = vld [vmem:[#allocation5 + $0x1228] sm:$0xff]  ;;  %v620_v22 = vld [vmem:[#allocation5 + $0x1020] sm:$0xff] }
 0x12a   :  { %1654 = vmatprep.mubr.f32.mxu0 %v53_v23  ;;  %1730 = vmatpush2.msra.mxu1 %v584_v24  ;;  %v684_v23 = vld [vmem:[#allocation5 + $0x1220] sm:$0xff]  ;;  %v619_v24 = vld [vmem:[#allocation5 + $0x1018] sm:$0xff] }
 0x12b   :  { %1655 = vmatmul.mubr.f32.vlgmr.msra.gmra.mxu0 %v52_v25  ;;  %1731 = vmatprep.mubr.f32.mxu1 %v55_v26  ;;  %v683_v25 = vld [vmem:[#allocation5 + $0x1218] sm:$0xff]  ;;  %v618_v26 = vld [vmem:[#allocation5 + $0x1010] sm:$0xff] }
 0x12c   :  { %1744 = vmatprep.subr.mxu0 %v647_v27  ;;  %1821 = vmatprep.subr.mxu1 %v711_v28  ;;  %v682_v27 = vld [vmem:[#allocation5 + $0x1210] sm:$0xff]  ;;  %v617_v28 = vld [vmem:[#allocation5 + $0x1008] sm:$0xff] }
 0x12d   :  { %1732 = vmatmul.mubr.f32.vlgmr.msra.gmra.mxu1 %v54_v29  ;;  %1745 = vmatpush1.msra.mxu0 %v646_v30  ;;  %v681_v29 = vld [vmem:[#allocation5 + $0x1208] sm:$0xff]  ;;  %v616_v30 = vld [vmem:[#allocation5 + $0x1000] sm:$0xff] }
 0x12e   :  { %1822 = vmatpush1.msra.mxu1 %v710_v31  ;;  %1746 = vmatprep.subr.mxu0 %v645_v32  ;;  %v680_v31 = vld [vmem:[#allocation5 + $0x1200] sm:$0xff]  ;;  %v679_v32 = vld [vmem:[#allocation5 + $0x11f8] sm:$0xff] }
 0x12f   :  { %1823 = vmatprep.subr.mxu1 %v709_v33  ;;  %1660 = vmatprep.mubr.f32.mxu0 %v85_v34  ;;  %v743_v33 = vld [vmem:[#allocation5 + $0x13f8] sm:$0xff]  ;;  %v678_v34 = vld [vmem:[#allocation5 + $0x11f0] sm:$0xff] }
 0x130   :  { %1747 = vmatpush1.msra.mxu0 %v644_v35  ;;  %1824 = vmatpush1.msra.mxu1 %v708_v36  ;;  %v742_v35 = vld [vmem:[#allocation5 + $0x13f0] sm:$0xff]  ;;  %v677_v36 = vld [vmem:[#allocation5 + $0x11e8] sm:$0xff] }
 0x131   :  { %1661 = vmatmul.mubr.f32.gmra.mxu0 %v84_v37  ;;  %1748 = vmatprep.subr.mxu0 %v643_v38  ;;  %v741_v37 = vld [vmem:[#allocation5 + $0x13e8] sm:$0xff]  ;;  %v676_v38 = vld [vmem:[#allocation5 + $0x11e0] sm:$0xff] }
 0x132   :  { %1825 = vmatprep.subr.mxu1 %v707_v39  ;;  %1737 = vmatprep.mubr.f32.mxu1 %v87_v40  ;;  %v740_v39 = vld [vmem:[#allocation5 + $0x13e0] sm:$0xff]  ;;  %v675_v40 = vld [vmem:[#allocation5 + $0x11d8] sm:$0xff] }
 0x133   :  { %1749 = vmatpush1.msra.mxu0 %v642_v41  ;;  %1826 = vmatpush1.msra.mxu1 %v706_v42  ;;  %v739_v41 = vld [vmem:[#allocation5 + $0x13d8] sm:$0xff]  ;;  %v674_v42 = vld [vmem:[#allocation5 + $0x11d0] sm:$0xff] }
 0x134   :  { %1750 = vmatprep.subr.mxu0 %v641_v43  ;;  %1738 = vmatmul.mubr.f32.gmra.mxu1 %v86_v44  ;;  %v738_v43 = vld [vmem:[#allocation5 + $0x13d0] sm:$0xff]  ;;  %v673_v44 = vld [vmem:[#allocation5 + $0x11c8] sm:$0xff] }
 0x135   :  { %1827 = vmatprep.subr.mxu1 %v705_v45  ;;  %1751 = vmatpush1.msra.mxu0 %v640_v46  ;;  %v737_v45 = vld [vmem:[#allocation5 + $0x13c8] sm:$0xff]  ;;  %v672_v46 = vld [vmem:[#allocation5 + $0x11c0] sm:$0xff] }
 0x136   :  { %1828 = vmatpush1.msra.mxu1 %v704_v47  ;;  %1752 = vmatprep.subr.mxu0 %v639_v48  ;;  %v736_v47 = vld [vmem:[#allocation5 + $0x13c0] sm:$0xff]  ;;  %v671_v48 = vld [vmem:[#allocation5 + $0x11b8] sm:$0xff] }
 0x137   :  { %1829 = vmatprep.subr.mxu1 %v703_v49  ;;  %1753 = vmatpush1.msra.mxu0 %v638_v50  ;;  %v735_v49 = vld [vmem:[#allocation5 + $0x13b8] sm:$0xff]  ;;  %v670_v50 = vld [vmem:[#allocation5 + $0x11b0] sm:$0xff] }
 0x138   :  { %1830 = vmatpush1.msra.mxu1 %v702_v51  ;;  %1754 = vmatprep.subr.mxu0 %v637_v52  ;;  %v734_v51 = vld [vmem:[#allocation5 + $0x13b0] sm:$0xff]  ;;  %v669_v52 = vld [vmem:[#allocation5 + $0x11a8] sm:$0xff] }
 0x139   :  { %1831 = vmatprep.subr.mxu1 %v701_v53  ;;  %1755 = vmatpush1.msra.mxu0 %v636_v54  ;;  %v733_v53 = vld [vmem:[#allocation5 + $0x13a8] sm:$0xff]  ;;  %v668_v54 = vld [vmem:[#allocation5 + $0x11a0] sm:$0xff] }
 0x13a   :  { %1832 = vmatpush1.msra.mxu1 %v700_v55  ;;  %1756 = vmatprep.subr.mxu0 %v635_v56  ;;  %v732_v55 = vld [vmem:[#allocation5 + $0x13a0] sm:$0xff]  ;;  %v667_v56 = vld [vmem:[#allocation5 + $0x1198] sm:$0xff] }
 0x13b   :  { %1833 = vmatprep.subr.mxu1 %v699_v57  ;;  %1757 = vmatpush1.msra.mxu0 %v634_v58  ;;  %v731_v57 = vld [vmem:[#allocation5 + $0x1398] sm:$0xff]  ;;  %v666_v58 = vld [vmem:[#allocation5 + $0x1190] sm:$0xff] }
 0x13c   :  { %1834 = vmatpush1.msra.mxu1 %v698_v59  ;;  %1758 = vmatprep.subr.mxu0 %v633_v60  ;;  %v730_v59 = vld [vmem:[#allocation5 + $0x1390] sm:$0xff]  ;;  %v665_v60 = vld [vmem:[#allocation5 + $0x1188] sm:$0xff] }
 0x13d   :  { %1835 = vmatprep.subr.mxu1 %v697_v61  ;;  %1759 = vmatpush1.msra.mxu0 %v632_v62  ;;  %v729_v61 = vld [vmem:[#allocation5 + $0x1388] sm:$0xff]  ;;  %v664_v62 = vld [vmem:[#allocation5 + $0x1180] sm:$0xff] }
 0x13e   :  { %1836 = vmatpush1.msra.mxu1 %v696_v63  ;;  %1760 = vmatprep.subr.mxu0 %v631_v0  ;;  %v728_v63 = vld [vmem:[#allocation5 + $0x1380] sm:$0xff]  ;;  %v663_v0 = vld [vmem:[#allocation5 + $0x1178] sm:$0xff] }
 0x13f   :  { %1837 = vmatprep.subr.mxu1 %v695_v1  ;;  %1761 = vmatpush1.msra.mxu0 %v630_v2  ;;  %v727_v1 = vld [vmem:[#allocation5 + $0x1378] sm:$0xff]  ;;  %v662_v2 = vld [vmem:[#allocation5 + $0x1170] sm:$0xff] }
 0x140   :  { %1838 = vmatpush1.msra.mxu1 %v694_v3  ;;  %1762 = vmatprep.subr.mxu0 %v629_v4  ;;  %v726_v3 = vld [vmem:[#allocation5 + $0x1370] sm:$0xff]  ;;  %v661_v4 = vld [vmem:[#allocation5 + $0x1168] sm:$0xff] }
 0x141   :  { %1839 = vmatprep.subr.mxu1 %v693_v5  ;;  %1763 = vmatpush1.msra.mxu0 %v628_v6  ;;  %v725_v5 = vld [vmem:[#allocation5 + $0x1368] sm:$0xff]  ;;  %v660_v6 = vld [vmem:[#allocation5 + $0x1160] sm:$0xff] }
 0x142   :  { %1840 = vmatpush1.msra.mxu1 %v692_v7  ;;  %1764 = vmatprep.subr.mxu0 %v627_v8  ;;  %v724_v7 = vld [vmem:[#allocation5 + $0x1360] sm:$0xff]  ;;  %v659_v8 = vld [vmem:[#allocation5 + $0x1158] sm:$0xff] }
 0x143   :  { %1841 = vmatprep.subr.mxu1 %v691_v9  ;;  %1765 = vmatpush1.msra.mxu0 %v626_v10  ;;  %v723_v9 = vld [vmem:[#allocation5 + $0x1358] sm:$0xff]  ;;  %v658_v10 = vld [vmem:[#allocation5 + $0x1150] sm:$0xff] }
 0x144   :  { %1842 = vmatpush1.msra.mxu1 %v690_v11  ;;  %1766 = vmatprep.subr.mxu0 %v625_v12  ;;  %v722_v11 = vld [vmem:[#allocation5 + $0x1350] sm:$0xff]  ;;  %v657_v12 = vld [vmem:[#allocation5 + $0x1148] sm:$0xff] }
 0x145   :  { %1843 = vmatprep.subr.mxu1 %v689_v13  ;;  %1767 = vmatpush1.msra.mxu0 %v624_v14  ;;  %v721_v13 = vld [vmem:[#allocation5 + $0x1348] sm:$0xff]  ;;  %v656_v14 = vld [vmem:[#allocation5 + $0x1140] sm:$0xff] }
 0x146   :  { %1844 = vmatpush1.msra.mxu1 %v688_v15  ;;  %1768 = vmatprep.subr.mxu0 %v623_v16  ;;  %v720_v15 = vld [vmem:[#allocation5 + $0x1340] sm:$0xff]  ;;  %v655_v16 = vld [vmem:[#allocation5 + $0x1138] sm:$0xff] }
 0x147   :  { %1845 = vmatprep.subr.mxu1 %v687_v17  ;;  %1769 = vmatpush1.msra.mxu0 %v622_v18  ;;  %v719_v17 = vld [vmem:[#allocation5 + $0x1338] sm:$0xff]  ;;  %v654_v18 = vld [vmem:[#allocation5 + $0x1130] sm:$0xff] }
 0x148   :  { %1846 = vmatpush1.msra.mxu1 %v686_v19  ;;  %1770 = vmatprep.subr.mxu0 %v621_v20  ;;  %v718_v19 = vld [vmem:[#allocation5 + $0x1330] sm:$0xff]  ;;  %v653_v20 = vld [vmem:[#allocation5 + $0x1128] sm:$0xff] }
 0x149   :  { %1847 = vmatprep.subr.mxu1 %v685_v21  ;;  %1771 = vmatpush1.msra.mxu0 %v620_v22  ;;  %v717_v21 = vld [vmem:[#allocation5 + $0x1328] sm:$0xff]  ;;  %v652_v22 = vld [vmem:[#allocation5 + $0x1120] sm:$0xff] }
 0x14a   :  { %1848 = vmatpush1.msra.mxu1 %v684_v23  ;;  %1772 = vmatprep.subr.mxu0 %v619_v24  ;;  %v716_v23 = vld [vmem:[#allocation5 + $0x1320] sm:$0xff]  ;;  %v651_v24 = vld [vmem:[#allocation5 + $0x1118] sm:$0xff] }
 0x14b   :  { %1849 = vmatprep.subr.mxu1 %v683_v25  ;;  %1773 = vmatpush1.msra.mxu0 %v618_v26  ;;  %v715_v25 = vld [vmem:[#allocation5 + $0x1318] sm:$0xff]  ;;  %v650_v26 = vld [vmem:[#allocation5 + $0x1110] sm:$0xff] }
 0x14c   :  { %1850 = vmatpush1.msra.mxu1 %v682_v27  ;;  %1774 = vmatprep.subr.mxu0 %v617_v28  ;;  %v714_v27 = vld [vmem:[#allocation5 + $0x1310] sm:$0xff]  ;;  %v649_v28 = vld [vmem:[#allocation5 + $0x1108] sm:$0xff] }
 0x14d   :  { %1851 = vmatprep.subr.mxu1 %v681_v29  ;;  %1775 = vmatpush1.msra.mxu0 %v616_v30  ;;  %v713_v29 = vld [vmem:[#allocation5 + $0x1308] sm:$0xff]  ;;  %v648_v30 = vld [vmem:[#allocation5 + $0x1100] sm:$0xff] }
 0x14e   :  { %1852 = vmatpush1.msra.mxu1 %v680_v31  ;;  %1776 = vmatprep.subr.mxu0 %v679_v32  ;;  %v57_v31 = vld [vmem:[#allocation2 + $0x88] sm:$0xff]  ;;  %v712_v32 = vld [vmem:[#allocation5 + $0x1300] sm:$0xff] }
 0x14f   :  { %1853 = vmatprep.subr.mxu1 %v743_v33  ;;  %1777 = vmatpush2.msra.mxu0 %v678_v34  ;;  %v56_v33 = vld [vmem:[#allocation2 + $0x80] sm:$0xff]  ;;  %v59_v34 = vld [vmem:[#allocation2 + $0x98] sm:$0xff] }
 0x150   :  { %1854 = vmatpush2.msra.mxu1 %v742_v35  ;;  %1778 = vmatprep.subr.mxu0 %v677_v36  ;;  %v775_v35 = vld [vmem:[#allocation5 + $0x14f8] sm:$0xff] }
 0x151   :  { %1855 = vmatprep.subr.mxu1 %v741_v37  ;;  %1779 = vmatpush2.msra.mxu0 %v676_v38  ;;  %v839_v36 = vld [vmem:[#allocation5 + $0x16f8] sm:$0xff]  ;;  %v58_v37 = vld [vmem:[#allocation2 + $0x90] sm:$0xff] }
 0x152   :  { %1856 = vmatpush2.msra.mxu1 %v740_v39  ;;  %1780 = vmatprep.subr.mxu0 %v675_v40  ;;  %v774_v38 = vld [vmem:[#allocation5 + $0x14f0] sm:$0xff]  ;;  %v773_v40 = vld [vmem:[#allocation5 + $0x14e8] sm:$0xff] }
 0x153   :  { %1857 = vmatprep.subr.mxu1 %v739_v41  ;;  %1781 = vmatpush2.msra.mxu0 %v674_v42  ;;  %v838_v39 = vld [vmem:[#allocation5 + $0x16f0] sm:$0xff]  ;;  %v837_v41 = vld [vmem:[#allocation5 + $0x16e8] sm:$0xff] }
 0x154   :  { %1858 = vmatpush2.msra.mxu1 %v738_v43  ;;  %1782 = vmatprep.subr.mxu0 %v673_v44  ;;  %v89_v42 = vld [vmem:[#allocation2 + $0x188] sm:$0xff]  ;;  %v772_v43 = vld [vmem:[#allocation5 + $0x14e0] sm:$0xff] }
 0x155   :  { %1859 = vmatprep.subr.mxu1 %v737_v45  ;;  %1783 = vmatpush2.msra.mxu0 %v672_v46  ;;  %v836_v44 = vld [vmem:[#allocation5 + $0x16e0] sm:$0xff]  ;;  %v771_v46 = vld [vmem:[#allocation5 + $0x14d8] sm:$0xff] }
 0x156   :  { %1860 = vmatpush2.msra.mxu1 %v736_v47  ;;  %1784 = vmatprep.subr.mxu0 %v671_v48  ;;  %v88_v45 = vld [vmem:[#allocation2 + $0x180] sm:$0xff]  ;;  %v835_v47 = vld [vmem:[#allocation5 + $0x16d8] sm:$0xff] }
 0x157   :  { %1861 = vmatprep.subr.mxu1 %v735_v49  ;;  %1785 = vmatpush2.msra.mxu0 %v670_v50  ;;  %v91_v48 = vld [vmem:[#allocation2 + $0x198] sm:$0xff]  ;;  %v770_v49 = vld [vmem:[#allocation5 + $0x14d0] sm:$0xff] }
 0x158   :  { %1862 = vmatpush2.msra.mxu1 %v734_v51  ;;  %1786 = vmatprep.subr.mxu0 %v669_v52  ;;  %v834_v50 = vld [vmem:[#allocation5 + $0x16d0] sm:$0xff]  ;;  %v769_v51 = vld [vmem:[#allocation5 + $0x14c8] sm:$0xff] }
 0x159   :  { %1863 = vmatprep.subr.mxu1 %v733_v53  ;;  %1787 = vmatpush2.msra.mxu0 %v668_v54  ;;  %v90_v52 = vld [vmem:[#allocation2 + $0x190] sm:$0xff]  ;;  %v833_v53 = vld [vmem:[#allocation5 + $0x16c8] sm:$0xff]  ;;  %v768_v54 = vld [vmem:[#allocation5 + $0x14c0] sm:$0xff] }
 0x15a   :  { %1864 = vmatpush2.msra.mxu1 %v732_v55  ;;  %1788 = vmatprep.subr.mxu0 %v667_v56  ;;  %v832_v55 = vld [vmem:[#allocation5 + $0x16c0] sm:$0xff]  ;;  %v767_v56 = vld [vmem:[#allocation5 + $0x14b8] sm:$0xff] }
 0x15b   :  { %1865 = vmatprep.subr.mxu1 %v731_v57  ;;  %1789 = vmatpush2.msra.mxu0 %v666_v58  ;;  %v831_v57 = vld [vmem:[#allocation5 + $0x16b8] sm:$0xff]  ;;  %v766_v58 = vld [vmem:[#allocation5 + $0x14b0] sm:$0xff] }
 0x15c   :  { %1866 = vmatpush2.msra.mxu1 %v730_v59  ;;  %1790 = vmatprep.subr.mxu0 %v665_v60  ;;  %v830_v59 = vld [vmem:[#allocation5 + $0x16b0] sm:$0xff]  ;;  %v765_v60 = vld [vmem:[#allocation5 + $0x14a8] sm:$0xff] }
 0x15d   :  { %1867 = vmatprep.subr.mxu1 %v729_v61  ;;  %1791 = vmatpush2.msra.mxu0 %v664_v62  ;;  %v829_v61 = vld [vmem:[#allocation5 + $0x16a8] sm:$0xff]  ;;  %v764_v62 = vld [vmem:[#allocation5 + $0x14a0] sm:$0xff] }
 0x15e   :  { %1868 = vmatpush2.msra.mxu1 %v728_v63  ;;  %1792 = vmatprep.subr.mxu0 %v663_v0  ;;  %v828_v63 = vld [vmem:[#allocation5 + $0x16a0] sm:$0xff]  ;;  %v763_v0 = vld [vmem:[#allocation5 + $0x1498] sm:$0xff] }
 0x15f   :  { %1869 = vmatprep.subr.mxu1 %v727_v1  ;;  %1793 = vmatpush2.msra.mxu0 %v662_v2  ;;  %v827_v1 = vld [vmem:[#allocation5 + $0x1698] sm:$0xff]  ;;  %v762_v2 = vld [vmem:[#allocation5 + $0x1490] sm:$0xff] }
 0x160   :  { %1870 = vmatpush2.msra.mxu1 %v726_v3  ;;  %1794 = vmatprep.subr.mxu0 %v661_v4  ;;  %v826_v3 = vld [vmem:[#allocation5 + $0x1690] sm:$0xff]  ;;  %v761_v4 = vld [vmem:[#allocation5 + $0x1488] sm:$0xff] }
 0x161   :  { %1871 = vmatprep.subr.mxu1 %v725_v5  ;;  %1795 = vmatpush2.msra.mxu0 %v660_v6  ;;  %v825_v5 = vld [vmem:[#allocation5 + $0x1688] sm:$0xff]  ;;  %v760_v6 = vld [vmem:[#allocation5 + $0x1480] sm:$0xff] }
 0x162   :  { %1872 = vmatpush2.msra.mxu1 %v724_v7  ;;  %1796 = vmatprep.subr.mxu0 %v659_v8  ;;  %v824_v7 = vld [vmem:[#allocation5 + $0x1680] sm:$0xff]  ;;  %v759_v8 = vld [vmem:[#allocation5 + $0x1478] sm:$0xff] }
 0x163   :  { %1873 = vmatprep.subr.mxu1 %v723_v9  ;;  %1797 = vmatpush2.msra.mxu0 %v658_v10  ;;  %v823_v9 = vld [vmem:[#allocation5 + $0x1678] sm:$0xff]  ;;  %v758_v10 = vld [vmem:[#allocation5 + $0x1470] sm:$0xff] }
 0x164   :  { %1874 = vmatpush2.msra.mxu1 %v722_v11  ;;  %1798 = vmatprep.subr.mxu0 %v657_v12  ;;  %v822_v11 = vld [vmem:[#allocation5 + $0x1670] sm:$0xff]  ;;  %v757_v12 = vld [vmem:[#allocation5 + $0x1468] sm:$0xff] }
 0x165   :  { %1875 = vmatprep.subr.mxu1 %v721_v13  ;;  %1799 = vmatpush2.msra.mxu0 %v656_v14  ;;  %v821_v13 = vld [vmem:[#allocation5 + $0x1668] sm:$0xff]  ;;  %v756_v14 = vld [vmem:[#allocation5 + $0x1460] sm:$0xff] }
 0x166   :  { %1876 = vmatpush2.msra.mxu1 %v720_v15  ;;  %1800 = vmatprep.subr.mxu0 %v655_v16  ;;  %v820_v15 = vld [vmem:[#allocation5 + $0x1660] sm:$0xff]  ;;  %v755_v16 = vld [vmem:[#allocation5 + $0x1458] sm:$0xff] }
 0x167   :  { %1877 = vmatprep.subr.mxu1 %v719_v17  ;;  %1801 = vmatpush2.msra.mxu0 %v654_v18  ;;  %v819_v17 = vld [vmem:[#allocation5 + $0x1658] sm:$0xff]  ;;  %v754_v18 = vld [vmem:[#allocation5 + $0x1450] sm:$0xff] }
 0x168   :  { %1878 = vmatpush2.msra.mxu1 %v718_v19  ;;  %1802 = vmatprep.subr.mxu0 %v653_v20  ;;  %v818_v19 = vld [vmem:[#allocation5 + $0x1650] sm:$0xff]  ;;  %v753_v20 = vld [vmem:[#allocation5 + $0x1448] sm:$0xff] }
 0x169   :  { %1879 = vmatprep.subr.mxu1 %v717_v21  ;;  %1803 = vmatpush2.msra.mxu0 %v652_v22  ;;  %v817_v21 = vld [vmem:[#allocation5 + $0x1648] sm:$0xff]  ;;  %v752_v22 = vld [vmem:[#allocation5 + $0x1440] sm:$0xff] }
 0x16a   :  { %1880 = vmatpush2.msra.mxu1 %v716_v23  ;;  %1804 = vmatprep.subr.mxu0 %v651_v24  ;;  %v816_v23 = vld [vmem:[#allocation5 + $0x1640] sm:$0xff]  ;;  %v751_v24 = vld [vmem:[#allocation5 + $0x1438] sm:$0xff] }
 0x16b   :  { %1881 = vmatprep.subr.mxu1 %v715_v25  ;;  %1805 = vmatpush2.msra.mxu0 %v650_v26  ;;  %v815_v25 = vld [vmem:[#allocation5 + $0x1638] sm:$0xff]  ;;  %v750_v26 = vld [vmem:[#allocation5 + $0x1430] sm:$0xff] }
 0x16c   :  { %1882 = vmatpush2.msra.mxu1 %v714_v27  ;;  %1806 = vmatprep.subr.mxu0 %v649_v28  ;;  %v814_v27 = vld [vmem:[#allocation5 + $0x1630] sm:$0xff]  ;;  %v749_v28 = vld [vmem:[#allocation5 + $0x1428] sm:$0xff] }
 0x16d   :  { %1883 = vmatprep.subr.mxu1 %v713_v29  ;;  %1807 = vmatpush2.msra.mxu0 %v648_v30  ;;  %v813_v29 = vld [vmem:[#allocation5 + $0x1628] sm:$0xff]  ;;  %v748_v30 = vld [vmem:[#allocation5 + $0x1420] sm:$0xff] }
 0x16e   :  { %1808 = vmatprep.mubr.f32.mxu0 %v57_v31  ;;  %1884 = vmatpush2.msra.mxu1 %v712_v32  ;;  %v812_v31 = vld [vmem:[#allocation5 + $0x1620] sm:$0xff]  ;;  %v747_v32 = vld [vmem:[#allocation5 + $0x1418] sm:$0xff] }
 0x16f   :  { %1809 = vmatmul.mubr.f32.vlgmr.msra.gmra.mxu0 %v56_v33  ;;  %1885 = vmatprep.mubr.f32.mxu1 %v59_v34  ;;  %v811_v33 = vld [vmem:[#allocation5 + $0x1618] sm:$0xff]  ;;  %v746_v34 = vld [vmem:[#allocation5 + $0x1410] sm:$0xff] }
 0x170   :  { %1898 = vmatprep.subr.mxu0 %v775_v35  ;;  %1975 = vmatprep.subr.mxu1 %v839_v36  ;;  %v810_v35 = vld [vmem:[#allocation5 + $0x1610] sm:$0xff]  ;;  %v745_v36 = vld [vmem:[#allocation5 + $0x1408] sm:$0xff] }
 0x171   :  { %1886 = vmatmul.mubr.f32.vlgmr.msra.gmra.mxu1 %v58_v37  ;;  %1899 = vmatpush1.msra.mxu0 %v774_v38  ;;  %v809_v37 = vld [vmem:[#allocation5 + $0x1608] sm:$0xff]  ;;  %v744_v38 = vld [vmem:[#allocation5 + $0x1400] sm:$0xff] }
 0x172   :  { %1976 = vmatpush1.msra.mxu1 %v838_v39  ;;  %1900 = vmatprep.subr.mxu0 %v773_v40  ;;  %v808_v39 = vld [vmem:[#allocation5 + $0x1600] sm:$0xff]  ;;  %v807_v40 = vld [vmem:[#allocation5 + $0x15f8] sm:$0xff] }
 0x173   :  { %1977 = vmatprep.subr.mxu1 %v837_v41  ;;  %1814 = vmatprep.mubr.f32.mxu0 %v89_v42  ;;  %v871_v41 = vld [vmem:[#allocation5 + $0x17f8] sm:$0xff]  ;;  %v806_v42 = vld [vmem:[#allocation5 + $0x15f0] sm:$0xff] }
 0x174   :  { %1901 = vmatpush1.msra.mxu0 %v772_v43  ;;  %1978 = vmatpush1.msra.mxu1 %v836_v44  ;;  %v870_v43 = vld [vmem:[#allocation5 + $0x17f0] sm:$0xff]  ;;  %v805_v44 = vld [vmem:[#allocation5 + $0x15e8] sm:$0xff] }
 0x175   :  { %1815 = vmatmul.mubr.f32.gmra.mxu0 %v88_v45  ;;  %1902 = vmatprep.subr.mxu0 %v771_v46  ;;  %v869_v45 = vld [vmem:[#allocation5 + $0x17e8] sm:$0xff]  ;;  %v804_v46 = vld [vmem:[#allocation5 + $0x15e0] sm:$0xff] }
 0x176   :  { %1979 = vmatprep.subr.mxu1 %v835_v47  ;;  %1891 = vmatprep.mubr.f32.mxu1 %v91_v48  ;;  %v868_v47 = vld [vmem:[#allocation5 + $0x17e0] sm:$0xff]  ;;  %v803_v48 = vld [vmem:[#allocation5 + $0x15d8] sm:$0xff] }
 0x177   :  { %1903 = vmatpush1.msra.mxu0 %v770_v49  ;;  %1980 = vmatpush1.msra.mxu1 %v834_v50  ;;  %v867_v49 = vld [vmem:[#allocation5 + $0x17d8] sm:$0xff]  ;;  %v802_v50 = vld [vmem:[#allocation5 + $0x15d0] sm:$0xff] }
 0x178   :  { %1904 = vmatprep.subr.mxu0 %v769_v51  ;;  %1892 = vmatmul.mubr.f32.gmra.mxu1 %v90_v52  ;;  %v866_v51 = vld [vmem:[#allocation5 + $0x17d0] sm:$0xff]  ;;  %v801_v52 = vld [vmem:[#allocation5 + $0x15c8] sm:$0xff] }
 0x179   :  { %1981 = vmatprep.subr.mxu1 %v833_v53  ;;  %1905 = vmatpush1.msra.mxu0 %v768_v54  ;;  %v865_v53 = vld [vmem:[#allocation5 + $0x17c8] sm:$0xff]  ;;  %v800_v54 = vld [vmem:[#allocation5 + $0x15c0] sm:$0xff] }
 0x17a   :  { %1982 = vmatpush1.msra.mxu1 %v832_v55  ;;  %1906 = vmatprep.subr.mxu0 %v767_v56  ;;  %v864_v55 = vld [vmem:[#allocation5 + $0x17c0] sm:$0xff]  ;;  %v799_v56 = vld [vmem:[#allocation5 + $0x15b8] sm:$0xff] }
 0x17b   :  { %1983 = vmatprep.subr.mxu1 %v831_v57  ;;  %1907 = vmatpush1.msra.mxu0 %v766_v58  ;;  %v863_v57 = vld [vmem:[#allocation5 + $0x17b8] sm:$0xff]  ;;  %v798_v58 = vld [vmem:[#allocation5 + $0x15b0] sm:$0xff] }
 0x17c   :  { %1984 = vmatpush1.msra.mxu1 %v830_v59  ;;  %1908 = vmatprep.subr.mxu0 %v765_v60  ;;  %v862_v59 = vld [vmem:[#allocation5 + $0x17b0] sm:$0xff]  ;;  %v797_v60 = vld [vmem:[#allocation5 + $0x15a8] sm:$0xff] }
 0x17d   :  { %1985 = vmatprep.subr.mxu1 %v829_v61  ;;  %1909 = vmatpush1.msra.mxu0 %v764_v62  ;;  %v861_v61 = vld [vmem:[#allocation5 + $0x17a8] sm:$0xff]  ;;  %v796_v62 = vld [vmem:[#allocation5 + $0x15a0] sm:$0xff] }
 0x17e   :  { %1986 = vmatpush1.msra.mxu1 %v828_v63  ;;  %1910 = vmatprep.subr.mxu0 %v763_v0  ;;  %v860_v63 = vld [vmem:[#allocation5 + $0x17a0] sm:$0xff]  ;;  %v795_v0 = vld [vmem:[#allocation5 + $0x1598] sm:$0xff] }
 0x17f   :  { %1987 = vmatprep.subr.mxu1 %v827_v1  ;;  %1911 = vmatpush1.msra.mxu0 %v762_v2  ;;  %v859_v1 = vld [vmem:[#allocation5 + $0x1798] sm:$0xff]  ;;  %v794_v2 = vld [vmem:[#allocation5 + $0x1590] sm:$0xff] }
 0x180   :  { %1988 = vmatpush1.msra.mxu1 %v826_v3  ;;  %1912 = vmatprep.subr.mxu0 %v761_v4  ;;  %v858_v3 = vld [vmem:[#allocation5 + $0x1790] sm:$0xff]  ;;  %v793_v4 = vld [vmem:[#allocation5 + $0x1588] sm:$0xff] }
 0x181   :  { %1989 = vmatprep.subr.mxu1 %v825_v5  ;;  %1913 = vmatpush1.msra.mxu0 %v760_v6  ;;  %v857_v5 = vld [vmem:[#allocation5 + $0x1788] sm:$0xff]  ;;  %v792_v6 = vld [vmem:[#allocation5 + $0x1580] sm:$0xff] }
 0x182   :  { %1990 = vmatpush1.msra.mxu1 %v824_v7  ;;  %1914 = vmatprep.subr.mxu0 %v759_v8  ;;  %v856_v7 = vld [vmem:[#allocation5 + $0x1780] sm:$0xff]  ;;  %v791_v8 = vld [vmem:[#allocation5 + $0x1578] sm:$0xff] }
 0x183   :  { %1991 = vmatprep.subr.mxu1 %v823_v9  ;;  %1915 = vmatpush1.msra.mxu0 %v758_v10  ;;  %v855_v9 = vld [vmem:[#allocation5 + $0x1778] sm:$0xff]  ;;  %v790_v10 = vld [vmem:[#allocation5 + $0x1570] sm:$0xff] }
 0x184   :  { %1992 = vmatpush1.msra.mxu1 %v822_v11  ;;  %1916 = vmatprep.subr.mxu0 %v757_v12  ;;  %v854_v11 = vld [vmem:[#allocation5 + $0x1770] sm:$0xff]  ;;  %v789_v12 = vld [vmem:[#allocation5 + $0x1568] sm:$0xff] }
 0x185   :  { %1993 = vmatprep.subr.mxu1 %v821_v13  ;;  %1917 = vmatpush1.msra.mxu0 %v756_v14  ;;  %v853_v13 = vld [vmem:[#allocation5 + $0x1768] sm:$0xff]  ;;  %v788_v14 = vld [vmem:[#allocation5 + $0x1560] sm:$0xff] }
 0x186   :  { %1994 = vmatpush1.msra.mxu1 %v820_v15  ;;  %1918 = vmatprep.subr.mxu0 %v755_v16  ;;  %v852_v15 = vld [vmem:[#allocation5 + $0x1760] sm:$0xff]  ;;  %v787_v16 = vld [vmem:[#allocation5 + $0x1558] sm:$0xff] }
 0x187   :  { %1995 = vmatprep.subr.mxu1 %v819_v17  ;;  %1919 = vmatpush1.msra.mxu0 %v754_v18  ;;  %v851_v17 = vld [vmem:[#allocation5 + $0x1758] sm:$0xff]  ;;  %v786_v18 = vld [vmem:[#allocation5 + $0x1550] sm:$0xff] }
 0x188   :  { %1996 = vmatpush1.msra.mxu1 %v818_v19  ;;  %1920 = vmatprep.subr.mxu0 %v753_v20  ;;  %v850_v19 = vld [vmem:[#allocation5 + $0x1750] sm:$0xff]  ;;  %v785_v20 = vld [vmem:[#allocation5 + $0x1548] sm:$0xff] }
 0x189   :  { %1997 = vmatprep.subr.mxu1 %v817_v21  ;;  %1921 = vmatpush1.msra.mxu0 %v752_v22  ;;  %v849_v21 = vld [vmem:[#allocation5 + $0x1748] sm:$0xff]  ;;  %v784_v22 = vld [vmem:[#allocation5 + $0x1540] sm:$0xff] }
 0x18a   :  { %1998 = vmatpush1.msra.mxu1 %v816_v23  ;;  %1922 = vmatprep.subr.mxu0 %v751_v24  ;;  %v848_v23 = vld [vmem:[#allocation5 + $0x1740] sm:$0xff]  ;;  %v783_v24 = vld [vmem:[#allocation5 + $0x1538] sm:$0xff] }
 0x18b   :  { %1999 = vmatprep.subr.mxu1 %v815_v25  ;;  %1923 = vmatpush1.msra.mxu0 %v750_v26  ;;  %v847_v25 = vld [vmem:[#allocation5 + $0x1738] sm:$0xff]  ;;  %v782_v26 = vld [vmem:[#allocation5 + $0x1530] sm:$0xff] }
 0x18c   :  { %2000 = vmatpush1.msra.mxu1 %v814_v27  ;;  %1924 = vmatprep.subr.mxu0 %v749_v28  ;;  %v846_v27 = vld [vmem:[#allocation5 + $0x1730] sm:$0xff]  ;;  %v781_v28 = vld [vmem:[#allocation5 + $0x1528] sm:$0xff] }
 0x18d   :  { %2001 = vmatprep.subr.mxu1 %v813_v29  ;;  %1925 = vmatpush1.msra.mxu0 %v748_v30  ;;  %v845_v29 = vld [vmem:[#allocation5 + $0x1728] sm:$0xff]  ;;  %v780_v30 = vld [vmem:[#allocation5 + $0x1520] sm:$0xff] }
 0x18e   :  { %2002 = vmatpush1.msra.mxu1 %v812_v31  ;;  %1926 = vmatprep.subr.mxu0 %v747_v32  ;;  %v844_v31 = vld [vmem:[#allocation5 + $0x1720] sm:$0xff]  ;;  %v779_v32 = vld [vmem:[#allocation5 + $0x1518] sm:$0xff] }
 0x18f   :  { %2003 = vmatprep.subr.mxu1 %v811_v33  ;;  %1927 = vmatpush1.msra.mxu0 %v746_v34  ;;  %v843_v33 = vld [vmem:[#allocation5 + $0x1718] sm:$0xff]  ;;  %v778_v34 = vld [vmem:[#allocation5 + $0x1510] sm:$0xff] }
 0x190   :  { %2004 = vmatpush1.msra.mxu1 %v810_v35  ;;  %1928 = vmatprep.subr.mxu0 %v745_v36  ;;  %v842_v35 = vld [vmem:[#allocation5 + $0x1710] sm:$0xff]  ;;  %v777_v36 = vld [vmem:[#allocation5 + $0x1508] sm:$0xff] }
 0x191   :  { %2005 = vmatprep.subr.mxu1 %v809_v37  ;;  %1929 = vmatpush1.msra.mxu0 %v744_v38  ;;  %v841_v37 = vld [vmem:[#allocation5 + $0x1708] sm:$0xff]  ;;  %v776_v38 = vld [vmem:[#allocation5 + $0x1500] sm:$0xff] }
 0x192   :  { %2006 = vmatpush1.msra.mxu1 %v808_v39  ;;  %1930 = vmatprep.subr.mxu0 %v807_v40  ;;  %v61_v39 = vld [vmem:[#allocation2 + $0xa8] sm:$0xff]  ;;  %v840_v40 = vld [vmem:[#allocation5 + $0x1700] sm:$0xff] }
 0x193   :  { %2007 = vmatprep.subr.mxu1 %v871_v41  ;;  %1931 = vmatpush2.msra.mxu0 %v806_v42  ;;  %v60_v41 = vld [vmem:[#allocation2 + $0xa0] sm:$0xff]  ;;  %v63_v42 = vld [vmem:[#allocation2 + $0xb8] sm:$0xff] }
 0x194   :  { %2008 = vmatpush2.msra.mxu1 %v870_v43  ;;  %1932 = vmatprep.subr.mxu0 %v805_v44  ;;  %v903_v43 = vld [vmem:[#allocation5 + $0x18f8] sm:$0xff] }
 0x195   :  { %2009 = vmatprep.subr.mxu1 %v869_v45  ;;  %1933 = vmatpush2.msra.mxu0 %v804_v46  ;;  %v967_v44 = vld [vmem:[#allocation5 + $0x1af8] sm:$0xff]  ;;  %v62_v45 = vld [vmem:[#allocation2 + $0xb0] sm:$0xff] }
 0x196   :  { %2010 = vmatpush2.msra.mxu1 %v868_v47  ;;  %1934 = vmatprep.subr.mxu0 %v803_v48  ;;  %v902_v46 = vld [vmem:[#allocation5 + $0x18f0] sm:$0xff]  ;;  %v901_v48 = vld [vmem:[#allocation5 + $0x18e8] sm:$0xff] }
 0x197   :  { %2011 = vmatprep.subr.mxu1 %v867_v49  ;;  %1935 = vmatpush2.msra.mxu0 %v802_v50  ;;  %v966_v47 = vld [vmem:[#allocation5 + $0x1af0] sm:$0xff]  ;;  %v965_v49 = vld [vmem:[#allocation5 + $0x1ae8] sm:$0xff] }
 0x198   :  { %2012 = vmatpush2.msra.mxu1 %v866_v51  ;;  %1936 = vmatprep.subr.mxu0 %v801_v52  ;;  %v93_v50 = vld [vmem:[#allocation2 + $0x1a8] sm:$0xff]  ;;  %v900_v51 = vld [vmem:[#allocation5 + $0x18e0] sm:$0xff] }
 0x199   :  { %2013 = vmatprep.subr.mxu1 %v865_v53  ;;  %1937 = vmatpush2.msra.mxu0 %v800_v54  ;;  %v964_v52 = vld [vmem:[#allocation5 + $0x1ae0] sm:$0xff]  ;;  %v899_v54 = vld [vmem:[#allocation5 + $0x18d8] sm:$0xff] }
 0x19a   :  { %2014 = vmatpush2.msra.mxu1 %v864_v55  ;;  %1938 = vmatprep.subr.mxu0 %v799_v56  ;;  %v92_v53 = vld [vmem:[#allocation2 + $0x1a0] sm:$0xff]  ;;  %v963_v55 = vld [vmem:[#allocation5 + $0x1ad8] sm:$0xff] }
 0x19b   :  { %2015 = vmatprep.subr.mxu1 %v863_v57  ;;  %1939 = vmatpush2.msra.mxu0 %v798_v58  ;;  %v95_v56 = vld [vmem:[#allocation2 + $0x1b8] sm:$0xff]  ;;  %v898_v57 = vld [vmem:[#allocation5 + $0x18d0] sm:$0xff] }
 0x19c   :  { %2016 = vmatpush2.msra.mxu1 %v862_v59  ;;  %1940 = vmatprep.subr.mxu0 %v797_v60  ;;  %v962_v58 = vld [vmem:[#allocation5 + $0x1ad0] sm:$0xff]  ;;  %v897_v59 = vld [vmem:[#allocation5 + $0x18c8] sm:$0xff] }
 0x19d   :  { %2017 = vmatprep.subr.mxu1 %v861_v61  ;;  %1941 = vmatpush2.msra.mxu0 %v796_v62  ;;  %v94_v60 = vld [vmem:[#allocation2 + $0x1b0] sm:$0xff]  ;;  %v961_v61 = vld [vmem:[#allocation5 + $0x1ac8] sm:$0xff]  ;;  %v896_v62 = vld [vmem:[#allocation5 + $0x18c0] sm:$0xff] }
 0x19e   :  { %2018 = vmatpush2.msra.mxu1 %v860_v63  ;;  %1942 = vmatprep.subr.mxu0 %v795_v0  ;;  %v960_v63 = vld [vmem:[#allocation5 + $0x1ac0] sm:$0xff]  ;;  %v895_v0 = vld [vmem:[#allocation5 + $0x18b8] sm:$0xff] }
 0x19f   :  { %2019 = vmatprep.subr.mxu1 %v859_v1  ;;  %1943 = vmatpush2.msra.mxu0 %v794_v2  ;;  %v959_v1 = vld [vmem:[#allocation5 + $0x1ab8] sm:$0xff]  ;;  %v894_v2 = vld [vmem:[#allocation5 + $0x18b0] sm:$0xff] }
 0x1a0   :  { %2020 = vmatpush2.msra.mxu1 %v858_v3  ;;  %1944 = vmatprep.subr.mxu0 %v793_v4  ;;  %v958_v3 = vld [vmem:[#allocation5 + $0x1ab0] sm:$0xff]  ;;  %v893_v4 = vld [vmem:[#allocation5 + $0x18a8] sm:$0xff] }
 0x1a1   :  { %2021 = vmatprep.subr.mxu1 %v857_v5  ;;  %1945 = vmatpush2.msra.mxu0 %v792_v6  ;;  %v957_v5 = vld [vmem:[#allocation5 + $0x1aa8] sm:$0xff]  ;;  %v892_v6 = vld [vmem:[#allocation5 + $0x18a0] sm:$0xff] }
 0x1a2   :  { %2022 = vmatpush2.msra.mxu1 %v856_v7  ;;  %1946 = vmatprep.subr.mxu0 %v791_v8  ;;  %v956_v7 = vld [vmem:[#allocation5 + $0x1aa0] sm:$0xff]  ;;  %v891_v8 = vld [vmem:[#allocation5 + $0x1898] sm:$0xff] }
 0x1a3   :  { %2023 = vmatprep.subr.mxu1 %v855_v9  ;;  %1947 = vmatpush2.msra.mxu0 %v790_v10  ;;  %v955_v9 = vld [vmem:[#allocation5 + $0x1a98] sm:$0xff]  ;;  %v890_v10 = vld [vmem:[#allocation5 + $0x1890] sm:$0xff] }
 0x1a4   :  { %2024 = vmatpush2.msra.mxu1 %v854_v11  ;;  %1948 = vmatprep.subr.mxu0 %v789_v12  ;;  %v954_v11 = vld [vmem:[#allocation5 + $0x1a90] sm:$0xff]  ;;  %v889_v12 = vld [vmem:[#allocation5 + $0x1888] sm:$0xff] }
 0x1a5   :  { %2025 = vmatprep.subr.mxu1 %v853_v13  ;;  %1949 = vmatpush2.msra.mxu0 %v788_v14  ;;  %v953_v13 = vld [vmem:[#allocation5 + $0x1a88] sm:$0xff]  ;;  %v888_v14 = vld [vmem:[#allocation5 + $0x1880] sm:$0xff] }
 0x1a6   :  { %2026 = vmatpush2.msra.mxu1 %v852_v15  ;;  %1950 = vmatprep.subr.mxu0 %v787_v16  ;;  %v952_v15 = vld [vmem:[#allocation5 + $0x1a80] sm:$0xff]  ;;  %v887_v16 = vld [vmem:[#allocation5 + $0x1878] sm:$0xff] }
 0x1a7   :  { %2027 = vmatprep.subr.mxu1 %v851_v17  ;;  %1951 = vmatpush2.msra.mxu0 %v786_v18  ;;  %v951_v17 = vld [vmem:[#allocation5 + $0x1a78] sm:$0xff]  ;;  %v886_v18 = vld [vmem:[#allocation5 + $0x1870] sm:$0xff] }
 0x1a8   :  { %2028 = vmatpush2.msra.mxu1 %v850_v19  ;;  %1952 = vmatprep.subr.mxu0 %v785_v20  ;;  %v950_v19 = vld [vmem:[#allocation5 + $0x1a70] sm:$0xff]  ;;  %v885_v20 = vld [vmem:[#allocation5 + $0x1868] sm:$0xff] }
 0x1a9   :  { %2029 = vmatprep.subr.mxu1 %v849_v21  ;;  %1953 = vmatpush2.msra.mxu0 %v784_v22  ;;  %v949_v21 = vld [vmem:[#allocation5 + $0x1a68] sm:$0xff]  ;;  %v884_v22 = vld [vmem:[#allocation5 + $0x1860] sm:$0xff] }
 0x1aa   :  { %2030 = vmatpush2.msra.mxu1 %v848_v23  ;;  %1954 = vmatprep.subr.mxu0 %v783_v24  ;;  %v948_v23 = vld [vmem:[#allocation5 + $0x1a60] sm:$0xff]  ;;  %v883_v24 = vld [vmem:[#allocation5 + $0x1858] sm:$0xff] }
 0x1ab   :  { %2031 = vmatprep.subr.mxu1 %v847_v25  ;;  %1955 = vmatpush2.msra.mxu0 %v782_v26  ;;  %v947_v25 = vld [vmem:[#allocation5 + $0x1a58] sm:$0xff]  ;;  %v882_v26 = vld [vmem:[#allocation5 + $0x1850] sm:$0xff] }
 0x1ac   :  { %2032 = vmatpush2.msra.mxu1 %v846_v27  ;;  %1956 = vmatprep.subr.mxu0 %v781_v28  ;;  %v946_v27 = vld [vmem:[#allocation5 + $0x1a50] sm:$0xff]  ;;  %v881_v28 = vld [vmem:[#allocation5 + $0x1848] sm:$0xff] }
 0x1ad   :  { %2033 = vmatprep.subr.mxu1 %v845_v29  ;;  %1957 = vmatpush2.msra.mxu0 %v780_v30  ;;  %v945_v29 = vld [vmem:[#allocation5 + $0x1a48] sm:$0xff]  ;;  %v880_v30 = vld [vmem:[#allocation5 + $0x1840] sm:$0xff] }
 0x1ae   :  { %2034 = vmatpush2.msra.mxu1 %v844_v31  ;;  %1958 = vmatprep.subr.mxu0 %v779_v32  ;;  %v944_v31 = vld [vmem:[#allocation5 + $0x1a40] sm:$0xff]  ;;  %v879_v32 = vld [vmem:[#allocation5 + $0x1838] sm:$0xff] }
 0x1af   :  { %2035 = vmatprep.subr.mxu1 %v843_v33  ;;  %1959 = vmatpush2.msra.mxu0 %v778_v34  ;;  %v943_v33 = vld [vmem:[#allocation5 + $0x1a38] sm:$0xff]  ;;  %v878_v34 = vld [vmem:[#allocation5 + $0x1830] sm:$0xff] }
 0x1b0   :  { %2036 = vmatpush2.msra.mxu1 %v842_v35  ;;  %1960 = vmatprep.subr.mxu0 %v777_v36  ;;  %v942_v35 = vld [vmem:[#allocation5 + $0x1a30] sm:$0xff]  ;;  %v877_v36 = vld [vmem:[#allocation5 + $0x1828] sm:$0xff] }
 0x1b1   :  { %2037 = vmatprep.subr.mxu1 %v841_v37  ;;  %1961 = vmatpush2.msra.mxu0 %v776_v38  ;;  %v941_v37 = vld [vmem:[#allocation5 + $0x1a28] sm:$0xff]  ;;  %v876_v38 = vld [vmem:[#allocation5 + $0x1820] sm:$0xff] }
 0x1b2   :  { %1962 = vmatprep.mubr.f32.mxu0 %v61_v39  ;;  %2038 = vmatpush2.msra.mxu1 %v840_v40  ;;  %v940_v39 = vld [vmem:[#allocation5 + $0x1a20] sm:$0xff]  ;;  %v875_v40 = vld [vmem:[#allocation5 + $0x1818] sm:$0xff] }
 0x1b3   :  { %1963 = vmatmul.mubr.f32.vlgmr.msra.gmra.mxu0 %v60_v41  ;;  %2039 = vmatprep.mubr.f32.mxu1 %v63_v42  ;;  %v939_v41 = vld [vmem:[#allocation5 + $0x1a18] sm:$0xff]  ;;  %v874_v42 = vld [vmem:[#allocation5 + $0x1810] sm:$0xff] }
 0x1b4   :  { %2052 = vmatprep.subr.mxu0 %v903_v43  ;;  %2129 = vmatprep.subr.mxu1 %v967_v44  ;;  %v938_v43 = vld [vmem:[#allocation5 + $0x1a10] sm:$0xff]  ;;  %v873_v44 = vld [vmem:[#allocation5 + $0x1808] sm:$0xff] }
 0x1b5   :  { %2040 = vmatmul.mubr.f32.vlgmr.msra.gmra.mxu1 %v62_v45  ;;  %2053 = vmatpush1.msra.mxu0 %v902_v46  ;;  %v937_v45 = vld [vmem:[#allocation5 + $0x1a08] sm:$0xff]  ;;  %v872_v46 = vld [vmem:[#allocation5 + $0x1800] sm:$0xff] }
 0x1b6   :  { %2130 = vmatpush1.msra.mxu1 %v966_v47  ;;  %2054 = vmatprep.subr.mxu0 %v901_v48  ;;  %v936_v47 = vld [vmem:[#allocation5 + $0x1a00] sm:$0xff]  ;;  %v935_v48 = vld [vmem:[#allocation5 + $0x19f8] sm:$0xff] }
 0x1b7   :  { %2131 = vmatprep.subr.mxu1 %v965_v49  ;;  %1968 = vmatprep.mubr.f32.mxu0 %v93_v50  ;;  %v999_v49 = vld [vmem:[#allocation5 + $0x1bf8] sm:$0xff]  ;;  %v934_v50 = vld [vmem:[#allocation5 + $0x19f0] sm:$0xff] }
 0x1b8   :  { %2055 = vmatpush1.msra.mxu0 %v900_v51  ;;  %2132 = vmatpush1.msra.mxu1 %v964_v52  ;;  %v998_v51 = vld [vmem:[#allocation5 + $0x1bf0] sm:$0xff]  ;;  %v933_v52 = vld [vmem:[#allocation5 + $0x19e8] sm:$0xff] }
 0x1b9   :  { %1969 = vmatmul.mubr.f32.gmra.mxu0 %v92_v53  ;;  %2056 = vmatprep.subr.mxu0 %v899_v54  ;;  %v997_v53 = vld [vmem:[#allocation5 + $0x1be8] sm:$0xff]  ;;  %v932_v54 = vld [vmem:[#allocation5 + $0x19e0] sm:$0xff] }
 0x1ba   :  { %2133 = vmatprep.subr.mxu1 %v963_v55  ;;  %2045 = vmatprep.mubr.f32.mxu1 %v95_v56  ;;  %v996_v55 = vld [vmem:[#allocation5 + $0x1be0] sm:$0xff]  ;;  %v931_v56 = vld [vmem:[#allocation5 + $0x19d8] sm:$0xff] }
 0x1bb   :  { %2057 = vmatpush1.msra.mxu0 %v898_v57  ;;  %2134 = vmatpush1.msra.mxu1 %v962_v58  ;;  %v995_v57 = vld [vmem:[#allocation5 + $0x1bd8] sm:$0xff]  ;;  %v930_v58 = vld [vmem:[#allocation5 + $0x19d0] sm:$0xff] }
 0x1bc   :  { %2058 = vmatprep.subr.mxu0 %v897_v59  ;;  %2046 = vmatmul.mubr.f32.gmra.mxu1 %v94_v60  ;;  %v994_v59 = vld [vmem:[#allocation5 + $0x1bd0] sm:$0xff]  ;;  %v929_v60 = vld [vmem:[#allocation5 + $0x19c8] sm:$0xff] }
 0x1bd   :  { %2135 = vmatprep.subr.mxu1 %v961_v61  ;;  %2059 = vmatpush1.msra.mxu0 %v896_v62  ;;  %v993_v61 = vld [vmem:[#allocation5 + $0x1bc8] sm:$0xff]  ;;  %v928_v62 = vld [vmem:[#allocation5 + $0x19c0] sm:$0xff] }
 0x1be   :  { %2136 = vmatpush1.msra.mxu1 %v960_v63  ;;  %2060 = vmatprep.subr.mxu0 %v895_v0  ;;  %v992_v63 = vld [vmem:[#allocation5 + $0x1bc0] sm:$0xff]  ;;  %v927_v0 = vld [vmem:[#allocation5 + $0x19b8] sm:$0xff] }
 0x1bf   :  { %2137 = vmatprep.subr.mxu1 %v959_v1  ;;  %2061 = vmatpush1.msra.mxu0 %v894_v2  ;;  %v991_v1 = vld [vmem:[#allocation5 + $0x1bb8] sm:$0xff]  ;;  %v926_v2 = vld [vmem:[#allocation5 + $0x19b0] sm:$0xff] }
 0x1c0   :  { %2138 = vmatpush1.msra.mxu1 %v958_v3  ;;  %2062 = vmatprep.subr.mxu0 %v893_v4  ;;  %v990_v3 = vld [vmem:[#allocation5 + $0x1bb0] sm:$0xff]  ;;  %v925_v4 = vld [vmem:[#allocation5 + $0x19a8] sm:$0xff] }
 0x1c1   :  { %2139 = vmatprep.subr.mxu1 %v957_v5  ;;  %2063 = vmatpush1.msra.mxu0 %v892_v6  ;;  %v989_v5 = vld [vmem:[#allocation5 + $0x1ba8] sm:$0xff]  ;;  %v924_v6 = vld [vmem:[#allocation5 + $0x19a0] sm:$0xff] }
 0x1c2   :  { %2140 = vmatpush1.msra.mxu1 %v956_v7  ;;  %2064 = vmatprep.subr.mxu0 %v891_v8  ;;  %v988_v7 = vld [vmem:[#allocation5 + $0x1ba0] sm:$0xff]  ;;  %v923_v8 = vld [vmem:[#allocation5 + $0x1998] sm:$0xff] }
 0x1c3   :  { %2141 = vmatprep.subr.mxu1 %v955_v9  ;;  %2065 = vmatpush1.msra.mxu0 %v890_v10  ;;  %v987_v9 = vld [vmem:[#allocation5 + $0x1b98] sm:$0xff]  ;;  %v922_v10 = vld [vmem:[#allocation5 + $0x1990] sm:$0xff] }
 0x1c4   :  { %2142 = vmatpush1.msra.mxu1 %v954_v11  ;;  %2066 = vmatprep.subr.mxu0 %v889_v12  ;;  %v986_v11 = vld [vmem:[#allocation5 + $0x1b90] sm:$0xff]  ;;  %v921_v12 = vld [vmem:[#allocation5 + $0x1988] sm:$0xff] }
 0x1c5   :  { %2143 = vmatprep.subr.mxu1 %v953_v13  ;;  %2067 = vmatpush1.msra.mxu0 %v888_v14  ;;  %v985_v13 = vld [vmem:[#allocation5 + $0x1b88] sm:$0xff]  ;;  %v920_v14 = vld [vmem:[#allocation5 + $0x1980] sm:$0xff] }
 0x1c6   :  { %2144 = vmatpush1.msra.mxu1 %v952_v15  ;;  %2068 = vmatprep.subr.mxu0 %v887_v16  ;;  %v984_v15 = vld [vmem:[#allocation5 + $0x1b80] sm:$0xff]  ;;  %v919_v16 = vld [vmem:[#allocation5 + $0x1978] sm:$0xff] }
 0x1c7   :  { %2145 = vmatprep.subr.mxu1 %v951_v17  ;;  %2069 = vmatpush1.msra.mxu0 %v886_v18  ;;  %v983_v17 = vld [vmem:[#allocation5 + $0x1b78] sm:$0xff]  ;;  %v918_v18 = vld [vmem:[#allocation5 + $0x1970] sm:$0xff] }
 0x1c8   :  { %2146 = vmatpush1.msra.mxu1 %v950_v19  ;;  %2070 = vmatprep.subr.mxu0 %v885_v20  ;;  %v982_v19 = vld [vmem:[#allocation5 + $0x1b70] sm:$0xff]  ;;  %v917_v20 = vld [vmem:[#allocation5 + $0x1968] sm:$0xff] }
 0x1c9   :  { %2147 = vmatprep.subr.mxu1 %v949_v21  ;;  %2071 = vmatpush1.msra.mxu0 %v884_v22  ;;  %v981_v21 = vld [vmem:[#allocation5 + $0x1b68] sm:$0xff]  ;;  %v916_v22 = vld [vmem:[#allocation5 + $0x1960] sm:$0xff] }
 0x1ca   :  { %2148 = vmatpush1.msra.mxu1 %v948_v23  ;;  %2072 = vmatprep.subr.mxu0 %v883_v24  ;;  %v980_v23 = vld [vmem:[#allocation5 + $0x1b60] sm:$0xff]  ;;  %v915_v24 = vld [vmem:[#allocation5 + $0x1958] sm:$0xff] }
 0x1cb   :  { %2149 = vmatprep.subr.mxu1 %v947_v25  ;;  %2073 = vmatpush1.msra.mxu0 %v882_v26  ;;  %v979_v25 = vld [vmem:[#allocation5 + $0x1b58] sm:$0xff]  ;;  %v914_v26 = vld [vmem:[#allocation5 + $0x1950] sm:$0xff] }
 0x1cc   :  { %2150 = vmatpush1.msra.mxu1 %v946_v27  ;;  %2074 = vmatprep.subr.mxu0 %v881_v28  ;;  %v978_v27 = vld [vmem:[#allocation5 + $0x1b50] sm:$0xff]  ;;  %v913_v28 = vld [vmem:[#allocation5 + $0x1948] sm:$0xff] }
 0x1cd   :  { %2151 = vmatprep.subr.mxu1 %v945_v29  ;;  %2075 = vmatpush1.msra.mxu0 %v880_v30  ;;  %v977_v29 = vld [vmem:[#allocation5 + $0x1b48] sm:$0xff]  ;;  %v912_v30 = vld [vmem:[#allocation5 + $0x1940] sm:$0xff] }
 0x1ce   :  { %2152 = vmatpush1.msra.mxu1 %v944_v31  ;;  %2076 = vmatprep.subr.mxu0 %v879_v32  ;;  %v976_v31 = vld [vmem:[#allocation5 + $0x1b40] sm:$0xff]  ;;  %v911_v32 = vld [vmem:[#allocation5 + $0x1938] sm:$0xff] }
 0x1cf   :  { %2153 = vmatprep.subr.mxu1 %v943_v33  ;;  %2077 = vmatpush1.msra.mxu0 %v878_v34  ;;  %v975_v33 = vld [vmem:[#allocation5 + $0x1b38] sm:$0xff]  ;;  %v910_v34 = vld [vmem:[#allocation5 + $0x1930] sm:$0xff] }
 0x1d0   :  { %2154 = vmatpush1.msra.mxu1 %v942_v35  ;;  %2078 = vmatprep.subr.mxu0 %v877_v36  ;;  %v974_v35 = vld [vmem:[#allocation5 + $0x1b30] sm:$0xff]  ;;  %v909_v36 = vld [vmem:[#allocation5 + $0x1928] sm:$0xff] }
 0x1d1   :  { %2155 = vmatprep.subr.mxu1 %v941_v37  ;;  %2079 = vmatpush1.msra.mxu0 %v876_v38  ;;  %v973_v37 = vld [vmem:[#allocation5 + $0x1b28] sm:$0xff]  ;;  %v908_v38 = vld [vmem:[#allocation5 + $0x1920] sm:$0xff] }
 0x1d2   :  { %2156 = vmatpush1.msra.mxu1 %v940_v39  ;;  %2080 = vmatprep.subr.mxu0 %v875_v40  ;;  %v972_v39 = vld [vmem:[#allocation5 + $0x1b20] sm:$0xff]  ;;  %v907_v40 = vld [vmem:[#allocation5 + $0x1918] sm:$0xff] }
 0x1d3   :  { %2157 = vmatprep.subr.mxu1 %v939_v41  ;;  %2081 = vmatpush1.msra.mxu0 %v874_v42  ;;  %v971_v41 = vld [vmem:[#allocation5 + $0x1b18] sm:$0xff]  ;;  %v906_v42 = vld [vmem:[#allocation5 + $0x1910] sm:$0xff] }
 0x1d4   :  { %2158 = vmatpush1.msra.mxu1 %v938_v43  ;;  %2082 = vmatprep.subr.mxu0 %v873_v44  ;;  %v970_v43 = vld [vmem:[#allocation5 + $0x1b10] sm:$0xff]  ;;  %v905_v44 = vld [vmem:[#allocation5 + $0x1908] sm:$0xff] }
 0x1d5   :  { %2159 = vmatprep.subr.mxu1 %v937_v45  ;;  %2083 = vmatpush1.msra.mxu0 %v872_v46  ;;  %v969_v45 = vld [vmem:[#allocation5 + $0x1b08] sm:$0xff]  ;;  %v904_v46 = vld [vmem:[#allocation5 + $0x1900] sm:$0xff] }
 0x1d6   :  { %2160 = vmatpush1.msra.mxu1 %v936_v47  ;;  %2084 = vmatprep.subr.mxu0 %v935_v48  ;;  %v65_v47 = vld [vmem:[#allocation2 + $0xc8] sm:$0xff]  ;;  %v968_v48 = vld [vmem:[#allocation5 + $0x1b00] sm:$0xff] }
 0x1d7   :  { %2161 = vmatprep.subr.mxu1 %v999_v49  ;;  %2085 = vmatpush2.msra.mxu0 %v934_v50  ;;  %v64_v49 = vld [vmem:[#allocation2 + $0xc0] sm:$0xff]  ;;  %v67_v50 = vld [vmem:[#allocation2 + $0xd8] sm:$0xff] }
 0x1d8   :  { %2162 = vmatpush2.msra.mxu1 %v998_v51  ;;  %2086 = vmatprep.subr.mxu0 %v933_v52  ;;  %v1031_v51 = vld [vmem:[#allocation5 + $0x1cf8] sm:$0xff] }
 0x1d9   :  { %2163 = vmatprep.subr.mxu1 %v997_v53  ;;  %2087 = vmatpush2.msra.mxu0 %v932_v54  ;;  %v1095_v52 = vld [vmem:[#allocation5 + $0x1ef8] sm:$0xff]  ;;  %v66_v53 = vld [vmem:[#allocation2 + $0xd0] sm:$0xff] }
 0x1da   :  { %2164 = vmatpush2.msra.mxu1 %v996_v55  ;;  %2088 = vmatprep.subr.mxu0 %v931_v56  ;;  %v1030_v54 = vld [vmem:[#allocation5 + $0x1cf0] sm:$0xff]  ;;  %v1029_v56 = vld [vmem:[#allocation5 + $0x1ce8] sm:$0xff] }
 0x1db   :  { %2165 = vmatprep.subr.mxu1 %v995_v57  ;;  %2089 = vmatpush2.msra.mxu0 %v930_v58  ;;  %v1094_v55 = vld [vmem:[#allocation5 + $0x1ef0] sm:$0xff]  ;;  %v1093_v57 = vld [vmem:[#allocation5 + $0x1ee8] sm:$0xff] }
 0x1dc   :  { %2166 = vmatpush2.msra.mxu1 %v994_v59  ;;  %2090 = vmatprep.subr.mxu0 %v929_v60  ;;  %v97_v58 = vld [vmem:[#allocation2 + $0x1c8] sm:$0xff]  ;;  %v1028_v59 = vld [vmem:[#allocation5 + $0x1ce0] sm:$0xff] }
 0x1dd   :  { %2167 = vmatprep.subr.mxu1 %v993_v61  ;;  %2091 = vmatpush2.msra.mxu0 %v928_v62  ;;  %v1092_v60 = vld [vmem:[#allocation5 + $0x1ee0] sm:$0xff]  ;;  %v1027_v62 = vld [vmem:[#allocation5 + $0x1cd8] sm:$0xff] }
 0x1de   :  { %2168 = vmatpush2.msra.mxu1 %v992_v63  ;;  %2092 = vmatprep.subr.mxu0 %v927_v0  ;;  %v96_v61 = vld [vmem:[#allocation2 + $0x1c0] sm:$0xff]  ;;  %v1091_v63 = vld [vmem:[#allocation5 + $0x1ed8] sm:$0xff] }
 0x1df   :  { %2169 = vmatprep.subr.mxu1 %v991_v1  ;;  %2093 = vmatpush2.msra.mxu0 %v926_v2  ;;  %v99_v0 = vld [vmem:[#allocation2 + $0x1d8] sm:$0xff]  ;;  %v1026_v1 = vld [vmem:[#allocation5 + $0x1cd0] sm:$0xff] }
 0x1e0   :  { %2170 = vmatpush2.msra.mxu1 %v990_v3  ;;  %2094 = vmatprep.subr.mxu0 %v925_v4  ;;  %v1090_v2 = vld [vmem:[#allocation5 + $0x1ed0] sm:$0xff]  ;;  %v1025_v3 = vld [vmem:[#allocation5 + $0x1cc8] sm:$0xff] }
 0x1e1   :  { %2171 = vmatprep.subr.mxu1 %v989_v5  ;;  %2095 = vmatpush2.msra.mxu0 %v924_v6  ;;  %v98_v4 = vld [vmem:[#allocation2 + $0x1d0] sm:$0xff]  ;;  %v1089_v5 = vld [vmem:[#allocation5 + $0x1ec8] sm:$0xff]  ;;  %v1024_v6 = vld [vmem:[#allocation5 + $0x1cc0] sm:$0xff] }
 0x1e2   :  { %2172 = vmatpush2.msra.mxu1 %v988_v7  ;;  %2096 = vmatprep.subr.mxu0 %v923_v8  ;;  %v1088_v7 = vld [vmem:[#allocation5 + $0x1ec0] sm:$0xff]  ;;  %v1023_v8 = vld [vmem:[#allocation5 + $0x1cb8] sm:$0xff] }
 0x1e3   :  { %2173 = vmatprep.subr.mxu1 %v987_v9  ;;  %2097 = vmatpush2.msra.mxu0 %v922_v10  ;;  %v1087_v9 = vld [vmem:[#allocation5 + $0x1eb8] sm:$0xff]  ;;  %v1022_v10 = vld [vmem:[#allocation5 + $0x1cb0] sm:$0xff] }
 0x1e4   :  { %2174 = vmatpush2.msra.mxu1 %v986_v11  ;;  %2098 = vmatprep.subr.mxu0 %v921_v12  ;;  %v1086_v11 = vld [vmem:[#allocation5 + $0x1eb0] sm:$0xff]  ;;  %v1021_v12 = vld [vmem:[#allocation5 + $0x1ca8] sm:$0xff] }
 0x1e5   :  { %2175 = vmatprep.subr.mxu1 %v985_v13  ;;  %2099 = vmatpush2.msra.mxu0 %v920_v14  ;;  %v1085_v13 = vld [vmem:[#allocation5 + $0x1ea8] sm:$0xff]  ;;  %v1020_v14 = vld [vmem:[#allocation5 + $0x1ca0] sm:$0xff] }
 0x1e6   :  { %2176 = vmatpush2.msra.mxu1 %v984_v15  ;;  %2100 = vmatprep.subr.mxu0 %v919_v16  ;;  %v1084_v15 = vld [vmem:[#allocation5 + $0x1ea0] sm:$0xff]  ;;  %v1019_v16 = vld [vmem:[#allocation5 + $0x1c98] sm:$0xff] }
 0x1e7   :  { %2177 = vmatprep.subr.mxu1 %v983_v17  ;;  %2101 = vmatpush2.msra.mxu0 %v918_v18  ;;  %v1083_v17 = vld [vmem:[#allocation5 + $0x1e98] sm:$0xff]  ;;  %v1018_v18 = vld [vmem:[#allocation5 + $0x1c90] sm:$0xff] }
 0x1e8   :  { %2178 = vmatpush2.msra.mxu1 %v982_v19  ;;  %2102 = vmatprep.subr.mxu0 %v917_v20  ;;  %v1082_v19 = vld [vmem:[#allocation5 + $0x1e90] sm:$0xff]  ;;  %v1017_v20 = vld [vmem:[#allocation5 + $0x1c88] sm:$0xff] }
 0x1e9   :  { %2179 = vmatprep.subr.mxu1 %v981_v21  ;;  %2103 = vmatpush2.msra.mxu0 %v916_v22  ;;  %v1081_v21 = vld [vmem:[#allocation5 + $0x1e88] sm:$0xff]  ;;  %v1016_v22 = vld [vmem:[#allocation5 + $0x1c80] sm:$0xff] }
 0x1ea   :  { %2180 = vmatpush2.msra.mxu1 %v980_v23  ;;  %2104 = vmatprep.subr.mxu0 %v915_v24  ;;  %v1080_v23 = vld [vmem:[#allocation5 + $0x1e80] sm:$0xff]  ;;  %v1015_v24 = vld [vmem:[#allocation5 + $0x1c78] sm:$0xff] }
 0x1eb   :  { %2181 = vmatprep.subr.mxu1 %v979_v25  ;;  %2105 = vmatpush2.msra.mxu0 %v914_v26  ;;  %v1079_v25 = vld [vmem:[#allocation5 + $0x1e78] sm:$0xff]  ;;  %v1014_v26 = vld [vmem:[#allocation5 + $0x1c70] sm:$0xff] }
 0x1ec   :  { %2182 = vmatpush2.msra.mxu1 %v978_v27  ;;  %2106 = vmatprep.subr.mxu0 %v913_v28  ;;  %v1078_v27 = vld [vmem:[#allocation5 + $0x1e70] sm:$0xff]  ;;  %v1013_v28 = vld [vmem:[#allocation5 + $0x1c68] sm:$0xff] }
 0x1ed   :  { %2183 = vmatprep.subr.mxu1 %v977_v29  ;;  %2107 = vmatpush2.msra.mxu0 %v912_v30  ;;  %v1077_v29 = vld [vmem:[#allocation5 + $0x1e68] sm:$0xff]  ;;  %v1012_v30 = vld [vmem:[#allocation5 + $0x1c60] sm:$0xff] }
 0x1ee   :  { %2184 = vmatpush2.msra.mxu1 %v976_v31  ;;  %2108 = vmatprep.subr.mxu0 %v911_v32  ;;  %v1076_v31 = vld [vmem:[#allocation5 + $0x1e60] sm:$0xff]  ;;  %v1011_v32 = vld [vmem:[#allocation5 + $0x1c58] sm:$0xff] }
 0x1ef   :  { %2185 = vmatprep.subr.mxu1 %v975_v33  ;;  %2109 = vmatpush2.msra.mxu0 %v910_v34  ;;  %v1075_v33 = vld [vmem:[#allocation5 + $0x1e58] sm:$0xff]  ;;  %v1010_v34 = vld [vmem:[#allocation5 + $0x1c50] sm:$0xff] }
 0x1f0   :  { %2186 = vmatpush2.msra.mxu1 %v974_v35  ;;  %2110 = vmatprep.subr.mxu0 %v909_v36  ;;  %v1074_v35 = vld [vmem:[#allocation5 + $0x1e50] sm:$0xff]  ;;  %v1009_v36 = vld [vmem:[#allocation5 + $0x1c48] sm:$0xff] }
 0x1f1   :  { %2187 = vmatprep.subr.mxu1 %v973_v37  ;;  %2111 = vmatpush2.msra.mxu0 %v908_v38  ;;  %v1073_v37 = vld [vmem:[#allocation5 + $0x1e48] sm:$0xff]  ;;  %v1008_v38 = vld [vmem:[#allocation5 + $0x1c40] sm:$0xff] }
 0x1f2   :  { %2188 = vmatpush2.msra.mxu1 %v972_v39  ;;  %2112 = vmatprep.subr.mxu0 %v907_v40  ;;  %v1072_v39 = vld [vmem:[#allocation5 + $0x1e40] sm:$0xff]  ;;  %v1007_v40 = vld [vmem:[#allocation5 + $0x1c38] sm:$0xff] }
 0x1f3   :  { %2189 = vmatprep.subr.mxu1 %v971_v41  ;;  %2113 = vmatpush2.msra.mxu0 %v906_v42  ;;  %v1071_v41 = vld [vmem:[#allocation5 + $0x1e38] sm:$0xff]  ;;  %v1006_v42 = vld [vmem:[#allocation5 + $0x1c30] sm:$0xff] }
 0x1f4   :  { %2190 = vmatpush2.msra.mxu1 %v970_v43  ;;  %2114 = vmatprep.subr.mxu0 %v905_v44  ;;  %v1070_v43 = vld [vmem:[#allocation5 + $0x1e30] sm:$0xff]  ;;  %v1005_v44 = vld [vmem:[#allocation5 + $0x1c28] sm:$0xff] }
 0x1f5   :  { %2191 = vmatprep.subr.mxu1 %v969_v45  ;;  %2115 = vmatpush2.msra.mxu0 %v904_v46  ;;  %v1069_v45 = vld [vmem:[#allocation5 + $0x1e28] sm:$0xff]  ;;  %v1004_v46 = vld [vmem:[#allocation5 + $0x1c20] sm:$0xff] }
 0x1f6   :  { %2116 = vmatprep.mubr.f32.mxu0 %v65_v47  ;;  %2192 = vmatpush2.msra.mxu1 %v968_v48  ;;  %v1068_v47 = vld [vmem:[#allocation5 + $0x1e20] sm:$0xff]  ;;  %v1003_v48 = vld [vmem:[#allocation5 + $0x1c18] sm:$0xff] }
 0x1f7   :  { %2117 = vmatmul.mubr.f32.vlgmr.msra.gmra.mxu0 %v64_v49  ;;  %2193 = vmatprep.mubr.f32.mxu1 %v67_v50  ;;  %v1067_v49 = vld [vmem:[#allocation5 + $0x1e18] sm:$0xff]  ;;  %v1002_v50 = vld [vmem:[#allocation5 + $0x1c10] sm:$0xff] }
 0x1f8   :  { %2206 = vmatprep.subr.mxu0 %v1031_v51  ;;  %2283 = vmatprep.subr.mxu1 %v1095_v52  ;;  %v1066_v51 = vld [vmem:[#allocation5 + $0x1e10] sm:$0xff]  ;;  %v1001_v52 = vld [vmem:[#allocation5 + $0x1c08] sm:$0xff] }
 0x1f9   :  { %2194 = vmatmul.mubr.f32.vlgmr.msra.gmra.mxu1 %v66_v53  ;;  %2207 = vmatpush1.msra.mxu0 %v1030_v54  ;;  %v1065_v53 = vld [vmem:[#allocation5 + $0x1e08] sm:$0xff]  ;;  %v1000_v54 = vld [vmem:[#allocation5 + $0x1c00] sm:$0xff] }
 0x1fa   :  { %2284 = vmatpush1.msra.mxu1 %v1094_v55  ;;  %2208 = vmatprep.subr.mxu0 %v1029_v56  ;;  %v1064_v55 = vld [vmem:[#allocation5 + $0x1e00] sm:$0xff]  ;;  %v1063_v56 = vld [vmem:[#allocation5 + $0x1df8] sm:$0xff] }
 0x1fb   :  { %2285 = vmatprep.subr.mxu1 %v1093_v57  ;;  %2122 = vmatprep.mubr.f32.mxu0 %v97_v58  ;;  %v1127_v57 = vld [vmem:[#allocation5 + $0x1ff8] sm:$0xff]  ;;  %v1062_v58 = vld [vmem:[#allocation5 + $0x1df0] sm:$0xff] }
 0x1fc   :  { %2209 = vmatpush1.msra.mxu0 %v1028_v59  ;;  %2286 = vmatpush1.msra.mxu1 %v1092_v60  ;;  %v1126_v59 = vld [vmem:[#allocation5 + $0x1ff0] sm:$0xff]  ;;  %v1061_v60 = vld [vmem:[#allocation5 + $0x1de8] sm:$0xff] }
 0x1fd   :  { %2123 = vmatmul.mubr.f32.gmra.mxu0 %v96_v61  ;;  %2210 = vmatprep.subr.mxu0 %v1027_v62  ;;  %v1125_v61 = vld [vmem:[#allocation5 + $0x1fe8] sm:$0xff]  ;;  %v1060_v62 = vld [vmem:[#allocation5 + $0x1de0] sm:$0xff] }
 0x1fe   :  { %2287 = vmatprep.subr.mxu1 %v1091_v63  ;;  %2199 = vmatprep.mubr.f32.mxu1 %v99_v0  ;;  %v1124_v63 = vld [vmem:[#allocation5 + $0x1fe0] sm:$0xff]  ;;  %v1059_v0 = vld [vmem:[#allocation5 + $0x1dd8] sm:$0xff] }
 0x1ff   :  { %2211 = vmatpush1.msra.mxu0 %v1026_v1  ;;  %2288 = vmatpush1.msra.mxu1 %v1090_v2  ;;  %v1123_v1 = vld [vmem:[#allocation5 + $0x1fd8] sm:$0xff]  ;;  %v1058_v2 = vld [vmem:[#allocation5 + $0x1dd0] sm:$0xff] }
 0x200   :  { %2212 = vmatprep.subr.mxu0 %v1025_v3  ;;  %2200 = vmatmul.mubr.f32.gmra.mxu1 %v98_v4  ;;  %v1122_v3 = vld [vmem:[#allocation5 + $0x1fd0] sm:$0xff]  ;;  %v1057_v4 = vld [vmem:[#allocation5 + $0x1dc8] sm:$0xff] }
 0x201   :  { %2289 = vmatprep.subr.mxu1 %v1089_v5  ;;  %2213 = vmatpush1.msra.mxu0 %v1024_v6  ;;  %v1121_v5 = vld [vmem:[#allocation5 + $0x1fc8] sm:$0xff]  ;;  %v1056_v6 = vld [vmem:[#allocation5 + $0x1dc0] sm:$0xff] }
 0x202   :  { %2290 = vmatpush1.msra.mxu1 %v1088_v7  ;;  %2214 = vmatprep.subr.mxu0 %v1023_v8  ;;  %v1120_v7 = vld [vmem:[#allocation5 + $0x1fc0] sm:$0xff]  ;;  %v1055_v8 = vld [vmem:[#allocation5 + $0x1db8] sm:$0xff] }
 0x203   :  { %2291 = vmatprep.subr.mxu1 %v1087_v9  ;;  %2215 = vmatpush1.msra.mxu0 %v1022_v10  ;;  %v1119_v9 = vld [vmem:[#allocation5 + $0x1fb8] sm:$0xff]  ;;  %v1054_v10 = vld [vmem:[#allocation5 + $0x1db0] sm:$0xff] }
 0x204   :  { %2292 = vmatpush1.msra.mxu1 %v1086_v11  ;;  %2216 = vmatprep.subr.mxu0 %v1021_v12  ;;  %v1118_v11 = vld [vmem:[#allocation5 + $0x1fb0] sm:$0xff]  ;;  %v1053_v12 = vld [vmem:[#allocation5 + $0x1da8] sm:$0xff] }
 0x205   :  { %2293 = vmatprep.subr.mxu1 %v1085_v13  ;;  %2217 = vmatpush1.msra.mxu0 %v1020_v14  ;;  %v1117_v13 = vld [vmem:[#allocation5 + $0x1fa8] sm:$0xff]  ;;  %v1052_v14 = vld [vmem:[#allocation5 + $0x1da0] sm:$0xff] }
 0x206   :  { %2294 = vmatpush1.msra.mxu1 %v1084_v15  ;;  %2218 = vmatprep.subr.mxu0 %v1019_v16  ;;  %v1116_v15 = vld [vmem:[#allocation5 + $0x1fa0] sm:$0xff]  ;;  %v1051_v16 = vld [vmem:[#allocation5 + $0x1d98] sm:$0xff] }
 0x207   :  { %2295 = vmatprep.subr.mxu1 %v1083_v17  ;;  %2219 = vmatpush1.msra.mxu0 %v1018_v18  ;;  %v1115_v17 = vld [vmem:[#allocation5 + $0x1f98] sm:$0xff]  ;;  %v1050_v18 = vld [vmem:[#allocation5 + $0x1d90] sm:$0xff] }
 0x208   :  { %2296 = vmatpush1.msra.mxu1 %v1082_v19  ;;  %2220 = vmatprep.subr.mxu0 %v1017_v20  ;;  %v1114_v19 = vld [vmem:[#allocation5 + $0x1f90] sm:$0xff]  ;;  %v1049_v20 = vld [vmem:[#allocation5 + $0x1d88] sm:$0xff] }
 0x209   :  { %2297 = vmatprep.subr.mxu1 %v1081_v21  ;;  %2221 = vmatpush1.msra.mxu0 %v1016_v22  ;;  %v1113_v21 = vld [vmem:[#allocation5 + $0x1f88] sm:$0xff]  ;;  %v1048_v22 = vld [vmem:[#allocation5 + $0x1d80] sm:$0xff] }
 0x20a   :  { %2298 = vmatpush1.msra.mxu1 %v1080_v23  ;;  %2222 = vmatprep.subr.mxu0 %v1015_v24  ;;  %v1112_v23 = vld [vmem:[#allocation5 + $0x1f80] sm:$0xff]  ;;  %v1047_v24 = vld [vmem:[#allocation5 + $0x1d78] sm:$0xff] }
 0x20b   :  { %2299 = vmatprep.subr.mxu1 %v1079_v25  ;;  %2223 = vmatpush1.msra.mxu0 %v1014_v26  ;;  %v1111_v25 = vld [vmem:[#allocation5 + $0x1f78] sm:$0xff]  ;;  %v1046_v26 = vld [vmem:[#allocation5 + $0x1d70] sm:$0xff] }
 0x20c   :  { %2300 = vmatpush1.msra.mxu1 %v1078_v27  ;;  %2224 = vmatprep.subr.mxu0 %v1013_v28  ;;  %v1110_v27 = vld [vmem:[#allocation5 + $0x1f70] sm:$0xff]  ;;  %v1045_v28 = vld [vmem:[#allocation5 + $0x1d68] sm:$0xff] }
 0x20d   :  { %2301 = vmatprep.subr.mxu1 %v1077_v29  ;;  %2225 = vmatpush1.msra.mxu0 %v1012_v30  ;;  %v1109_v29 = vld [vmem:[#allocation5 + $0x1f68] sm:$0xff]  ;;  %v1044_v30 = vld [vmem:[#allocation5 + $0x1d60] sm:$0xff] }
 0x20e   :  { %2302 = vmatpush1.msra.mxu1 %v1076_v31  ;;  %2226 = vmatprep.subr.mxu0 %v1011_v32  ;;  %v1108_v31 = vld [vmem:[#allocation5 + $0x1f60] sm:$0xff]  ;;  %v1043_v32 = vld [vmem:[#allocation5 + $0x1d58] sm:$0xff] }
 0x20f   :  { %2303 = vmatprep.subr.mxu1 %v1075_v33  ;;  %2227 = vmatpush1.msra.mxu0 %v1010_v34  ;;  %v1107_v33 = vld [vmem:[#allocation5 + $0x1f58] sm:$0xff]  ;;  %v1042_v34 = vld [vmem:[#allocation5 + $0x1d50] sm:$0xff] }
 0x210   :  { %2304 = vmatpush1.msra.mxu1 %v1074_v35  ;;  %2228 = vmatprep.subr.mxu0 %v1009_v36  ;;  %v1106_v35 = vld [vmem:[#allocation5 + $0x1f50] sm:$0xff]  ;;  %v1041_v36 = vld [vmem:[#allocation5 + $0x1d48] sm:$0xff] }
 0x211   :  { %2305 = vmatprep.subr.mxu1 %v1073_v37  ;;  %2229 = vmatpush1.msra.mxu0 %v1008_v38  ;;  %v1105_v37 = vld [vmem:[#allocation5 + $0x1f48] sm:$0xff]  ;;  %v1040_v38 = vld [vmem:[#allocation5 + $0x1d40] sm:$0xff] }
 0x212   :  { %2306 = vmatpush1.msra.mxu1 %v1072_v39  ;;  %2230 = vmatprep.subr.mxu0 %v1007_v40  ;;  %v1104_v39 = vld [vmem:[#allocation5 + $0x1f40] sm:$0xff]  ;;  %v1039_v40 = vld [vmem:[#allocation5 + $0x1d38] sm:$0xff] }
 0x213   :  { %2307 = vmatprep.subr.mxu1 %v1071_v41  ;;  %2231 = vmatpush1.msra.mxu0 %v1006_v42  ;;  %v1103_v41 = vld [vmem:[#allocation5 + $0x1f38] sm:$0xff]  ;;  %v1038_v42 = vld [vmem:[#allocation5 + $0x1d30] sm:$0xff] }
 0x214   :  { %2308 = vmatpush1.msra.mxu1 %v1070_v43  ;;  %2232 = vmatprep.subr.mxu0 %v1005_v44  ;;  %v1102_v43 = vld [vmem:[#allocation5 + $0x1f30] sm:$0xff]  ;;  %v1037_v44 = vld [vmem:[#allocation5 + $0x1d28] sm:$0xff] }
 0x215   :  { %2309 = vmatprep.subr.mxu1 %v1069_v45  ;;  %2233 = vmatpush1.msra.mxu0 %v1004_v46  ;;  %v1101_v45 = vld [vmem:[#allocation5 + $0x1f28] sm:$0xff]  ;;  %v1036_v46 = vld [vmem:[#allocation5 + $0x1d20] sm:$0xff] }
 0x216   :  { %2310 = vmatpush1.msra.mxu1 %v1068_v47  ;;  %2234 = vmatprep.subr.mxu0 %v1003_v48  ;;  %v1100_v47 = vld [vmem:[#allocation5 + $0x1f20] sm:$0xff]  ;;  %v1035_v48 = vld [vmem:[#allocation5 + $0x1d18] sm:$0xff] }
 0x217   :  { %2311 = vmatprep.subr.mxu1 %v1067_v49  ;;  %2235 = vmatpush1.msra.mxu0 %v1002_v50  ;;  %v1099_v49 = vld [vmem:[#allocation5 + $0x1f18] sm:$0xff]  ;;  %v1034_v50 = vld [vmem:[#allocation5 + $0x1d10] sm:$0xff] }
 0x218   :  { %2312 = vmatpush1.msra.mxu1 %v1066_v51  ;;  %2236 = vmatprep.subr.mxu0 %v1001_v52  ;;  %v1098_v51 = vld [vmem:[#allocation5 + $0x1f10] sm:$0xff]  ;;  %v1033_v52 = vld [vmem:[#allocation5 + $0x1d08] sm:$0xff] }
 0x219   :  { %2313 = vmatprep.subr.mxu1 %v1065_v53  ;;  %2237 = vmatpush1.msra.mxu0 %v1000_v54  ;;  %v1097_v53 = vld [vmem:[#allocation5 + $0x1f08] sm:$0xff]  ;;  %v1032_v54 = vld [vmem:[#allocation5 + $0x1d00] sm:$0xff] }
 0x21a   :  { %2314 = vmatpush1.msra.mxu1 %v1064_v55  ;;  %2238 = vmatprep.subr.mxu0 %v1063_v56  ;;  %v69_v55 = vld [vmem:[#allocation2 + $0xe8] sm:$0xff]  ;;  %v1096_v56 = vld [vmem:[#allocation5 + $0x1f00] sm:$0xff] }
 0x21b   :  { %2315 = vmatprep.subr.mxu1 %v1127_v57  ;;  %2239 = vmatpush2.msra.mxu0 %v1062_v58  ;;  %v71_v57 = vld [vmem:[#allocation2 + $0xf8] sm:$0xff]  ;;  %v68_v58 = vld [vmem:[#allocation2 + $0xe0] sm:$0xff] }
 0x21c   :  { %2316 = vmatpush2.msra.mxu1 %v1126_v59  ;;  %2240 = vmatprep.subr.mxu0 %v1061_v60  ;;  %v70_v59 = vld [vmem:[#allocation2 + $0xf0] sm:$0xff]  ;;  %v101_v60 = vld [vmem:[#allocation2 + $0x1e8] sm:$0xff] }
 0x21d   :  { %2317 = vmatprep.subr.mxu1 %v1125_v61  ;;  %2241 = vmatpush2.msra.mxu0 %v1060_v62  ;;  %v103_v61 = vld [vmem:[#allocation2 + $0x1f8] sm:$0xff]  ;;  %v100_v62 = vld [vmem:[#allocation2 + $0x1e0] sm:$0xff] }
 0x21e   :  { %2318 = vmatpush2.msra.mxu1 %v1124_v63  ;;  %2242 = vmatprep.subr.mxu0 %v1059_v0  ;;  %v102_v63 = vld [vmem:[#allocation2 + $0x1f0] sm:$0xff]  ;;  %v1194_v0 = vpop.f32.mrf.mxu0 }
 0x21f   :  { %2319 = vmatprep.subr.mxu1 %v1123_v1  ;;  %2243 = vmatpush2.msra.mxu0 %v1058_v2  ;;  %v1271_v1 = vpop.f32.mrf.mxu1 }
 0x220   :  { %2320 = vmatpush2.msra.mxu1 %v1122_v3  ;;  %2244 = vmatprep.subr.mxu0 %v1057_v4  ;;  %v1196_v2 = vpop.f32.mrf.mxu0 }
 0x221   :  { %2321 = vmatprep.subr.mxu1 %v1121_v5  ;;  %2245 = vmatpush2.msra.mxu0 %v1056_v6  ;;  %v1273_v3 = vpop.f32.mrf.mxu1 }
 0x222   :  { %2322 = vmatpush2.msra.mxu1 %v1120_v7  ;;  %2246 = vmatprep.subr.mxu0 %v1055_v8  ;;  %v1200_v4 = vpop.f32.mrf.mxu0 }
 0x223   :  { %2323 = vmatprep.subr.mxu1 %v1119_v9  ;;  %2247 = vmatpush2.msra.mxu0 %v1054_v10  ;;  %v1277_v5 = vpop.f32.mrf.mxu1 }
 0x224   :  { %2324 = vmatpush2.msra.mxu1 %v1118_v11  ;;  %2248 = vmatprep.subr.mxu0 %v1053_v12  ;;  %v1202_v6 = vpop.f32.mrf.mxu0 }
 0x225   :  { %2325 = vmatprep.subr.mxu1 %v1117_v13  ;;  %2249 = vmatpush2.msra.mxu0 %v1052_v14  ;;  %v1279_v7 = vpop.f32.mrf.mxu1 }
 0x226   :  { %2326 = vmatpush2.msra.mxu1 %v1116_v15  ;;  %2250 = vmatprep.subr.mxu0 %v1051_v16  ;;  %v1348_v8 = vpop.f32.mrf.mxu0 }
 0x227   :  { %2327 = vmatprep.subr.mxu1 %v1115_v17  ;;  %2251 = vmatpush2.msra.mxu0 %v1050_v18  ;;  %v1425_v9 = vpop.f32.mrf.mxu1 }
 0x228   :  { %2328 = vmatpush2.msra.mxu1 %v1114_v19  ;;  %2252 = vmatprep.subr.mxu0 %v1049_v20  ;;  %v1350_v10 = vpop.f32.mrf.mxu0 }
 0x229   :  { %2329 = vmatprep.subr.mxu1 %v1113_v21  ;;  %2253 = vmatpush2.msra.mxu0 %v1048_v22  ;;  %v1427_v11 = vpop.f32.mrf.mxu1 }
 0x22a   :  { %2330 = vmatpush2.msra.mxu1 %v1112_v23  ;;  %2254 = vmatprep.subr.mxu0 %v1047_v24  ;;  %v1354_v12 = vpop.f32.mrf.mxu0 }
 0x22b   :  { %2331 = vmatprep.subr.mxu1 %v1111_v25  ;;  %2255 = vmatpush2.msra.mxu0 %v1046_v26  ;;  %v1431_v13 = vpop.f32.mrf.mxu1 }
 0x22c   :  { %2332 = vmatpush2.msra.mxu1 %v1110_v27  ;;  %2256 = vmatprep.subr.mxu0 %v1045_v28  ;;  %v1356_v14 = vpop.f32.mrf.mxu0 }
 0x22d   :  { %2333 = vmatprep.subr.mxu1 %v1109_v29  ;;  %2257 = vmatpush2.msra.mxu0 %v1044_v30  ;;  %v1433_v15 = vpop.f32.mrf.mxu1 }
 0x22e   :  { %2334 = vmatpush2.msra.mxu1 %v1108_v31  ;;  %2258 = vmatprep.subr.mxu0 %v1043_v32  ;;  %v1502_v16 = vpop.f32.mrf.mxu0 }
 0x22f   :  { %2335 = vmatprep.subr.mxu1 %v1107_v33  ;;  %2259 = vmatpush2.msra.mxu0 %v1042_v34  ;;  %v1579_v17 = vpop.f32.mrf.mxu1 }
 0x230   :  { %2336 = vmatpush2.msra.mxu1 %v1106_v35  ;;  %2260 = vmatprep.subr.mxu0 %v1041_v36  ;;  %v1504_v18 = vpop.f32.mrf.mxu0  ;;  %v1272_v36 = vadd.f32 %v1271_v1, %v1194_v0 }
 0x231   :  { %2337 = vmatprep.subr.mxu1 %v1105_v37  ;;  %2261 = vmatpush2.msra.mxu0 %v1040_v38  ;;  %v1581_v19 = vpop.f32.mrf.mxu1  ;;  %v1274_v37 = vadd.f32 %v1273_v3, %v1196_v2 }
 0x232   :  { %2338 = vmatpush2.msra.mxu1 %v1104_v39  ;;  %2262 = vmatprep.subr.mxu0 %v1039_v40  ;;  %v1508_v20 = vpop.f32.mrf.mxu0  ;;  %v1349_v38 = vadd.f32 %v1348_v8, %v1272_v36 }
 0x233   :  { %2339 = vmatprep.subr.mxu1 %v1103_v41  ;;  %2263 = vmatpush2.msra.mxu0 %v1038_v42  ;;  %v1585_v21 = vpop.f32.mrf.mxu1  ;;  %v1278_v41 = vadd.f32 %v1277_v5, %v1200_v4  ;;  %v1351_v42 = vadd.f32 %v1350_v10, %v1274_v37 }
 0x234   :  { %2340 = vmatpush2.msra.mxu1 %v1102_v43  ;;  %2264 = vmatprep.subr.mxu0 %v1037_v44  ;;  %v1510_v22 = vpop.f32.mrf.mxu0  ;;  %v1280_v43 = vadd.f32 %v1279_v7, %v1202_v6  ;;  %v1426_v44 = vadd.f32 %v1425_v9, %v1349_v38 }
 0x235   :  { %2341 = vmatprep.subr.mxu1 %v1101_v45  ;;  %2265 = vmatpush2.msra.mxu0 %v1036_v46  ;;  %v1587_v23 = vpop.f32.mrf.mxu1  ;;  %v1355_v45 = vadd.f32 %v1354_v12, %v1278_v41 }
 0x236   :  { %2342 = vmatpush2.msra.mxu1 %v1100_v47  ;;  %2266 = vmatprep.subr.mxu0 %v1035_v48  ;;  %v1656_v24 = vpop.f32.mrf.mxu0  ;;  %v1428_v48 = vadd.f32 %v1427_v11, %v1351_v42 }
 0x237   :  { %2343 = vmatprep.subr.mxu1 %v1099_v49  ;;  %2267 = vmatpush2.msra.mxu0 %v1034_v50  ;;  %v1733_v25 = vpop.f32.mrf.mxu1  ;;  %v1357_v49 = vadd.f32 %v1356_v14, %v1280_v43  ;;  %v1503_v50 = vadd.f32 %v1502_v16, %v1426_v44 }
 0x238   :  { %2344 = vmatpush2.msra.mxu1 %v1098_v51  ;;  %2268 = vmatprep.subr.mxu0 %v1033_v52  ;;  %v1658_v26 = vpop.f32.mrf.mxu0 }
 0x239   :  { %2345 = vmatprep.subr.mxu1 %v1097_v53  ;;  %2269 = vmatpush2.msra.mxu0 %v1032_v54  ;;  %v1735_v27 = vpop.f32.mrf.mxu1  ;;  %v1432_v53 = vadd.f32 %v1431_v13, %v1355_v45  ;;  %v1505_v54 = vadd.f32 %v1504_v18, %v1428_v48 }
 0x23a   :  { %2270 = vmatprep.mubr.f32.mxu0 %v69_v55  ;;  %2346 = vmatpush2.msra.mxu1 %v1096_v56  ;;  %v1662_v28 = vpop.f32.mrf.mxu0  ;;  %v1434_v55 = vadd.f32 %v1433_v15, %v1357_v49  ;;  %v1580_v56 = vadd.f32 %v1579_v17, %v1503_v50 }
 0x23b   :  { %2347 = vmatprep.mubr.f32.mxu1 %v71_v57  ;;  %2271 = vmatmul.mubr.f32.vlgmr.msra.gmra.mxu0 %v68_v58  ;;  %v1739_v29 = vpop.f32.mrf.mxu1  ;;  %v1509_v57 = vadd.f32 %v1508_v20, %v1432_v53 }
 0x23c   :  { %2348 = vmatmul.mubr.f32.vlgmr.msra.gmra.mxu1 %v70_v59  ;;  %2276 = vmatprep.mubr.f32.mxu0 %v101_v60  ;;  %v1664_v30 = vpop.f32.mrf.mxu0  ;;  %v1582_v60 = vadd.f32 %v1581_v19, %v1505_v54 }
 0x23d   :  { %2353 = vmatprep.mubr.f32.mxu1 %v103_v61  ;;  %v1741_v31 = vpop.f32.mrf.mxu1  ;;  %v1511_v61 = vadd.f32 %v1510_v22, %v1434_v55 }
 0x23e   :  { %v1810_v32 = vpop.f32.mrf.mxu0  ;;  %v1659_v0 = vadd.f32 %v1658_v26, %v1582_v60 }
 0x23f   :  { %2277 = vmatmul.mubr.f32.gmra.mxu0 %v100_v62  ;;  %v1887_v33 = vpop.f32.mrf.mxu1  ;;  %v1657_v62 = vadd.f32 %v1656_v24, %v1580_v56  ;;  %v1588_v3 = vadd.f32 %v1587_v23, %v1511_v61 }
 0x240   :  { %2354 = vmatmul.mubr.f32.gmra.mxu1 %v102_v63  ;;  %v1812_v34 = vpop.f32.mrf.mxu0  ;;  %v1586_v63 = vadd.f32 %v1585_v21, %v1509_v57  ;;  %v1736_v6 = vadd.f32 %v1735_v27, %v1659_v0 }
 0x241   :  { %v1889_v35 = vpop.f32.mrf.mxu1  ;;  %v1734_v4 = vadd.f32 %v1733_v25, %v1657_v62  ;;  %v1665_v7 = vadd.f32 %v1664_v30, %v1588_v3 }
 0x242   :  { %v1816_v39 = vpop.f32.mrf.mxu0  ;;  %v1663_v5 = vadd.f32 %v1662_v28, %v1586_v63  ;;  %v1813_v12 = vadd.f32 %v1812_v34, %v1736_v6 }
 0x243   :  { %v1893_v40 = vpop.f32.mrf.mxu1  ;;  %v1811_v8 = vadd.f32 %v1810_v32, %v1734_v4  ;;  %v1742_v15 = vadd.f32 %v1741_v31, %v1665_v7 }
 0x244   :  { %v1818_v46 = vpop.f32.mrf.mxu0  ;;  %v1740_v11 = vadd.f32 %v1739_v29, %v1663_v5  ;;  %v1890_v18 = vadd.f32 %v1889_v35, %v1813_v12 }
 0x245   :  { %v1895_v47 = vpop.f32.mrf.mxu1  ;;  %v1888_v16 = vadd.f32 %v1887_v33, %v1811_v8  ;;  %v1819_v19 = vadd.f32 %v1818_v46, %v1742_v15 }
 0x246   :  { %v1817_v17 = vadd.f32 %v1816_v39, %v1740_v11 }
 0x247   :  { %v1896_v25 = vadd.f32 %v1895_v47, %v1819_v19 }
 0x248   :  { %v1894_v23 = vadd.f32 %v1893_v40, %v1817_v17 }
 0x273   :  { %v1964_v51 = vpop.f32.mrf.mxu0 }
 0x274   :  { %v1965_v20 = vadd.f32 %v1964_v51, %v1888_v16 }
 0x275   :  { %v2041_v52 = vpop.f32.mrf.mxu1  ;;  %v1966_v58 = vpop.f32.mrf.mxu0 }
 0x276   :  { %v1967_v24 = vadd.f32 %v1966_v58, %v1890_v18  ;;  %v2042_v26 = vadd.f32 %v2041_v52, %v1965_v20 }
 0x277   :  { %v2043_v59 = vpop.f32.mrf.mxu1 }
 0x278   :  { %v2044_v32 = vadd.f32 %v2043_v59, %v1967_v24 }
 0x279   :  { %v1970_v1 = vpop.f32.mrf.mxu0 }
 0x27a   :  { %v1971_v27 = vadd.f32 %v1970_v1, %v1894_v23 }
 0x27b   :  { %v1972_v9 = vpop.f32.mrf.mxu0 }
 0x27c   :  { %v2047_v2 = vpop.f32.mrf.mxu1  ;;  %v1973_v29 = vadd.f32 %v1972_v9, %v1896_v25 }
 0x27d   :  { %v2048_v36 = vadd.f32 %v2047_v2, %v1971_v27 }
 0x27e   :  { %v2049_v10 = vpop.f32.mrf.mxu1 }
 0x27f   :  { %v2050_v38 = vadd.f32 %v2049_v10, %v1973_v29 }
 0x2b7   :  { %v2118_v13 = vpop.f32.mrf.mxu0 }
 0x2b8   :  { %v2119_v34 = vadd.f32 %v2118_v13, %v2042_v26 }
 0x2b9   :  { %v2195_v14 = vpop.f32.mrf.mxu1  ;;  %v2120_v21 = vpop.f32.mrf.mxu0 }
 0x2ba   :  { %v2121_v37 = vadd.f32 %v2120_v21, %v2044_v32  ;;  %v2196_v35 = vadd.f32 %v2195_v14, %v2119_v34 }
 0x2bb   :  { %v2197_v22 = vpop.f32.mrf.mxu1 }
 0x2bc   :  { %v2198_v43 = vadd.f32 %v2197_v22, %v2121_v37 }
 0x2bd   :  { %v2124_v28 = vpop.f32.mrf.mxu0 }
 0x2be   :  { %v2125_v39 = vadd.f32 %v2124_v28, %v2048_v36 }
 0x2bf   :  { %v2126_v31 = vpop.f32.mrf.mxu0 }
 0x2c0   :  { %v2201_v30 = vpop.f32.mrf.mxu1  ;;  %v2127_v40 = vadd.f32 %v2126_v31, %v2050_v38 }
 0x2c1   :  { %v2202_v47 = vadd.f32 %v2201_v30, %v2125_v39 }
 0x2c2   :  { %v2203_v33 = vpop.f32.mrf.mxu1 }
 0x2c3   :  { %v2204_v52 = vadd.f32 %v2203_v33, %v2127_v40 }
 0x2fb   :  { %v2272_v41 = vpop.f32.mrf.mxu0 }
 0x2fc   :  { %v2349_v42 = vpop.f32.mrf.mxu1  ;;  %v2273_v44 = vadd.f32 %v2272_v41, %v2196_v35 }
 0x2fd   :  { %v2274_v45 = vpop.f32.mrf.mxu0 }
 0x2fe   :  { %v2351_v46 = vpop.f32.mrf.mxu1  ;;  %v2350_v48 = vadd.f32 %v2349_v42, %v2273_v44  ;;  %v2275_v49 = vadd.f32 %v2274_v45, %v2198_v43 }
 0x2ff   :  { %v2278_v50 = vpop.f32.mrf.mxu0 }
 0x300   :  { %v2355_v51 = vpop.f32.mrf.mxu1  ;;  %2360 = vst [vmem:[#allocation7] sm:$0xff] %v2350_v48  ;;  %v2352_v53 = vadd.f32 %v2351_v46, %v2275_v49  ;;  %v2279_v54 = vadd.f32 %v2278_v50, %v2202_v47 }
 0x301   :  { %v2280_v55 = vpop.f32.mrf.mxu0 }
 0x302   :  { %2361 = vst [vmem:[#allocation7 + $0x8] sm:$0xff] %v2352_v53  ;;  %v2356_v56 = vadd.f32 %v2355_v51, %v2279_v54  ;;  %v2281_v57 = vadd.f32 %v2280_v55, %v2204_v52  ;;  %v2357_v58 = vpop.f32.mrf.mxu1 }
 0x304   :  { %2362 = vst [vmem:[#allocation7 + $0x10] sm:$0xff] %v2356_v56  ;;  %v2358_v59 = vadd.f32 %v2357_v58, %v2281_v57 }
 0x306   :  { %2363 = vst [vmem:[#allocation7 + $0x18] sm:$0xff] %v2358_v59 }
 0x307   :  { %2439 = shalt.err (!%p2436_p0)
}
 0x308   :  { %2375 = dma.vmem_to_hbm [thread:$0]  %s2370_s1, 512, %s2493_s2, [#allocation4], %s2456_s13, %s2456_s13, %s2458_s19  }
 0x309   :  { %2452 = dma.done.wait [#allocation4], 512  }
 0x30a   :  { %2453 = vsyncadd [#allocation4], 4294966784 }
 0x30b   :  { %2379 = vsyncpa [#allocation3], 1 }
 0x30c   :  { %2380 = vsyncpa [#allocation6], 1 }
 0x30d   :  { %2381 = vsyncpa [#allocation4], 1 }

</bundles_post_ra>
